<compile_context>
chip_gen: v7x
topology: tpu7x:2x2x1
jax: 0.10.0
libtpu: 0.0.40
codegen_flags: <defaults>
</compile_context>

<pallas_src>
import math

import jax
import jax.numpy as jnp
from jax.experimental import pallas as pl
from jax.experimental.pallas import tpu as pltpu


# ----------------------------------------------------------------------------
# Pallas kernel: fused (conv1x1 + BN + ReLU) x2 for all frames of one batch
# element and one tile of depth slices, MXU channel mix, single dense store.
# ----------------------------------------------------------------------------
def _feature_mix_kernel(x_ref, w1_ref, b1_ref, w2_ref, b2_ref, o_ref):
    # x_ref : (cf, cin, ts)   VMEM  input tile: td depth slices flattened with
    #                               H*W into ts = td*H*W lanes
    # w1_ref: (cmid, cin)     VMEM  conv1 weight * BN1 scale (transposed)
    # b1_ref: (cmid, 1)       VMEM  conv1 bias folded with BN1
    # w2_ref: (1, cmid)       VMEM  conv2 weight * BN2 scale
    # b2_ref: (1, 1)          VMEM  conv2 bias folded with BN2
    # o_ref : (td*cf, hw)     VMEM  output tile, rows ordered (depth, frame)
    cf = x_ref.shape[0]
    tdcf, hw = o_ref.shape
    td = tdcf // cf

    ys = []
    for f in range(cf):                              # static, small (c_frames)
        # conv1 + bn1 + relu -> (cmid, ts), channel contraction on the MXU
        h = jnp.dot(w1_ref[...], x_ref[f],
                    preferred_element_type=jnp.float32,
                    precision=jax.lax.Precision.HIGHEST)
        h = jnp.maximum(h + b1_ref[...], 0.0)
        # conv2 + bn2 + relu -> (1, ts), second small dot on the MXU
        y = jnp.dot(w2_ref[...], h,
                    preferred_element_type=jnp.float32,
                    precision=jax.lax.Precision.HIGHEST)
        y = jnp.maximum(y + b2_ref[...], 0.0)
        ys.append(y.reshape(td, hw))

    # Interleave frames with depth: (td, cf, hw) -> (td*cf, hw), one dense
    # full-block store (lane dim H*W, no masked per-frame stores).
    out = jnp.stack(ys, axis=1).reshape(tdcf, hw)
    o_ref[...] = out.astype(o_ref.dtype)


# ----------------------------------------------------------------------------
# Tiling helpers
# ----------------------------------------------------------------------------
def _vmem_budget():
    """(vmem_limit_bytes, block_working_set_budget) sized per TPU generation."""
    try:
        cap = pltpu.get_tpu_info().vmem_capacity_bytes
    except Exception:
        cap = 64 * 1024 * 1024                       # conservative (v7x) default
    limit = min(cap // 2, 64 * 1024 * 1024)          # 32 MiB on v7x, 64 MiB v5e/v6e
    budget = min(limit // 2, 24 * 1024 * 1024)       # double-buffered blocks + temps
    return limit, budget


def _pick_depth_tile(d, hw, cf, cin, cmid, budget_bytes):
    """Largest depth tile td (dividing D) whose double-buffered input/output
    blocks plus f32 temporaries fit in budget_bytes, subject to TPU layout
    legality (lane dim multiple of 128 / sublane dim multiple of 8, unless the
    block spans the full extent)."""
    itemsize = 4
    per_depth = hw * itemsize * (2 * cf * cin        # 2x buffered input block
                                 + 2 * cf            # 2x buffered output block
                                 + cmid + 2 * cf)    # f32 temporaries (h, y, out)
    valid = []
    for td in range(1, d + 1):
        if d % td:
            continue
        ts = td * hw
        lane_ok = (ts % 128 == 0) or (td == d)
        sub_ok = ((td * cf) % 8 == 0) or (td == d)
        if lane_ok and sub_ok:
            valid.append(td)
    fitting = [td for td in valid if td * per_depth <= budget_bytes]
    return max(fitting) if fitting else min(valid)


# ----------------------------------------------------------------------------
# Forward wrapper
# ----------------------------------------------------------------------------
def feature_mix_forward(params, x):
    """x: (B, c_frames, Cin, D, H, W)  ->  (B, D, c_frames, H, W)."""
    b, cf, cin, d, h, w = x.shape
    hw = h * w
    s_total = d * hw
    cmid = params["w1t"].shape[0]

    x4 = x.reshape(b, cf, cin, s_total)              # contiguous reshape (free)

    vmem_limit, budget = _vmem_budget()
    td = _pick_depth_tile(d, hw, cf, cin, cmid, budget)
    ts = td * hw
    n_blocks = s_total // ts

    # Both grid axes are parallel; put the longer one first so megacore (v7x,
    # 2 TCs/chip) has >= 2 blocks to shard.  Single-TC chips ignore the order.
    if b >= n_blocks:
        grid = (b, n_blocks)
        x_map = lambda bi, si: (bi, 0, 0, si)
        o_map = lambda bi, si: (bi, si, 0)
    else:
        grid = (n_blocks, b)
        x_map = lambda si, bi: (bi, 0, 0, si)
        o_map = lambda si, bi: (bi, si, 0)
    p_map = lambda *_: (0, 0)

    itemsize = jnp.dtype(x.dtype).itemsize
    cost = pl.CostEstimate(
        flops=2 * b * cf * s_total * (cin * cmid + cmid),
        transcendentals=0,
        bytes_accessed=(b * cf * cin * s_total + b * cf * s_total) * itemsize
        + sum(int(p.size) for p in params.values()) * 4,
    )

    out = pl.pallas_call(
        _feature_mix_kernel,
        out_shape=jax.ShapeDtypeStruct((b, d * cf, hw), x.dtype),
        grid_spec=pltpu.PrefetchScalarGridSpec(
            num_scalar_prefetch=0,
            grid=grid,
            in_specs=[
                # all frames, all input channels, td depth slices * H*W lanes
                pl.BlockSpec((None, cf, cin, ts), x_map),
                # tiny folded parameters, VMEM-resident (feed the MXU);
                # constant block index -> fetched once, not per grid step
                pl.BlockSpec((cmid, cin), p_map),
                pl.BlockSpec((cmid, 1), p_map),
                pl.BlockSpec((1, cmid), p_map),
                pl.BlockSpec((1, 1), p_map),
            ],
            # one dense (td*cf, H*W) block per step, already frame-interleaved
            out_specs=pl.BlockSpec((None, td * cf, hw), o_map),
        ),
        compiler_params=pltpu.CompilerParams(
            dimension_semantics=("parallel", "parallel"),
            vmem_limit_bytes=vmem_limit,
        ),
        cost_estimate=cost,
    )(x4, params["w1t"], params["b1"], params["w2"], params["b2"])

    # (B, D*cf, H*W) -> (B, D, cf, H, W): contiguous, free.
    return out.reshape(b, d, cf, h, w)


# ----------------------------------------------------------------------------
# Deterministic synthetic parameters (mirrors module __init__ shapes).
# BatchNorm folded in inference mode:
#   scale = gamma / sqrt(var + eps);  bias = beta - mean*scale + conv_bias*scale
# ----------------------------------------------------------------------------
def _bn_fold(key, cout, conv_bias, eps=1e-5):
    kg, kb, km, kv = jax.random.split(key, 4)
    gamma = 1.0 + 0.1 * jax.random.normal(kg, (cout,), jnp.float32)
    beta = 0.1 * jax.random.normal(kb, (cout,), jnp.float32)
    mean = 0.1 * jax.random.normal(km, (cout,), jnp.float32)
    var = 1.0 + 0.1 * jax.random.uniform(kv, (cout,), jnp.float32)
    scale = gamma / jnp.sqrt(var + eps)
    bias = beta - mean * scale + conv_bias * scale
    return scale, bias


def init_feature_mix_params(key, in_channels=5, mid_channels=16):
    k1w, k1b, k1bn, k2w, k2b, k2bn = jax.random.split(key, 6)

    std1 = 1.0 / math.sqrt(in_channels)
    w1 = std1 * jax.random.normal(k1w, (in_channels, mid_channels), jnp.float32)
    cb1 = std1 * jax.random.normal(k1b, (mid_channels,), jnp.float32)
    s1, b1 = _bn_fold(k1bn, mid_channels, cb1)

    std2 = 1.0 / math.sqrt(mid_channels)
    w2 = std2 * jax.random.normal(k2w, (mid_channels,), jnp.float32)
    cb2 = std2 * jax.random.normal(k2b, (1,), jnp.float32)
    s2, b2 = _bn_fold(k2bn, 1, cb2)

    return {
        "w1t": (w1 * s1[None, :]).T,                     # (cmid, cin)
        "b1": b1.reshape(mid_channels, 1),               # (cmid, 1)
        "w2": (w2 * s2[0]).reshape(1, mid_channels),     # (1, cmid)
        "b2": b2.reshape(1, 1),                          # (1, 1)
    }


# ----------------------------------------------------------------------------
# Pure-JAX reference (correctness check against the Pallas kernel)
# ----------------------------------------------------------------------------
def feature_mix_reference(params, x):
    xt = jnp.moveaxis(x, 2, -1)                                   # (B,cf,D,H,W,cin)
    h = jnp.einsum('...c,kc->...k', xt, params["w1t"],
                   precision=jax.lax.Precision.HIGHEST)
    h = jnp.maximum(h + params["b1"][:, 0], 0.0)
    y = jnp.einsum('...k,k->...', h, params["w2"][0],
                   precision=jax.lax.Precision.HIGHEST)
    y = jnp.maximum(y + params["b2"][0, 0], 0.0)                  # (B,cf,D,H,W)
    return jnp.transpose(y, (0, 2, 1, 3, 4))                      # (B,D,cf,H,W)


# ----------------------------------------------------------------------------
if __name__ == "__main__":
    key = jax.random.PRNGKey(0)
    k_params, k_input = jax.random.split(key)

    B, C_FRAMES, CIN, D, H, W = 2, 2, 5, 8, 16, 16
    params = init_feature_mix_params(k_params, in_channels=CIN, mid_channels=16)

    x = jax.random.normal(k_input, (B, C_FRAMES, CIN, D, H, W), jnp.float32)

    fwd = jax.jit(feature_mix_forward)
    out = fwd(params, x)
    jax.block_until_ready(out)

    assert out.shape == (B, D, C_FRAMES, H, W), out.shape
    assert bool(jnp.all(jnp.isfinite(out)))

    ref = feature_mix_reference(params, x)
    max_err = float(jnp.max(jnp.abs(out - ref)))
    assert max_err < 1e-3, f"mismatch vs reference: {max_err}"

    print("KERNEL_OK")
</pallas_src>

<mosaic_0001>
module attributes {stable_mosaic.version = 11 : i64} {
  func.func @_feature_mix_kernel(%arg0: i32, %arg1: i32, %arg2: memref<1x2x5x2048xf32, #tpu.memory_space<vmem>>, %arg3: memref<16x5xf32, #tpu.memory_space<vmem>>, %arg4: memref<16x1xf32, #tpu.memory_space<vmem>>, %arg5: memref<1x16xf32, #tpu.memory_space<vmem>>, %arg6: memref<1x1xf32, #tpu.memory_space<vmem>>, %arg7: memref<1x16x256xf32, #tpu.memory_space<vmem>>) attributes {dimension_semantics = [#tpu.dimension_semantics<parallel>, #tpu.dimension_semantics<parallel>], iteration_bounds = array<i64: 2, 1>, scalar_prefetch = 0 : i64, scratch_operands = 0 : i64, tpu.core_type = #tpu.core_type<tc>, window_params = [{transform_indices = @transform_0, window_bounds = array<i64: 1, 2, 5, 2048>}, {pipeline_mode = #tpu.pipeline_mode<synchronous>, transform_indices = @transform_1, window_bounds = array<i64: 16, 5>}, {pipeline_mode = #tpu.pipeline_mode<synchronous>, transform_indices = @transform_2, window_bounds = array<i64: 16, 1>}, {pipeline_mode = #tpu.pipeline_mode<synchronous>, transform_indices = @transform_3, window_bounds = array<i64: 1, 16>}, {pipeline_mode = #tpu.pipeline_mode<synchronous>, transform_indices = @transform_4, window_bounds = array<i64: 1, 1>}, {transform_indices = @transform_5, window_bounds = array<i64: 1, 16, 256>}]} {
    %c0 = arith.constant 0 : index
    %c0_0 = arith.constant 0 : index
    %0 = vector.load %arg3[%c0, %c0_0] : memref<16x5xf32, #tpu.memory_space<vmem>>, vector<16x5xf32>
    %c0_1 = arith.constant 0 : index
    %c0_2 = arith.constant 0 : index
    %c0_3 = arith.constant 0 : index
    %c0_4 = arith.constant 0 : index
    %1 = vector.load %arg2[%c0_1, %c0_2, %c0_3, %c0_4] : memref<1x2x5x2048xf32, #tpu.memory_space<vmem>>, vector<1x1x5x2048xf32>
    %2 = vector.shape_cast %1 : vector<1x1x5x2048xf32> to vector<5x2048xf32>
    %cst = arith.constant dense<0.000000e+00> : vector<16x2048xf32>
    %3 = tpu.matmul %0, %2, %cst {dimension_numbers = #tpu.dot_dimension_numbers<[1], [0], [0], [1], [0, 0, 1, 1], [], []>, precision = #tpu.contract_precision<fp32>} : vector<16x5xf32>, vector<5x2048xf32>, vector<16x2048xf32> -> vector<16x2048xf32>
    %c0_5 = arith.constant 0 : index
    %c0_6 = arith.constant 0 : index
    %4 = vector.load %arg4[%c0_5, %c0_6] : memref<16x1xf32, #tpu.memory_space<vmem>>, vector<16x1xf32>
    %5 = vector.broadcast %4 : vector<16x1xf32> to vector<16x2048xf32>
    %6 = arith.addf %3, %5 : vector<16x2048xf32>
    %cst_7 = arith.constant 0.000000e+00 : f32
    %7 = vector.broadcast %cst_7 : f32 to vector<16x2048xf32>
    %8 = arith.maximumf %6, %7 : vector<16x2048xf32>
    %c0_8 = arith.constant 0 : index
    %c0_9 = arith.constant 0 : index
    %9 = vector.load %arg5[%c0_8, %c0_9] : memref<1x16xf32, #tpu.memory_space<vmem>>, vector<1x16xf32>
    %cst_10 = arith.constant dense<0.000000e+00> : vector<1x2048xf32>
    %10 = tpu.matmul %9, %8, %cst_10 {dimension_numbers = #tpu.dot_dimension_numbers<[1], [0], [0], [1], [0, 0, 1, 1], [], []>, precision = #tpu.contract_precision<fp32>} : vector<1x16xf32>, vector<16x2048xf32>, vector<1x2048xf32> -> vector<1x2048xf32>
    %c0_11 = arith.constant 0 : index
    %c0_12 = arith.constant 0 : index
    %11 = vector.load %arg6[%c0_11, %c0_12] : memref<1x1xf32, #tpu.memory_space<vmem>>, vector<1x1xf32>
    %12 = vector.broadcast %11 : vector<1x1xf32> to vector<1x2048xf32>
    %13 = arith.addf %10, %12 : vector<1x2048xf32>
    %cst_13 = arith.constant 0.000000e+00 : f32
    %14 = vector.broadcast %cst_13 : f32 to vector<1x2048xf32>
    %15 = arith.maximumf %13, %14 : vector<1x2048xf32>
    %16 = vector.shape_cast %15 : vector<1x2048xf32> to vector<8x256xf32>
    %c0_14 = arith.constant 0 : index
    %c0_15 = arith.constant 0 : index
    %17 = vector.load %arg3[%c0_14, %c0_15] : memref<16x5xf32, #tpu.memory_space<vmem>>, vector<16x5xf32>
    %c0_16 = arith.constant 0 : index
    %c1 = arith.constant 1 : index
    %c0_17 = arith.constant 0 : index
    %c0_18 = arith.constant 0 : index
    %18 = vector.load %arg2[%c0_16, %c1, %c0_17, %c0_18] : memref<1x2x5x2048xf32, #tpu.memory_space<vmem>>, vector<1x1x5x2048xf32>
    %19 = vector.shape_cast %18 : vector<1x1x5x2048xf32> to vector<5x2048xf32>
    %cst_19 = arith.constant dense<0.000000e+00> : vector<16x2048xf32>
    %20 = tpu.matmul %17, %19, %cst_19 {dimension_numbers = #tpu.dot_dimension_numbers<[1], [0], [0], [1], [0, 0, 1, 1], [], []>, precision = #tpu.contract_precision<fp32>} : vector<16x5xf32>, vector<5x2048xf32>, vector<16x2048xf32> -> vector<16x2048xf32>
    %c0_20 = arith.constant 0 : index
    %c0_21 = arith.constant 0 : index
    %21 = vector.load %arg4[%c0_20, %c0_21] : memref<16x1xf32, #tpu.memory_space<vmem>>, vector<16x1xf32>
    %22 = vector.broadcast %21 : vector<16x1xf32> to vector<16x2048xf32>
    %23 = arith.addf %20, %22 : vector<16x2048xf32>
    %cst_22 = arith.constant 0.000000e+00 : f32
    %24 = vector.broadcast %cst_22 : f32 to vector<16x2048xf32>
    %25 = arith.maximumf %23, %24 : vector<16x2048xf32>
    %c0_23 = arith.constant 0 : index
    %c0_24 = arith.constant 0 : index
    %26 = vector.load %arg5[%c0_23, %c0_24] : memref<1x16xf32, #tpu.memory_space<vmem>>, vector<1x16xf32>
    %cst_25 = arith.constant dense<0.000000e+00> : vector<1x2048xf32>
    %27 = tpu.matmul %26, %25, %cst_25 {dimension_numbers = #tpu.dot_dimension_numbers<[1], [0], [0], [1], [0, 0, 1, 1], [], []>, precision = #tpu.contract_precision<fp32>} : vector<1x16xf32>, vector<16x2048xf32>, vector<1x2048xf32> -> vector<1x2048xf32>
    %c0_26 = arith.constant 0 : index
    %c0_27 = arith.constant 0 : index
    %28 = vector.load %arg6[%c0_26, %c0_27] : memref<1x1xf32, #tpu.memory_space<vmem>>, vector<1x1xf32>
    %29 = vector.broadcast %28 : vector<1x1xf32> to vector<1x2048xf32>
    %30 = arith.addf %27, %29 : vector<1x2048xf32>
    %cst_28 = arith.constant 0.000000e+00 : f32
    %31 = vector.broadcast %cst_28 : f32 to vector<1x2048xf32>
    %32 = arith.maximumf %30, %31 : vector<1x2048xf32>
    %33 = vector.shape_cast %32 : vector<1x2048xf32> to vector<8x256xf32>
    %34 = vector.shape_cast %16 : vector<8x256xf32> to vector<8x1x256xf32>
    %35 = vector.shape_cast %33 : vector<8x256xf32> to vector<8x1x256xf32>
    %36 = tpu.concatenate %34, %35 in 1 : vector<8x1x256xf32>, vector<8x1x256xf32> -> vector<8x2x256xf32>
    %37 = vector.shape_cast %36 : vector<8x2x256xf32> to vector<16x256xf32>
    %c0_29 = arith.constant 0 : index
    %c0_30 = arith.constant 0 : index
    %c0_31 = arith.constant 0 : index
    %38 = vector.load %arg7[%c0_29, %c0_30, %c0_31] : memref<1x16x256xf32, #tpu.memory_space<vmem>>, vector<1x16x256xf32>
    %39 = vector.shape_cast %38 : vector<1x16x256xf32> to vector<16x256xf32>
    %40 = vector.shape_cast %37 : vector<16x256xf32> to vector<1x16x256xf32>
    tpu.vector_store %arg7[%c0_29, %c0_30, %c0_31], %40 {strides = array<i32>} : memref<1x16x256xf32, #tpu.memory_space<vmem>>, vector<1x16x256xf32>,
    return
  }
  func.func @transform_0(%arg0: i32, %arg1: i32) -> (i32, i32, i32, i32) {
    %c0_i32 = arith.constant 0 : i32
    %c0_i32_0 = arith.constant 0 : i32
    %c0_i32_1 = arith.constant 0 : i32
    return %arg0, %c0_i32, %c0_i32_0, %arg1 : i32, i32, i32, i32
  }
  func.func @transform_1(%arg0: i32, %arg1: i32) -> (i32, i32) {
    %c0_i32 = arith.constant 0 : i32
    %c0_i32_0 = arith.constant 0 : i32
    %c0_i32_1 = arith.constant 0 : i32
    return %c0_i32, %c0_i32_0 : i32, i32
  }
  func.func @transform_2(%arg0: i32, %arg1: i32) -> (i32, i32) {
    %c0_i32 = arith.constant 0 : i32
    %c0_i32_0 = arith.constant 0 : i32
    %c0_i32_1 = arith.constant 0 : i32
    return %c0_i32, %c0_i32_0 : i32, i32
  }
  func.func @transform_3(%arg0: i32, %arg1: i32) -> (i32, i32) {
    %c0_i32 = arith.constant 0 : i32
    %c0_i32_0 = arith.constant 0 : i32
    %c0_i32_1 = arith.constant 0 : i32
    return %c0_i32, %c0_i32_0 : i32, i32
  }
  func.func @transform_4(%arg0: i32, %arg1: i32) -> (i32, i32) {
    %c0_i32 = arith.constant 0 : i32
    %c0_i32_0 = arith.constant 0 : i32
    %c0_i32_1 = arith.constant 0 : i32
    return %c0_i32, %c0_i32_0 : i32, i32
  }
  func.func @transform_5(%arg0: i32, %arg1: i32) -> (i32, i32, i32) {
    %c0_i32 = arith.constant 0 : i32
    %c0_i32_0 = arith.constant 0 : i32
    return %arg0, %arg1, %c0_i32 : i32, i32, i32
  }
}

</mosaic_0001>

<bundles_post_ra>
// kernel: feature_mix_forward.1
= control target key start
LH: loop header
LB: loop body
LE: loop exit
PB: predicated region body
PF: predicated region fallthrough
CT: control target
= control target key end

     0   :  { %s18002_s20 = smov 0   ;;  %s18004_s21 = smov 0   ;;  %s19668_s0 = inlined_call_operand.vmem [shape: f32[2,2,5,2048], index: 0, kind: input, shape index: {}]   ;;  %s19669_s1 = inlined_call_operand.vmem [shape: f32[16,5], index: 1, kind: input, shape index: {}]   ;;  %s19670_s2 = inlined_call_operand.vmem [shape: f32[16,1], index: 2, kind: input, shape index: {}]   ;;  %s19671_s3 = inlined_call_operand.vmem [shape: f32[1,16], index: 3, kind: input, shape index: {}]   ;;  %s19672_s4 = inlined_call_operand.<no memory space> [shape: f32[1,1], index: 4, kind: input, shape index: {}]   ;;  %s19673_s5 = inlined_call_operand.vmem [shape: f32[2,16,256], index: 5, kind: output, shape index: {}]  }
   0x1   :  { %v10_v0 = vstv %s19672_s4  ;;  %s18006_s22 = smov 0  }
   0x2   :  { %11 = vst [vmem:[#allocation2] sm:$0x1] %v10_v0 }
   0x3 LB: > { %s29_s4 = sadd.s32 1, %s17960_s21  ;;  %p16928_p0 = scmp.ge.s32.totalorder %s17964_s22, 1  ;;  %s17964_s22 = sphi %s18006_s22, %s17_s22   ;;  %s17960_s21 = sphi %s18004_s21, %s19675_s21   ;;  %s17956_s20 = sphi %s18002_s20, %s19674_s20  }
   0x4   : > { %p31_p1 = scmp.ge.s32.totalorder %s29_s4, 2  ;;  %p210_p2 = scmp.lt.s32.totalorder %s17964_s22, 3 }
   0x6   : > { %s19677_s4 = smov (%p31_p1, %s29_s4), 0  ;;  %p211_p3 = pnand %p16928_p0, %p210_p2 }
   0x7   : > { %p248_p4 = scmp.lt.s32.totalorder (!%p211_p3), %s17956_s20, 1  ;;  %v268_v1 = vld [vmem:[%s19669_s1] sm:$0xff] (!%p211_p3)  ;;  %vm298_vm0 = vcmask (!%p211_p3), 39936   ;;  %v269_v2 = vld [vmem:[%s19669_s1 + $0x8] sm:$0xff] (!%p211_p3)  ;;  %v17966_v3 = vmov (!%p211_p3), 0.0   ;;  %vm305_vm1 = vcmask (!%p211_p3), 1044480  }
   0x8   : > { %214 = sbr.rel (%p211_p3) target bundleno = 1169 (0x491), region = 40  ;;  %420 = vmatprep.mubr.f32.mxu0 (!%p211_p3), %v17966_v3  ;;  %934 = vmatprep.mubr.f32.mxu1 (!%p211_p3), %v17966_v3  ;;  %v300_v4 = vsel (!%p211_p3), %vm298_vm0, %v268_v1, 0  ;;  %v303_v5 = vsel (!%p211_p3), %vm298_vm0, %v269_v2, 0  ;;  %v17967_v13 = vmov (!%p211_p3), 0   ;;  %v286_v26 = vld [vmem:[%s19670_s2] sm:$0xff] (!%p211_p3)  ;;  %v287_v38 = vld [vmem:[%s19670_s2 + $0x8] sm:$0xff] (!%p211_p3) }
   0x9   : > { %v18030_v6 = vand.u32 (!%p211_p3), 4294901760, %v300_v4  ;;  %v18032_v7 = vand.u32 (!%p211_p3), 4294901760, %v303_v5  ;;  %17940 = vset.pattern.permute.xlu0 (!%p211_p3), %v17967_v13  ;;  %17941 = vset.pattern.permute.xlu1 (!%p211_p3), %v17967_v13  ;;  %vm4509_vm2 = vcmask (!%p211_p3), 130048   ;;  %vm16610_vm3 = vcmask (!%p211_p3), 1040384  }
   0xa   : > { %290 = vperm.xlu0 (!%p211_p3), %17940, %v286_v26  }
   0xb   : > { %v18036_v8 = vsub.f32 (!%p211_p3), %v300_v4, %v18030_v6  ;;  %v18044_v9 = vsub.f32 (!%p211_p3), %v303_v5, %v18032_v7 }
   0xd   : > { %v18054_v18 = vand.u32 (!%p211_p3), 4294901760, %v18036_v8  ;;  %v18068_v25 = vand.u32 (!%p211_p3), 4294901760, %v18044_v9 }
   0xe   : > { %295 = vperm.xlu0 (!%p211_p3), %17940, %v287_v38  }
   0xf   : > { %s19679_s20 = smov (!%p248_p4, %s17956_s20), 1  ;;  %v424_v24 = vsub.f32 %v18036_v8, %v18054_v18  ;;  %v435_v32 = vsub.f32 %v18044_v9, %v18068_v25 }
  0x10   : > { %s16951_s27 = sshll.u32 %s19679_s20, 8  ;;  %s16952_s12 = sshll.u32 %s19679_s20, 5 }
  0x11   : > { %s18041_s30 = scalar_lea.vmem %s19668_s0, %s16951_s27  ;;  %v18085_v31 = vand.u32 4294901760, %v424_v24  ;;  %v18092_v36 = vand.u32 4294901760, %v435_v32  ;;  %s19599_s15 = scalar_lea.vmem %s19673_s5, %s16952_s12 }
  0x12   : > { %v271_v10 = vld [vmem:[%s18041_s30 + $0x8] sm:$0x1f]  ;;  %v273_v11 = vld [vmem:[%s18041_s30 + $0x18] sm:$0x1f]  ;;  %v270_v12 = vld [vmem:[%s18041_s30] sm:$0x1f] }
  0x13   : > { %v310_v14 = vsel %vm305_vm1, %v271_v10, 0  ;;  %v316_v15 = vsel %vm305_vm1, %v273_v11, 0  ;;  %v307_v16 = vsel %vm305_vm1, %v270_v12, 0  ;;  %v272_v17 = vld [vmem:[%s18041_s30 + $0x10] sm:$0x1f] }
  0x14   : > { %v18056_v19 = vand.u32 4294901760, %v310_v14  ;;  %v18058_v20 = vand.u32 4294901760, %v316_v15  ;;  %v18060_v21 = vand.u32 4294901760, %v307_v16  ;;  %v313_v22 = vsel %vm305_vm1, %v272_v17, 0  ;;  %v275_v47 = vld [vmem:[%s18041_s30 + $0x28] sm:$0x1f] }
  0x15   : > { %v18063_v23 = vand.u32 4294901760, %v313_v22  ;;  %v277_v48 = vld [vmem:[%s18041_s30 + $0x38] sm:$0x1f]  ;;  %v322_v49 = vsel %vm305_vm1, %v275_v47, 0  ;;  %v274_v53 = vld [vmem:[%s18041_s30 + $0x20] sm:$0x1f] }
  0x16   : > { %355 = vmatprep.subr.mxu0 %v18056_v19  ;;  %869 = vmatprep.subr.mxu1 %v18058_v20  ;;  %v18076_v27 = vsub.f32 %v307_v16, %v18060_v21  ;;  %v444_v28 = vsub.f32 %v310_v14, %v18056_v19  ;;  %v958_v29 = vsub.f32 %v316_v15, %v18058_v20  ;;  %v328_v50 = vsel %vm305_vm1, %v277_v48, 0  ;;  %v276_v54 = vld [vmem:[%s18041_s30 + $0x30] sm:$0x1f]  ;;  %v279_v16 = vld [vmem:[%s18041_s30 + $0x48] sm:$0x1f] }
  0x17   : > { %357 = vmatpush1.msra.mxu0 %v18060_v21  ;;  %871 = vmatpush1.msra.mxu1 %v18063_v23  ;;  %v18083_v30 = vsub.f32 %v313_v22, %v18063_v23  ;;  %v18134_v51 = vand.u32 4294901760, %v322_v49  ;;  %v18136_v52 = vand.u32 4294901760, %v328_v50  ;;  %v319_v55 = vsel %vm305_vm1, %v274_v53, 0  ;;  %v281_v17 = vld [vmem:[%s18041_s30 + $0x58] sm:$0x1f] }
  0x18   : > { %v445_v33 = vand.u32 4294901760, %v444_v28  ;;  %v959_v34 = vand.u32 4294901760, %v958_v29  ;;  %v451_v35 = vand.u32 4294901760, %v18076_v27  ;;  %426 = vmatmul.mubr.f32.vlgmr.msra.gmra.mrb[0].mxu0 %v18085_v31  ;;  %940 = vmatmul.mubr.f32.vlgmr.msra.gmra.mrb[0].mxu1 %v18085_v31  ;;  %v325_v56 = vsel %vm305_vm1, %v276_v54, 0  ;;  %v280_v24 = vld [vmem:[%s18041_s30 + $0x50] sm:$0x1f] }
  0x19   : > { %v965_v37 = vand.u32 4294901760, %v18083_v30  ;;  %431 = vmatprep.mubr.f32.mxu0 %v17966_v3  ;;  %945 = vmatprep.mubr.f32.mxu1 %v17966_v3  ;;  %v18151_v57 = vsub.f32 %v322_v49, %v18134_v51  ;;  %v18154_v58 = vsub.f32 %v328_v50, %v18136_v52  ;;  %v18160_v59 = vand.u32 4294901760, %v319_v55  ;;  %v283_v48 = vld [vmem:[%s18041_s30 + $0x68] sm:$0x1f]  ;;  %v285_v49 = vld [vmem:[%s18041_s30 + $0x78] sm:$0x1f] }
  0x1a   : > { %v446_v39 = vsub.f32 %v444_v28, %v445_v33  ;;  %v960_v40 = vsub.f32 %v958_v29, %v959_v34  ;;  %v452_v41 = vsub.f32 %v18076_v27, %v451_v35  ;;  %v18162_v60 = vand.u32 4294901760, %v325_v56  ;;  %v282_v54 = vld [vmem:[%s18041_s30 + $0x60] sm:$0x1f] }
  0x1b   : > { %v966_v42 = vsub.f32 %v18083_v30, %v965_v37  ;;  %v1473_v61 = vand.u32 4294901760, %v18151_v57  ;;  %v1987_v62 = vand.u32 4294901760, %v18154_v58  ;;  %v18173_v63 = vsub.f32 %v319_v55, %v18160_v59  ;;  %v284_v55 = vld [vmem:[%s18041_s30 + $0x70] sm:$0x1f] }
  0x1c   : > { %v447_v43 = vand.u32 4294901760, %v446_v39  ;;  %v961_v44 = vand.u32 4294901760, %v960_v40  ;;  %v453_v45 = vand.u32 4294901760, %v452_v41  ;;  %437 = vmatmul.mubr.f32.gmra.mrb[2].mxu0 %v18092_v36  ;;  %951 = vmatmul.mubr.f32.gmra.mrb[2].mxu1 %v18092_v36  ;;  %v18176_v0 = vsub.f32 %v325_v56, %v18162_v60 }
  0x1d   : > { %v967_v46 = vand.u32 4294901760, %v966_v42  ;;  %517 = vmatprep.mubr.f32.mxu0 %v17966_v3  ;;  %1031 = vmatprep.mubr.f32.mxu1 %v17966_v3  ;;  %v1474_v1 = vsub.f32 %v18151_v57, %v1473_v61  ;;  %v1988_v2 = vsub.f32 %v18154_v58, %v1987_v62  ;;  %v1479_v4 = vand.u32 4294901760, %v18173_v63 }
  0x1e   : > { %448 = vmatprep.subr.mxu0 %v447_v43  ;;  %962 = vmatprep.subr.mxu1 %v961_v44  ;;  %v1993_v5 = vand.u32 4294901760, %v18176_v0  ;;  %v346_v50 = vsel %vm305_vm1, %v283_v48, 0  ;;  %v343_v56 = vsel %vm305_vm1, %v282_v54, 0 }
  0x1f   : > { %454 = vmatpush1.msra.mxu0 %v453_v45  ;;  %968 = vmatpush1.msra.mxu1 %v967_v46  ;;  %v1475_v10 = vand.u32 4294901760, %v1474_v1  ;;  %v1989_v11 = vand.u32 4294901760, %v1988_v2  ;;  %v1480_v12 = vsub.f32 %v18173_v63, %v1479_v4 }
  0x20   : > { %519 = vmatmul.mubr.f32.vlgmr.msra.gmra.mrb[0].mxu0 %v18030_v6  ;;  %1033 = vmatmul.mubr.f32.vlgmr.msra.gmra.mrb[0].mxu1 %v18030_v6  ;;  %v1994_v13 = vsub.f32 %v18176_v0, %v1993_v5 }
  0x21   : > { %524 = vmatprep.mubr.f32.mxu0 %v17966_v3  ;;  %1038 = vmatprep.mubr.f32.mxu1 %v17966_v3  ;;  %v1481_v14 = vand.u32 4294901760, %v1480_v12 }
  0x22   : > { %534 = vmatprep.subr.mxu0 %v444_v28  ;;  %1048 = vmatprep.subr.mxu1 %v958_v29  ;;  %v1995_v15 = vand.u32 4294901760, %v1994_v13 }
  0x23   : > { %537 = vmatpush1.msra.mxu0 %v18076_v27  ;;  %1051 = vmatpush1.msra.mxu1 %v18083_v30  ;;  %v337_v27 = vsel %vm305_vm1, %v280_v24, 0 }
  0x24   : > { %526 = vmatmul.mubr.f32.gmra.mrb[2].mxu0 %v18032_v7  ;;  %1040 = vmatmul.mubr.f32.gmra.mrb[2].mxu1 %v18032_v7  ;;  %v18278_v32 = vand.u32 4294901760, %v337_v27 }
  0x25   : > { %600 = vmatprep.mubr.f32.mxu0 %v17966_v3  ;;  %1114 = vmatprep.mubr.f32.mxu1 %v17966_v3 }
  0x26   : > { %618 = vmatprep.subr.mxu0 %v18056_v19  ;;  %1132 = vmatprep.subr.mxu1 %v18058_v20 }
  0x28   : > { %603 = vmatmul.mubr.f32.vlgmr.msra.gmra.mrb[0].mxu0 %v18036_v8  ;;  %1117 = vmatmul.mubr.f32.vlgmr.msra.gmra.mrb[0].mxu1 %v18036_v8 }
  0x29   : > { %608 = vmatprep.mubr.f32.mxu0 %v17966_v3  ;;  %1122 = vmatprep.mubr.f32.mxu1 %v17966_v3 }
  0x2a   : > { %620 = vmatpush1.msra.mxu0 %v18060_v21  ;;  %1134 = vmatpush1.msra.mxu1 %v18063_v23 }
  0x2b   : > { %705 = vmatprep.subr.mxu0 %v445_v33  ;;  %1219 = vmatprep.subr.mxu1 %v959_v34 }
  0x2c   : > { %611 = vmatmul.mubr.f32.gmra.mrb[2].mxu0 %v18044_v9  ;;  %1125 = vmatmul.mubr.f32.gmra.mrb[2].mxu1 %v18044_v9 }
  0x2d   : > { %683 = vmatprep.mubr.f32.mxu0 %v17966_v3  ;;  %1197 = vmatprep.mubr.f32.mxu1 %v17966_v3 }
  0x30   : > { %687 = vmatmul.mubr.f32.vlgmr.msra.gmra.mrb[0].mxu0 %v18054_v18  ;;  %1201 = vmatmul.mubr.f32.vlgmr.msra.gmra.mrb[0].mxu1 %v18054_v18 }
  0x31   : > { %692 = vmatprep.mubr.f32.mxu0 %v17966_v3  ;;  %1206 = vmatprep.mubr.f32.mxu1 %v17966_v3 }
  0x32   : > { %709 = vmatpush1.msra.mxu0 %v451_v35  ;;  %1223 = vmatpush1.msra.mxu1 %v965_v37  ;;  %v18292_v37 = vsub.f32 %v337_v27, %v18278_v32 }
  0x33   : > { %788 = vmatprep.subr.mxu0 %v18056_v19  ;;  %1302 = vmatprep.subr.mxu1 %v18058_v20  ;;  %v334_v19 = vsel %vm305_vm1, %v279_v16, 0  ;;  %v340_v20 = vsel %vm305_vm1, %v281_v17, 0  ;;  %v4498_v17 = vld [vmem:[%s19671_s3] sm:$0x1] }
  0x34   : > { %696 = vmatmul.mubr.f32.gmra.mrb[2].mxu0 %v18068_v25  ;;  %1210 = vmatmul.mubr.f32.gmra.mrb[2].mxu1 %v18068_v25  ;;  %v18250_v22 = vand.u32 4294901760, %v340_v20  ;;  %v3021_v41 = vand.u32 4294901760, %v18292_v37 }
  0x35   : > { %772 = vmatprep.mubr.f32.mxu0 %v17966_v3  ;;  %1286 = vmatprep.mubr.f32.mxu1 %v17966_v3 }
  0x36   : > { %v18270_v29 = vsub.f32 %v340_v20, %v18250_v22  ;;  %v3022_v45 = vsub.f32 %v18292_v37, %v3021_v41 }
  0x38   : > { %774 = vmatmul.mubr.f32.vlgmr.msra.gmra.mrb[0].mxu0 %v18030_v6  ;;  %1288 = vmatmul.mubr.f32.vlgmr.msra.gmra.mrb[0].mxu1 %v18030_v6  ;;  %v3015_v34 = vand.u32 4294901760, %v18270_v29  ;;  %v3023_v47 = vand.u32 4294901760, %v3022_v45 }
  0x39   : > { %779 = vmatprep.mubr.f32.mxu0 %v17966_v3  ;;  %1293 = vmatprep.mubr.f32.mxu1 %v17966_v3 }
  0x3a   : > { %790 = vmatpush1.msra.mxu0 %v18060_v21  ;;  %1304 = vmatpush1.msra.mxu1 %v18063_v23  ;;  %v18248_v21 = vand.u32 4294901760, %v334_v19  ;;  %v278_v23 = vld [vmem:[%s18041_s30 + $0x40] sm:$0x1f]  ;;  %v3016_v39 = vsub.f32 %v18270_v29, %v3015_v34 }
  0x3b   : > { %1383 = vmatprep.subr.mxu0 %v18134_v51  ;;  %1897 = vmatprep.subr.mxu1 %v18136_v52  ;;  %v331_v26 = vsel %vm305_vm1, %v278_v23, 0 }
  0x3c   : > { %781 = vmatmul.mubr.f32.gmra.mrb[2].mxu0 %v18032_v7  ;;  %1295 = vmatmul.mubr.f32.gmra.mrb[2].mxu1 %v18032_v7  ;;  %v18267_v28 = vsub.f32 %v334_v19, %v18248_v21  ;;  %v18276_v30 = vand.u32 4294901760, %v331_v26  ;;  %v3017_v43 = vand.u32 4294901760, %v3016_v39  ;;  %v4511_v19 = vsel %vm4509_vm2, %v4498_v17, 0 }
  0x3d   : > { %853 = vmatprep.mubr.f32.mxu0 %v17966_v3  ;;  %1367 = vmatprep.mubr.f32.mxu1 %v17966_v3  ;;  %v18503_v20 = vand.u32 4294901760, %v4511_v19 }
  0x3e   : > { %v2501_v33 = vand.u32 4294901760, %v18267_v28  ;;  %v18289_v35 = vsub.f32 %v331_v26, %v18276_v30 }
  0x40   : > { %855 = vmatmul.mubr.f32.vlgmr.msra.gmra.mrb[0].mxu0 %v18030_v6  ;;  %1369 = vmatmul.mubr.f32.vlgmr.msra.gmra.mrb[0].mxu1 %v18030_v6  ;;  %v2502_v38 = vsub.f32 %v18267_v28, %v2501_v33  ;;  %v2507_v40 = vand.u32 4294901760, %v18289_v35 }
  0x41   : > { %860 = vmatprep.mubr.f32.mxu0 %v17966_v3  ;;  %1374 = vmatprep.mubr.f32.mxu1 %v17966_v3 }
  0x42   : > { %1385 = vmatpush1.msra.mxu0 %v18160_v59  ;;  %1899 = vmatpush1.msra.mxu1 %v18162_v60  ;;  %v2503_v42 = vand.u32 4294901760, %v2502_v38  ;;  %v2508_v44 = vsub.f32 %v18289_v35, %v2507_v40 }
  0x43   : > { %1476 = vmatprep.subr.mxu0 %v1475_v10  ;;  %1990 = vmatprep.subr.mxu1 %v1989_v11 }
  0x44   : > { %862 = vmatmul.mubr.f32.gmra.mrb[2].mxu0 %v18032_v7  ;;  %1376 = vmatmul.mubr.f32.gmra.mrb[2].mxu1 %v18032_v7  ;;  %v2509_v46 = vand.u32 4294901760, %v2508_v44 }
  0x45   : > { %1448 = vmatprep.mubr.f32.mxu0 %v17966_v3  ;;  %1962 = vmatprep.mubr.f32.mxu1 %v17966_v3 }
  0x48   : > { %1454 = vmatmul.mubr.f32.vlgmr.msra.gmra.mrb[4].mxu0 %v18085_v31  ;;  %1968 = vmatmul.mubr.f32.vlgmr.msra.gmra.mrb[4].mxu1 %v18085_v31 }
  0x49   : > { %1459 = vmatprep.mubr.f32.mxu0 %v17966_v3  ;;  %1973 = vmatprep.mubr.f32.mxu1 %v17966_v3 }
  0x4a   : > { %1482 = vmatpush1.msra.mxu0 %v1481_v14  ;;  %1996 = vmatpush1.msra.mxu1 %v1995_v15 }
  0x4b   : > { %1562 = vmatprep.subr.mxu0 %v18151_v57  ;;  %2076 = vmatprep.subr.mxu1 %v18154_v58  ;;  %v349_v57 = vsel %vm305_vm1, %v284_v55, 0 }
  0x4c   : > { %1465 = vmatmul.mubr.f32.gmra.mrb[6].mxu0 %v18092_v36  ;;  %1979 = vmatmul.mubr.f32.gmra.mrb[6].mxu1 %v18092_v36 }
  0x4d   : > { %1545 = vmatprep.mubr.f32.mxu0 %v17966_v3  ;;  %2059 = vmatprep.mubr.f32.mxu1 %v17966_v3 }
  0x50   : > { %1547 = vmatmul.mubr.f32.vlgmr.msra.gmra.mrb[4].mxu0 %v18030_v6  ;;  %2061 = vmatmul.mubr.f32.vlgmr.msra.gmra.mrb[4].mxu1 %v18030_v6 }
  0x51   : > { %1552 = vmatprep.mubr.f32.mxu0 %v17966_v3  ;;  %2066 = vmatprep.mubr.f32.mxu1 %v17966_v3 }
  0x52   : > { %1565 = vmatpush1.msra.mxu0 %v18173_v63  ;;  %2079 = vmatpush1.msra.mxu1 %v18176_v0 }
  0x53   : > { %1646 = vmatprep.subr.mxu0 %v18134_v51  ;;  %2160 = vmatprep.subr.mxu1 %v18136_v52 }
  0x54   : > { %1554 = vmatmul.mubr.f32.gmra.mrb[6].mxu0 %v18032_v7  ;;  %2068 = vmatmul.mubr.f32.gmra.mrb[6].mxu1 %v18032_v7 }
  0x55   : > { %1628 = vmatprep.mubr.f32.mxu0 %v17966_v3  ;;  %2142 = vmatprep.mubr.f32.mxu1 %v17966_v3 }
  0x58   : > { %1631 = vmatmul.mubr.f32.vlgmr.msra.gmra.mrb[4].mxu0 %v18036_v8  ;;  %2145 = vmatmul.mubr.f32.vlgmr.msra.gmra.mrb[4].mxu1 %v18036_v8 }
  0x59   : > { %1636 = vmatprep.mubr.f32.mxu0 %v17966_v3  ;;  %2150 = vmatprep.mubr.f32.mxu1 %v17966_v3 }
  0x5a   : > { %1648 = vmatpush1.msra.mxu0 %v18160_v59  ;;  %2162 = vmatpush1.msra.mxu1 %v18162_v60 }
  0x5b   : > { %1733 = vmatprep.subr.mxu0 %v1473_v61  ;;  %2247 = vmatprep.subr.mxu1 %v1987_v62  ;;  %v18394_v61 = vand.u32 4294901760, %v349_v57 }
  0x5c   : > { %1639 = vmatmul.mubr.f32.gmra.mrb[6].mxu0 %v18044_v9  ;;  %2153 = vmatmul.mubr.f32.gmra.mrb[6].mxu1 %v18044_v9 }
  0x5d   : > { %1711 = vmatprep.mubr.f32.mxu0 %v17966_v3  ;;  %2225 = vmatprep.mubr.f32.mxu1 %v17966_v3  ;;  %v18408_v1 = vsub.f32 %v349_v57, %v18394_v61 }
  0x5f   : > { %v4049_v10 = vand.u32 4294901760, %v18408_v1 }
  0x60   : > { %1715 = vmatmul.mubr.f32.vlgmr.msra.gmra.mrb[4].mxu0 %v18054_v18  ;;  %2229 = vmatmul.mubr.f32.vlgmr.msra.gmra.mrb[4].mxu1 %v18054_v18 }
  0x61   : > { %1720 = vmatprep.mubr.f32.mxu0 %v17966_v3  ;;  %2234 = vmatprep.mubr.f32.mxu1 %v17966_v3  ;;  %v4050_v14 = vsub.f32 %v18408_v1, %v4049_v10 }
  0x62   : > { %1737 = vmatpush1.msra.mxu0 %v1479_v4  ;;  %2251 = vmatpush1.msra.mxu1 %v1993_v5 }
  0x63   : > { %1816 = vmatprep.subr.mxu0 %v18134_v51  ;;  %2330 = vmatprep.subr.mxu1 %v18136_v52  ;;  %v352_v51 = vsel %vm305_vm1, %v285_v49, 0  ;;  %v18364_v52 = vand.u32 4294901760, %v346_v50  ;;  %v4051_v16 = vand.u32 4294901760, %v4050_v14 }
  0x64   : > { %1724 = vmatmul.mubr.f32.gmra.mrb[6].mxu0 %v18068_v25  ;;  %2238 = vmatmul.mubr.f32.gmra.mrb[6].mxu1 %v18068_v25  ;;  %v18366_v53 = vand.u32 4294901760, %v352_v51 }
  0x65   : > { %1800 = vmatprep.mubr.f32.mxu0 %v17966_v3  ;;  %2314 = vmatprep.mubr.f32.mxu1 %v17966_v3  ;;  %v18383_v58 = vsub.f32 %v346_v50, %v18364_v52 }
  0x67   : > { %v3529_v62 = vand.u32 4294901760, %v18383_v58 }
  0x68   : > { %1802 = vmatmul.mubr.f32.vlgmr.msra.gmra.mrb[4].mxu0 %v18030_v6  ;;  %2316 = vmatmul.mubr.f32.vlgmr.msra.gmra.mrb[4].mxu1 %v18030_v6 }
  0x69   : > { %1807 = vmatprep.mubr.f32.mxu0 %v17966_v3  ;;  %2321 = vmatprep.mubr.f32.mxu1 %v17966_v3  ;;  %v3530_v2 = vsub.f32 %v18383_v58, %v3529_v62 }
  0x6a   : > { %1818 = vmatpush1.msra.mxu0 %v18160_v59  ;;  %2332 = vmatpush1.msra.mxu1 %v18162_v60  ;;  %v18386_v59 = vsub.f32 %v352_v51, %v18366_v53  ;;  %v18392_v60 = vand.u32 4294901760, %v343_v56 }
  0x6b   : > { %2411 = vmatprep.subr.mxu0 %v18248_v21  ;;  %2925 = vmatprep.subr.mxu1 %v18250_v22  ;;  %v3531_v11 = vand.u32 4294901760, %v3530_v2 }
  0x6c   : > { %1809 = vmatmul.mubr.f32.gmra.mrb[6].mxu0 %v18032_v7  ;;  %2323 = vmatmul.mubr.f32.gmra.mrb[6].mxu1 %v18032_v7  ;;  %v4043_v63 = vand.u32 4294901760, %v18386_v59  ;;  %v18405_v0 = vsub.f32 %v343_v56, %v18392_v60 }
  0x6d   : > { %1881 = vmatprep.mubr.f32.mxu0 %v17966_v3  ;;  %2395 = vmatprep.mubr.f32.mxu1 %v17966_v3 }
  0x6e   : > { %v4044_v4 = vsub.f32 %v18386_v59, %v4043_v63  ;;  %v3535_v5 = vand.u32 4294901760, %v18405_v0 }
  0x70   : > { %1883 = vmatmul.mubr.f32.vlgmr.msra.gmra.mrb[4].mxu0 %v18030_v6  ;;  %2397 = vmatmul.mubr.f32.vlgmr.msra.gmra.mrb[4].mxu1 %v18030_v6  ;;  %v4045_v12 = vand.u32 4294901760, %v4044_v4  ;;  %v3536_v13 = vsub.f32 %v18405_v0, %v3535_v5 }
  0x71   : > { %1888 = vmatprep.mubr.f32.mxu0 %v17966_v3  ;;  %2402 = vmatprep.mubr.f32.mxu1 %v17966_v3 }
  0x72   : > { %2413 = vmatpush1.msra.mxu0 %v18276_v30  ;;  %2927 = vmatpush1.msra.mxu1 %v18278_v32  ;;  %v3537_v15 = vand.u32 4294901760, %v3536_v13 }
  0x73   : > { %2504 = vmatprep.subr.mxu0 %v2503_v42  ;;  %3018 = vmatprep.subr.mxu1 %v3017_v43 }
  0x74   : > { %1890 = vmatmul.mubr.f32.gmra.mrb[6].mxu0 %v18032_v7  ;;  %2404 = vmatmul.mubr.f32.gmra.mrb[6].mxu1 %v18032_v7 }
  0x75   : > { %2476 = vmatprep.mubr.f32.mxu0 %v17966_v3  ;;  %2990 = vmatprep.mubr.f32.mxu1 %v17966_v3 }
  0x78   : > { %2482 = vmatmul.mubr.f32.vlgmr.msra.gmra.mrb[8].mxu0 %v18085_v31  ;;  %2996 = vmatmul.mubr.f32.vlgmr.msra.gmra.mrb[8].mxu1 %v18085_v31 }
  0x79   : > { %2487 = vmatprep.mubr.f32.mxu0 %v17966_v3  ;;  %3001 = vmatprep.mubr.f32.mxu1 %v17966_v3 }
  0x7a   : > { %2510 = vmatpush1.msra.mxu0 %v2509_v46  ;;  %3024 = vmatpush1.msra.mxu1 %v3023_v47 }
  0x7b   : > { %2590 = vmatprep.subr.mxu0 %v18267_v28  ;;  %3104 = vmatprep.subr.mxu1 %v18270_v29 }
  0x7c   : > { %2493 = vmatmul.mubr.f32.gmra.mrb[10].mxu0 %v18092_v36  ;;  %3007 = vmatmul.mubr.f32.gmra.mrb[10].mxu1 %v18092_v36 }
  0x7d   : > { %2573 = vmatprep.mubr.f32.mxu0 %v17966_v3  ;;  %3087 = vmatprep.mubr.f32.mxu1 %v17966_v3 }
  0x80   : > { %2575 = vmatmul.mubr.f32.vlgmr.msra.gmra.mrb[8].mxu0 %v18030_v6  ;;  %3089 = vmatmul.mubr.f32.vlgmr.msra.gmra.mrb[8].mxu1 %v18030_v6 }
  0x81   : > { %2580 = vmatprep.mubr.f32.mxu0 %v17966_v3  ;;  %3094 = vmatprep.mubr.f32.mxu1 %v17966_v3 }
  0x82   : > { %2593 = vmatpush1.msra.mxu0 %v18289_v35  ;;  %3107 = vmatpush1.msra.mxu1 %v18292_v37 }
  0x83   : > { %2674 = vmatprep.subr.mxu0 %v18248_v21  ;;  %3188 = vmatprep.subr.mxu1 %v18250_v22 }
  0x84   : > { %2582 = vmatmul.mubr.f32.gmra.mrb[10].mxu0 %v18032_v7  ;;  %3096 = vmatmul.mubr.f32.gmra.mrb[10].mxu1 %v18032_v7 }
  0x85   : > { %2656 = vmatprep.mubr.f32.mxu0 %v17966_v3  ;;  %3170 = vmatprep.mubr.f32.mxu1 %v17966_v3 }
  0x88   : > { %2659 = vmatmul.mubr.f32.vlgmr.msra.gmra.mrb[8].mxu0 %v18036_v8  ;;  %3173 = vmatmul.mubr.f32.vlgmr.msra.gmra.mrb[8].mxu1 %v18036_v8 }
  0x89   : > { %2664 = vmatprep.mubr.f32.mxu0 %v17966_v3  ;;  %3178 = vmatprep.mubr.f32.mxu1 %v17966_v3 }
  0x8a   : > { %2676 = vmatpush1.msra.mxu0 %v18276_v30  ;;  %3190 = vmatpush1.msra.mxu1 %v18278_v32 }
  0x8b   : > { %2761 = vmatprep.subr.mxu0 %v2501_v33  ;;  %3275 = vmatprep.subr.mxu1 %v3015_v34 }
  0x8c   : > { %2667 = vmatmul.mubr.f32.gmra.mrb[10].mxu0 %v18044_v9  ;;  %3181 = vmatmul.mubr.f32.gmra.mrb[10].mxu1 %v18044_v9 }
  0x8d   : > { %2739 = vmatprep.mubr.f32.mxu0 %v17966_v3  ;;  %3253 = vmatprep.mubr.f32.mxu1 %v17966_v3 }
  0x90   : > { %2743 = vmatmul.mubr.f32.vlgmr.msra.gmra.mrb[8].mxu0 %v18054_v18  ;;  %3257 = vmatmul.mubr.f32.vlgmr.msra.gmra.mrb[8].mxu1 %v18054_v18 }
  0x91   : > { %2748 = vmatprep.mubr.f32.mxu0 %v17966_v3  ;;  %3262 = vmatprep.mubr.f32.mxu1 %v17966_v3 }
  0x92   : > { %2765 = vmatpush1.msra.mxu0 %v2507_v40  ;;  %3279 = vmatpush1.msra.mxu1 %v3021_v41 }
  0x93   : > { %2844 = vmatprep.subr.mxu0 %v18248_v21  ;;  %3358 = vmatprep.subr.mxu1 %v18250_v22  ;;  %v18505_v21 = vpop.permute.xlu0 %290  ;;  %v18508_v22 = vsub.f32 %v4511_v19, %v18503_v20 }
  0x94   : > { %2752 = vmatmul.mubr.f32.gmra.mrb[10].mxu0 %v18068_v25  ;;  %3266 = vmatmul.mubr.f32.gmra.mrb[10].mxu1 %v18068_v25 }
  0x95   : > { %2828 = vmatprep.mubr.f32.mxu0 %v17966_v3  ;;  %3342 = vmatprep.mubr.f32.mxu1 %v17966_v3  ;;  %v18511_v26 = vand.u32 4294901760, %v18508_v22 }
  0x97   : > { %v18517_v34 = vpop.permute.xlu0 %295  ;;  %v4585_v42 = vsub.f32 %v18508_v22, %v18511_v26 }
  0x98   : > { %2830 = vmatmul.mubr.f32.vlgmr.msra.gmra.mrb[8].mxu0 %v18030_v6  ;;  %3344 = vmatmul.mubr.f32.vlgmr.msra.gmra.mrb[8].mxu1 %v18030_v6 }
  0x99   : > { %2835 = vmatprep.mubr.f32.mxu0 %v17966_v3  ;;  %3349 = vmatprep.mubr.f32.mxu1 %v17966_v3 }
  0x9a   : > { %2846 = vmatpush1.msra.mxu0 %v18276_v30  ;;  %3360 = vmatpush1.msra.mxu1 %v18278_v32 }
  0x9b   : > { %3439 = vmatprep.subr.mxu0 %v18364_v52  ;;  %3953 = vmatprep.subr.mxu1 %v18366_v53 }
  0x9c   : > { %2837 = vmatmul.mubr.f32.gmra.mrb[10].mxu0 %v18032_v7  ;;  %3351 = vmatmul.mubr.f32.gmra.mrb[10].mxu1 %v18032_v7 }
  0x9d   : > { %2909 = vmatprep.mubr.f32.mxu0 %v17966_v3  ;;  %3423 = vmatprep.mubr.f32.mxu1 %v17966_v3 }
  0xa0   : > { %2911 = vmatmul.mubr.f32.vlgmr.msra.gmra.mrb[8].mxu0 %v18030_v6  ;;  %3425 = vmatmul.mubr.f32.vlgmr.msra.gmra.mrb[8].mxu1 %v18030_v6 }
  0xa1   : > { %2916 = vmatprep.mubr.f32.mxu0 %v17966_v3  ;;  %3430 = vmatprep.mubr.f32.mxu1 %v17966_v3 }
  0xa2   : > { %3441 = vmatpush1.msra.mxu0 %v18392_v60  ;;  %3955 = vmatpush1.msra.mxu1 %v18394_v61 }
  0xa3   : > { %3532 = vmatprep.subr.mxu0 %v3531_v11  ;;  %4046 = vmatprep.subr.mxu1 %v4045_v12 }
  0xa4   : > { %2918 = vmatmul.mubr.f32.gmra.mrb[10].mxu0 %v18032_v7  ;;  %3432 = vmatmul.mubr.f32.gmra.mrb[10].mxu1 %v18032_v7 }
  0xa5   : > { %3504 = vmatprep.mubr.f32.mxu0 %v17966_v3  ;;  %4018 = vmatprep.mubr.f32.mxu1 %v17966_v3 }
  0xa8   : > { %3510 = vmatmul.mubr.f32.vlgmr.msra.gmra.mrb[12].mxu0 %v18085_v31  ;;  %4024 = vmatmul.mubr.f32.vlgmr.msra.gmra.mrb[12].mxu1 %v18085_v31 }
  0xa9   : > { %3515 = vmatprep.mubr.f32.mxu0 %v17966_v3  ;;  %4029 = vmatprep.mubr.f32.mxu1 %v17966_v3 }
  0xaa   : > { %3538 = vmatpush1.msra.mxu0 %v3537_v15  ;;  %4052 = vmatpush1.msra.mxu1 %v4051_v16 }
  0xab   : > { %3618 = vmatprep.subr.mxu0 %v18383_v58  ;;  %4132 = vmatprep.subr.mxu1 %v18386_v59 }
  0xac   : > { %3521 = vmatmul.mubr.f32.gmra.mrb[14].mxu0 %v18092_v36  ;;  %4035 = vmatmul.mubr.f32.gmra.mrb[14].mxu1 %v18092_v36 }
  0xad   : > { %3601 = vmatprep.mubr.f32.mxu0 %v17966_v3  ;;  %4115 = vmatprep.mubr.f32.mxu1 %v17966_v3 }
  0xb0   : > { %3603 = vmatmul.mubr.f32.vlgmr.msra.gmra.mrb[12].mxu0 %v18030_v6  ;;  %4117 = vmatmul.mubr.f32.vlgmr.msra.gmra.mrb[12].mxu1 %v18030_v6 }
  0xb1   : > { %3608 = vmatprep.mubr.f32.mxu0 %v17966_v3  ;;  %4122 = vmatprep.mubr.f32.mxu1 %v17966_v3 }
  0xb2   : > { %3621 = vmatpush1.msra.mxu0 %v18405_v0  ;;  %4135 = vmatpush1.msra.mxu1 %v18408_v1 }
  0xb3   : > { %3702 = vmatprep.subr.mxu0 %v18364_v52  ;;  %4216 = vmatprep.subr.mxu1 %v18366_v53 }
  0xb4   : > { %3610 = vmatmul.mubr.f32.gmra.mrb[14].mxu0 %v18032_v7  ;;  %4124 = vmatmul.mubr.f32.gmra.mrb[14].mxu1 %v18032_v7 }
  0xb5   : > { %3684 = vmatprep.mubr.f32.mxu0 %v17966_v3  ;;  %4198 = vmatprep.mubr.f32.mxu1 %v17966_v3 }
  0xb8   : > { %3687 = vmatmul.mubr.f32.vlgmr.msra.gmra.mrb[12].mxu0 %v18036_v8  ;;  %4201 = vmatmul.mubr.f32.vlgmr.msra.gmra.mrb[12].mxu1 %v18036_v8 }
  0xb9   : > { %3692 = vmatprep.mubr.f32.mxu0 %v17966_v3  ;;  %4206 = vmatprep.mubr.f32.mxu1 %v17966_v3 }
  0xba   : > { %3704 = vmatpush1.msra.mxu0 %v18392_v60  ;;  %4218 = vmatpush1.msra.mxu1 %v18394_v61 }
  0xbb   : > { %3789 = vmatprep.subr.mxu0 %v3529_v62  ;;  %4303 = vmatprep.subr.mxu1 %v4043_v63 }
  0xbc   : > { %3695 = vmatmul.mubr.f32.gmra.mrb[14].mxu0 %v18044_v9  ;;  %4209 = vmatmul.mubr.f32.gmra.mrb[14].mxu1 %v18044_v9 }
  0xbd   : > { %3767 = vmatprep.mubr.f32.mxu0 %v17966_v3  ;;  %4281 = vmatprep.mubr.f32.mxu1 %v17966_v3 }
  0xc0   : > { %3771 = vmatmul.mubr.f32.vlgmr.msra.gmra.mrb[12].mxu0 %v18054_v18  ;;  %4285 = vmatmul.mubr.f32.vlgmr.msra.gmra.mrb[12].mxu1 %v18054_v18 }
  0xc1   : > { %3776 = vmatprep.mubr.f32.mxu0 %v17966_v3  ;;  %4290 = vmatprep.mubr.f32.mxu1 %v17966_v3 }
  0xc2   : > { %3793 = vmatpush1.msra.mxu0 %v3535_v5  ;;  %4307 = vmatpush1.msra.mxu1 %v4049_v10 }
  0xc3   : > { %3872 = vmatprep.subr.mxu0 %v18364_v52  ;;  %4386 = vmatprep.subr.mxu1 %v18366_v53 }
  0xc4   : > { %3780 = vmatmul.mubr.f32.gmra.mrb[14].mxu0 %v18068_v25  ;;  %4294 = vmatmul.mubr.f32.gmra.mrb[14].mxu1 %v18068_v25 }
  0xc5   : > { %3856 = vmatprep.mubr.f32.mxu0 %v17966_v3  ;;  %4370 = vmatprep.mubr.f32.mxu1 %v17966_v3 }
  0xc8   : > { %3858 = vmatmul.mubr.f32.vlgmr.msra.gmra.mrb[12].mxu0 %v18030_v6  ;;  %4372 = vmatmul.mubr.f32.vlgmr.msra.gmra.mrb[12].mxu1 %v18030_v6 }
  0xc9   : > { %3863 = vmatprep.mubr.f32.mxu0 %v17966_v3  ;;  %4377 = vmatprep.mubr.f32.mxu1 %v17966_v3 }
  0xca   : > { %3874 = vmatpush1.msra.mxu0 %v18392_v60  ;;  %4388 = vmatpush1.msra.mxu1 %v18394_v61 }
  0xcc   : > { %3865 = vmatmul.mubr.f32.gmra.mrb[14].mxu0 %v18032_v7  ;;  %4379 = vmatmul.mubr.f32.gmra.mrb[14].mxu1 %v18032_v7 }
  0xcd   : > { %3937 = vmatprep.mubr.f32.mxu0 %v17966_v3  ;;  %4451 = vmatprep.mubr.f32.mxu1 %v17966_v3 }
  0xd0   : > { %3939 = vmatmul.mubr.f32.vlgmr.msra.gmra.mrb[12].mxu0 %v18030_v6  ;;  %4453 = vmatmul.mubr.f32.vlgmr.msra.gmra.mrb[12].mxu1 %v18030_v6 }
  0xd1   : > { %3944 = vmatprep.mubr.f32.mxu0 %v17966_v3  ;;  %4458 = vmatprep.mubr.f32.mxu1 %v17966_v3 }
  0xd4   : > { %3946 = vmatmul.mubr.f32.gmra.mrb[14].mxu0 %v18032_v7  ;;  %4460 = vmatmul.mubr.f32.gmra.mrb[14].mxu1 %v18032_v7 }
  0xd5   : > { %4581 = vmatprep.mubr.f32.mxu0 %v17966_v3  ;;  %5072 = vmatprep.mubr.f32.mxu1 %v17966_v3 }
 0x113   : > { %v856_v23 = vpop.f32.mrb[0].mxu0  ;;  %v1370_v24 = vpop.f32.mrb[0].mxu1 }
 0x114   : > { %v17337_v27 = vadd.f32 %v856_v23, %v18505_v21  ;;  %v17341_v28 = vadd.f32 %v1370_v24, %v18505_v21  ;;  %v858_v29 = vpop.f32.mrb[1].mxu0  ;;  %v1372_v30 = vpop.f32.mrb[1].mxu1 }
 0x115   : > { %v17338_v32 = vadd.f32 %v858_v29, %v18505_v21  ;;  %v17342_v33 = vadd.f32 %v1372_v30, %v18505_v21 }
 0x116   : > { %v4466_v35 = vmax.f32 %v17337_v27, 0.0  ;;  %v4468_v37 = vmax.f32 %v17341_v28, 0.0  ;;  %v18545_v27 = vand.u32 4294901760, %v4585_v42 }
 0x117   : > { %v4467_v38 = vmax.f32 %v17338_v32, 0.0  ;;  %v4469_v39 = vmax.f32 %v17342_v33, 0.0  ;;  %v863_v40 = vpop.f32.mrb[2].mxu0  ;;  %v1377_v41 = vpop.f32.mrb[2].mxu1  ;;  %v4499_v33 = vld [vmem:[#allocation2] sm:$0x1] }
 0x118   : > { %v4515_v43 = vand.u32 4294901760, %v4466_v35  ;;  %v5006_v44 = vand.u32 4294901760, %v4468_v37  ;;  %v17339_v45 = vadd.f32 %v863_v40, %v18517_v34  ;;  %v17343_v46 = vadd.f32 %v1377_v41, %v18517_v34  ;;  %v865_v47 = vpop.f32.mrb[3].mxu0  ;;  %v1379_v48 = vpop.f32.mrb[3].mxu1  ;;  %4502 = vperm.xlu1 %17941, %v4499_v33  }
 0x119   : > { %v4513_v49 = vand.u32 4294901760, %v4467_v38  ;;  %v5004_v50 = vand.u32 4294901760, %v4469_v39  ;;  %v17340_v51 = vadd.f32 %v865_v47, %v18517_v34  ;;  %v17344_v52 = vadd.f32 %v1379_v48, %v18517_v34 }
 0x11a   : > { %v18525_v53 = vsub.f32 %v4466_v35, %v4515_v43  ;;  %v18527_v54 = vsub.f32 %v4468_v37, %v5006_v44  ;;  %v4482_v55 = vmax.f32 %v17339_v45, 0.0  ;;  %v4484_v56 = vmax.f32 %v17343_v46, 0.0 }
 0x11b   : > { %v18529_v57 = vsub.f32 %v4467_v38, %v4513_v49  ;;  %v18531_v58 = vsub.f32 %v4469_v39, %v5004_v50  ;;  %v4483_v59 = vmax.f32 %v17340_v51, 0.0  ;;  %v4485_v60 = vmax.f32 %v17344_v52, 0.0 }
 0x11c   : > { %v4601_v61 = vand.u32 4294901760, %v18525_v53  ;;  %v5092_v62 = vand.u32 4294901760, %v18527_v54  ;;  %v4519_v63 = vand.u32 4294901760, %v4482_v55  ;;  %v5010_v0 = vand.u32 4294901760, %v4484_v56 }
 0x11d   : > { %v4595_v1 = vand.u32 4294901760, %v18529_v57  ;;  %v5086_v2 = vand.u32 4294901760, %v18531_v58  ;;  %v4517_v4 = vand.u32 4294901760, %v4483_v59  ;;  %v5008_v5 = vand.u32 4294901760, %v4485_v60 }
 0x11e   : > { %v4602_v10 = vsub.f32 %v18525_v53, %v4601_v61  ;;  %v5093_v11 = vsub.f32 %v18527_v54, %v5092_v62  ;;  %v18539_v12 = vpack.c.bf16 %v4519_v63, %v4515_v43  ;;  %v4612_v13 = vsub.f32 %v4482_v55, %v4519_v63 }
 0x11f   : > { %v18541_v14 = vpack.c.bf16 %v5010_v0, %v5006_v44  ;;  %v5103_v15 = vsub.f32 %v4484_v56, %v5010_v0  ;;  %v4606_v16 = vsub.f32 %v4483_v59, %v4517_v4  ;;  %v5097_v17 = vsub.f32 %v4485_v60, %v5008_v5 }
 0x120   : > { %v4603_v19 = vand.u32 4294901760, %v4602_v10  ;;  %v4613_v23 = vand.u32 4294901760, %v4612_v13  ;;  %v18543_v24 = vpack.c.bf16 %v4517_v4, %v4513_v49  ;;  %v16977_v32 = vpack.c.bf16 %v5008_v5, %v5004_v50 }
 0x121   : > { %v5104_v28 = vand.u32 4294901760, %v5103_v15  ;;  %v4607_v29 = vand.u32 4294901760, %v4606_v16  ;;  %v5098_v30 = vand.u32 4294901760, %v5097_v17  ;;  %v4596_v37 = vsub.f32 %v18529_v57, %v4595_v1 }
 0x122   : > { %v4614_v35 = vsub.f32 %v4612_v13, %v4613_v23  ;;  %16954 = vmatprep.subr.bf16.mxu0 %v18543_v24  ;;  %v5087_v38 = vsub.f32 %v18531_v58, %v5086_v2  ;;  %v16961_v39 = vpack.c.bf16 %v4606_v16, %v18529_v57  ;;  %v5094_v40 = vand.u32 4294901760, %v5093_v11  ;;  %16978 = vmatprep.subr.bf16.mxu1 %v16977_v32 }
 0x123   : > { %v5105_v41 = vsub.f32 %v5103_v15, %v5104_v28  ;;  %16956 = vmatpush1.bf16.msra.mxu0 %v18539_v12  ;;  %v4608_v42 = vsub.f32 %v4606_v16, %v4607_v29  ;;  %v5099_v43 = vsub.f32 %v5097_v17, %v5098_v30  ;;  %16980 = vmatpush1.bf16.msra.mxu1 %v18541_v14  ;;  %v4597_v45 = vand.u32 4294901760, %v4596_v37 }
 0x124   : > { %v4615_v44 = vand.u32 4294901760, %v4614_v35  ;;  %v5088_v46 = vand.u32 4294901760, %v5087_v38  ;;  %v16985_v47 = vpack.c.bf16 %v5097_v17, %v18531_v58  ;;  %v16963_v51 = vpack.c.bf16 %v4612_v13, %v18525_v53 }
 0x125   : > { %v5106_v48 = vand.u32 4294901760, %v5105_v41  ;;  %v4609_v49 = vand.u32 4294901760, %v4608_v42  ;;  %v5100_v50 = vand.u32 4294901760, %v5099_v43  ;;  %v16987_v55 = vpack.c.bf16 %v5103_v15, %v18527_v54 }
 0x126   : > { %4587 = vmatmul.mubr.f32.vlgmr.msra.gmra.mrb[16].mxu0 %v18545_v27  ;;  %v16959_v52 = vpack.c.bf16 %v4615_v44, %v4603_v19  ;;  %v16969_v56 = vpack.c.bf16 %v4607_v29, %v4595_v1  ;;  %v16993_v57 = vpack.c.bf16 %v5098_v30, %v5086_v2  ;;  %5078 = vmatmul.mubr.f32.vlgmr.msra.gmra.mrb[16].mxu1 %v18545_v27 }
 0x127   : > { %v16957_v59 = vpack.c.bf16 %v4609_v49, %v4597_v45  ;;  %v16981_v60 = vpack.c.bf16 %v5100_v50, %v5088_v46  ;;  %v16983_v63 = vpack.c.bf16 %v5106_v48, %v5094_v40  ;;  %4677 = vmatprep.mubr.f32.mxu0 %v17966_v3  ;;  %5168 = vmatprep.mubr.f32.mxu1 %v17966_v3 }
 0x128   : > { %v16971_v58 = vpack.c.bf16 %v4613_v23, %v4601_v61  ;;  %v16995_v0 = vpack.c.bf16 %v5104_v28, %v5092_v62 }
 0x129   : > { %16958 = vmatprep.subr.bf16.mxu0 %v16957_v59  ;;  %16982 = vmatprep.subr.bf16.mxu1 %v16981_v60 }
 0x12a   : > { %16960 = vmatpush1.bf16.msra.mxu0 %v16959_v52  ;;  %16984 = vmatpush1.bf16.msra.mxu1 %v16983_v63 }
 0x12b   : > { %16962 = vmatprep.subr.bf16.mxu0 %v16961_v39  ;;  %16986 = vmatprep.subr.bf16.mxu1 %v16985_v47 }
 0x12e   : > { %4679 = vmatmul.mubr.f32.vlgmr.msra.gmra.mrb[16].mxu0 %v18503_v20  ;;  %5170 = vmatmul.mubr.f32.vlgmr.msra.gmra.mrb[16].mxu1 %v18503_v20 }
 0x12f   : > { %16964 = vmatpush1.bf16.msra.mxu0 %v16963_v51  ;;  %16988 = vmatpush1.bf16.msra.mxu1 %v16987_v55 }
 0x130   : > { %16966 = vmatprep.subr.bf16.mxu0 %v18543_v24  ;;  %16990 = vmatprep.subr.bf16.mxu1 %v16977_v32 }
 0x131   : > { %4757 = vmatprep.mubr.f32.mxu0 %v17966_v3  ;;  %5248 = vmatprep.mubr.f32.mxu1 %v17966_v3 }
 0x136   : > { %4760 = vmatmul.mubr.f32.vlgmr.msra.gmra.mrb[16].mxu0 %v18508_v22  ;;  %5251 = vmatmul.mubr.f32.vlgmr.msra.gmra.mrb[16].mxu1 %v18508_v22 }
 0x137   : > { %16968 = vmatpush1.bf16.msra.mxu0 %v18539_v12  ;;  %16992 = vmatpush1.bf16.msra.mxu1 %v18541_v14 }
 0x138   : > { %16970 = vmatprep.subr.bf16.mxu0 %v16969_v56  ;;  %16994 = vmatprep.subr.bf16.mxu1 %v16993_v57 }
 0x139   : > { %4834 = vmatprep.mubr.f32.mxu0 %v17966_v3  ;;  %5325 = vmatprep.mubr.f32.mxu1 %v17966_v3 }
 0x13e   : > { %4838 = vmatmul.mubr.f32.vlgmr.msra.gmra.mrb[16].mxu0 %v18511_v26  ;;  %5329 = vmatmul.mubr.f32.vlgmr.msra.gmra.mrb[16].mxu1 %v18511_v26 }
 0x13f   : > { %16972 = vmatpush1.bf16.msra.mxu0 %v16971_v58  ;;  %16996 = vmatpush1.bf16.msra.mxu1 %v16995_v0 }
 0x140   : > { %16974 = vmatprep.subr.bf16.mxu0 %v18543_v24  ;;  %16998 = vmatprep.subr.bf16.mxu1 %v16977_v32 }
 0x141   : > { %4920 = vmatprep.mubr.f32.mxu0 %v17966_v3  ;;  %5411 = vmatprep.mubr.f32.mxu1 %v17966_v3 }
 0x143   : > { %v1884_v53 = vpop.f32.mrb[4].mxu0  ;;  %v2398_v54 = vpop.f32.mrb[4].mxu1 }
 0x144   : > { %v17345_v61 = vadd.f32 %v1884_v53, %v18505_v21  ;;  %v17349_v62 = vadd.f32 %v2398_v54, %v18505_v21  ;;  %v1886_v1 = vpop.f32.mrb[5].mxu0  ;;  %v2400_v2 = vpop.f32.mrb[5].mxu1 }
 0x145   : > { %v17346_v4 = vadd.f32 %v1886_v1, %v18505_v21  ;;  %v17350_v5 = vadd.f32 %v2400_v2, %v18505_v21 }
 0x146   : > { %v4470_v10 = vmax.f32 %v17345_v61, 0.0  ;;  %v4472_v11 = vmax.f32 %v17349_v62, 0.0  ;;  %4922 = vmatmul.mubr.f32.vlgmr.msra.gmra.mrb[16].mxu0 %v18503_v20  ;;  %5413 = vmatmul.mubr.f32.vlgmr.msra.gmra.mrb[16].mxu1 %v18503_v20 }
 0x147   : > { %v4471_v13 = vmax.f32 %v17346_v4, 0.0  ;;  %v4473_v15 = vmax.f32 %v17350_v5, 0.0  ;;  %16976 = vmatpush1.bf16.msra.mxu0 %v18539_v12  ;;  %v1891_v16 = vpop.f32.mrb[6].mxu0  ;;  %v2405_v17 = vpop.f32.mrb[6].mxu1  ;;  %17000 = vmatpush1.bf16.msra.mxu1 %v18541_v14 }
 0x148   : > { %v5497_v19 = vand.u32 4294901760, %v4470_v10  ;;  %v5988_v23 = vand.u32 4294901760, %v4472_v11  ;;  %v17347_v24 = vadd.f32 %v1891_v16, %v18517_v34  ;;  %v17351_v28 = vadd.f32 %v2405_v17, %v18517_v34  ;;  %v1893_v29 = vpop.f32.mrb[7].mxu0  ;;  %v2407_v30 = vpop.f32.mrb[7].mxu1  ;;  %4996 = vmatprep.mubr.f32.mxu0 %v17966_v3  ;;  %5487 = vmatprep.mubr.f32.mxu1 %v17966_v3 }
 0x149   : > { %v5495_v32 = vand.u32 4294901760, %v4471_v13  ;;  %v5986_v33 = vand.u32 4294901760, %v4473_v15  ;;  %v17348_v12 = vadd.f32 %v1893_v29, %v18517_v34  ;;  %v17352_v35 = vadd.f32 %v2407_v30, %v18517_v34 }
 0x14a   : > { %v18590_v37 = vsub.f32 %v4470_v10, %v5497_v19  ;;  %v18592_v38 = vsub.f32 %v4472_v11, %v5988_v23  ;;  %v4486_v14 = vmax.f32 %v17347_v24, 0.0  ;;  %v4488_v39 = vmax.f32 %v17351_v28, 0.0 }
 0x14b   : > { %v18594_v40 = vsub.f32 %v4471_v13, %v5495_v32  ;;  %v18596_v41 = vsub.f32 %v4473_v15, %v5986_v33  ;;  %v4487_v42 = vmax.f32 %v17348_v12, 0.0  ;;  %v4489_v43 = vmax.f32 %v17352_v35, 0.0 }
 0x14c   : > { %v5583_v44 = vand.u32 4294901760, %v18590_v37  ;;  %v6074_v45 = vand.u32 4294901760, %v18592_v38  ;;  %v5501_v46 = vand.u32 4294901760, %v4486_v14  ;;  %v5992_v47 = vand.u32 4294901760, %v4488_v39 }
 0x14d   : > { %v5577_v48 = vand.u32 4294901760, %v18594_v40  ;;  %v6068_v49 = vand.u32 4294901760, %v18596_v41  ;;  %v5499_v50 = vand.u32 4294901760, %v4487_v42  ;;  %v5990_v51 = vand.u32 4294901760, %v4489_v43 }
 0x14e   : > { %v5584_v52 = vsub.f32 %v18590_v37, %v5583_v44  ;;  %v6075_v55 = vsub.f32 %v18592_v38, %v6074_v45  ;;  %v18604_v56 = vpack.c.bf16 %v5501_v46, %v5497_v19  ;;  %v5594_v57 = vsub.f32 %v4486_v14, %v5501_v46  ;;  %4998 = vmatmul.mubr.f32.vlgmr.msra.gmra.mrb[16].mxu0 %v18503_v20 }
 0x14f   : > { %v18607_v59 = vpack.c.bf16 %v5992_v47, %v5988_v23  ;;  %v6085_v60 = vsub.f32 %v4488_v39, %v5992_v47  ;;  %v5588_v63 = vsub.f32 %v4487_v42, %v5499_v50  ;;  %v6079_v58 = vsub.f32 %v4489_v43, %v5990_v51  ;;  %5489 = vmatmul.mubr.f32.vlgmr.msra.gmra.mrb[16].mxu1 %v18503_v20 }
 0x150   : > { %v5585_v0 = vand.u32 4294901760, %v5584_v52  ;;  %v5595_v53 = vand.u32 4294901760, %v5594_v57  ;;  %v18610_v54 = vpack.c.bf16 %v5499_v50, %v5495_v32  ;;  %5563 = vmatprep.mubr.f32.mxu0 %v17966_v3  ;;  %6054 = vmatprep.mubr.f32.mxu1 %v17966_v3  ;;  %v17025_v2 = vpack.c.bf16 %v5990_v51, %v5986_v33 }
 0x151   : > { %v6086_v61 = vand.u32 4294901760, %v6085_v60  ;;  %v5589_v62 = vand.u32 4294901760, %v5588_v63  ;;  %v6080_v1 = vand.u32 4294901760, %v6079_v58  ;;  %v5578_v5 = vsub.f32 %v18594_v40, %v5577_v48 }
 0x152   : > { %v5596_v4 = vsub.f32 %v5594_v57, %v5595_v53  ;;  %17002 = vmatprep.subr.bf16.mxu0 %v18610_v54  ;;  %v6069_v10 = vsub.f32 %v18596_v41, %v6068_v49  ;;  %v17009_v11 = vpack.c.bf16 %v5588_v63, %v18594_v40  ;;  %v6076_v13 = vand.u32 4294901760, %v6075_v55  ;;  %17026 = vmatprep.subr.bf16.mxu1 %v17025_v2 }
 0x153   : > { %v6087_v15 = vsub.f32 %v6085_v60, %v6086_v61  ;;  %17004 = vmatpush1.bf16.msra.mxu0 %v18604_v56  ;;  %v5590_v16 = vsub.f32 %v5588_v63, %v5589_v62  ;;  %v6081_v17 = vsub.f32 %v6079_v58, %v6080_v1  ;;  %17028 = vmatpush1.bf16.msra.mxu1 %v18607_v59  ;;  %v5579_v23 = vand.u32 4294901760, %v5578_v5 }
 0x154   : > { %v5597_v19 = vand.u32 4294901760, %v5596_v4  ;;  %v6070_v24 = vand.u32 4294901760, %v6069_v10  ;;  %v17033_v28 = vpack.c.bf16 %v6079_v58, %v18596_v41  ;;  %v17011_v33 = vpack.c.bf16 %v5594_v57, %v18590_v37 }
 0x155   : > { %v6088_v29 = vand.u32 4294901760, %v6087_v15  ;;  %v5591_v30 = vand.u32 4294901760, %v5590_v16  ;;  %v6082_v32 = vand.u32 4294901760, %v6081_v17  ;;  %v17035_v35 = vpack.c.bf16 %v6085_v60, %v18592_v38 }
 0x156   : > { %5569 = vmatmul.mubr.f32.vlgmr.msra.gmra.mrb[18].mxu0 %v18545_v27  ;;  %v17007_v12 = vpack.c.bf16 %v5597_v19, %v5585_v0  ;;  %v17017_v14 = vpack.c.bf16 %v5589_v62, %v5577_v48  ;;  %v17041_v39 = vpack.c.bf16 %v6080_v1, %v6068_v49  ;;  %6060 = vmatmul.mubr.f32.vlgmr.msra.gmra.mrb[18].mxu1 %v18545_v27 }
 0x157   : > { %v17005_v40 = vpack.c.bf16 %v5591_v30, %v5579_v23  ;;  %v17029_v42 = vpack.c.bf16 %v6082_v32, %v6070_v24  ;;  %v17031_v43 = vpack.c.bf16 %v6088_v29, %v6076_v13  ;;  %5659 = vmatprep.mubr.f32.mxu0 %v17966_v3  ;;  %6150 = vmatprep.mubr.f32.mxu1 %v17966_v3 }
 0x158   : > { %v17019_v41 = vpack.c.bf16 %v5595_v53, %v5583_v44  ;;  %v17043_v46 = vpack.c.bf16 %v6086_v61, %v6074_v45 }
 0x159   : > { %17006 = vmatprep.subr.bf16.mxu0 %v17005_v40  ;;  %17030 = vmatprep.subr.bf16.mxu1 %v17029_v42 }
 0x15a   : > { %17008 = vmatpush1.bf16.msra.mxu0 %v17007_v12  ;;  %17032 = vmatpush1.bf16.msra.mxu1 %v17031_v43 }
 0x15b   : > { %17010 = vmatprep.subr.bf16.mxu0 %v17009_v11  ;;  %17034 = vmatprep.subr.bf16.mxu1 %v17033_v28 }
 0x15e   : > { %5661 = vmatmul.mubr.f32.vlgmr.msra.gmra.mrb[18].mxu0 %v18503_v20  ;;  %6152 = vmatmul.mubr.f32.vlgmr.msra.gmra.mrb[18].mxu1 %v18503_v20 }
 0x15f   : > { %17012 = vmatpush1.bf16.msra.mxu0 %v17011_v33  ;;  %17036 = vmatpush1.bf16.msra.mxu1 %v17035_v35 }
 0x160   : > { %17014 = vmatprep.subr.bf16.mxu0 %v18610_v54  ;;  %17038 = vmatprep.subr.bf16.mxu1 %v17025_v2 }
 0x161   : > { %5739 = vmatprep.mubr.f32.mxu0 %v17966_v3  ;;  %6230 = vmatprep.mubr.f32.mxu1 %v17966_v3 }
 0x166   : > { %5742 = vmatmul.mubr.f32.vlgmr.msra.gmra.mrb[18].mxu0 %v18508_v22  ;;  %6233 = vmatmul.mubr.f32.vlgmr.msra.gmra.mrb[18].mxu1 %v18508_v22 }
 0x167   : > { %17016 = vmatpush1.bf16.msra.mxu0 %v18604_v56  ;;  %17040 = vmatpush1.bf16.msra.mxu1 %v18607_v59 }
 0x168   : > { %17018 = vmatprep.subr.bf16.mxu0 %v17017_v14  ;;  %17042 = vmatprep.subr.bf16.mxu1 %v17041_v39 }
 0x169   : > { %5816 = vmatprep.mubr.f32.mxu0 %v17966_v3  ;;  %6307 = vmatprep.mubr.f32.mxu1 %v17966_v3 }
 0x16e   : > { %5820 = vmatmul.mubr.f32.vlgmr.msra.gmra.mrb[18].mxu0 %v18511_v26  ;;  %6311 = vmatmul.mubr.f32.vlgmr.msra.gmra.mrb[18].mxu1 %v18511_v26 }
 0x16f   : > { %17020 = vmatpush1.bf16.msra.mxu0 %v17019_v41  ;;  %17044 = vmatpush1.bf16.msra.mxu1 %v17043_v46 }
 0x170   : > { %17022 = vmatprep.subr.bf16.mxu0 %v18610_v54  ;;  %17046 = vmatprep.subr.bf16.mxu1 %v17025_v2 }
 0x171   : > { %5902 = vmatprep.mubr.f32.mxu0 %v17966_v3  ;;  %6393 = vmatprep.mubr.f32.mxu1 %v17966_v3 }
 0x173   : > { %v2912_v37 = vpop.f32.mrb[8].mxu0  ;;  %v3426_v38 = vpop.f32.mrb[8].mxu1 }
 0x174   : > { %v17353_v44 = vadd.f32 %v2912_v37, %v18505_v21  ;;  %v17357_v45 = vadd.f32 %v3426_v38, %v18505_v21  ;;  %v2914_v47 = vpop.f32.mrb[9].mxu0  ;;  %v3428_v48 = vpop.f32.mrb[9].mxu1 }
 0x175   : > { %v17354_v49 = vadd.f32 %v2914_v47, %v18505_v21  ;;  %v17358_v50 = vadd.f32 %v3428_v48, %v18505_v21 }
 0x176   : > { %v4474_v51 = vmax.f32 %v17353_v44, 0.0  ;;  %v4476_v52 = vmax.f32 %v17357_v45, 0.0  ;;  %5904 = vmatmul.mubr.f32.vlgmr.msra.gmra.mrb[18].mxu0 %v18503_v20  ;;  %6395 = vmatmul.mubr.f32.vlgmr.msra.gmra.mrb[18].mxu1 %v18503_v20 }
 0x177   : > { %v4475_v55 = vmax.f32 %v17354_v49, 0.0  ;;  %v4477_v57 = vmax.f32 %v17358_v50, 0.0  ;;  %17024 = vmatpush1.bf16.msra.mxu0 %v18604_v56  ;;  %v2919_v60 = vpop.f32.mrb[10].mxu0  ;;  %v3433_v63 = vpop.f32.mrb[10].mxu1  ;;  %17048 = vmatpush1.bf16.msra.mxu1 %v18607_v59 }
 0x178   : > { %v6479_v58 = vand.u32 4294901760, %v4474_v51  ;;  %v6970_v0 = vand.u32 4294901760, %v4476_v52  ;;  %v17355_v53 = vadd.f32 %v2919_v60, %v18517_v34  ;;  %v17359_v54 = vadd.f32 %v3433_v63, %v18517_v34  ;;  %v2921_v61 = vpop.f32.mrb[11].mxu0  ;;  %v3435_v62 = vpop.f32.mrb[11].mxu1  ;;  %5978 = vmatprep.mubr.f32.mxu0 %v17966_v3  ;;  %6469 = vmatprep.mubr.f32.mxu1 %v17966_v3 }
 0x179   : > { %v6477_v1 = vand.u32 4294901760, %v4475_v55  ;;  %v6968_v2 = vand.u32 4294901760, %v4477_v57  ;;  %v17356_v56 = vadd.f32 %v2921_v61, %v18517_v34  ;;  %v17360_v4 = vadd.f32 %v3435_v62, %v18517_v34 }
 0x17a   : > { %v18657_v5 = vsub.f32 %v4474_v51, %v6479_v58  ;;  %v18659_v10 = vsub.f32 %v4476_v52, %v6970_v0  ;;  %v4490_v59 = vmax.f32 %v17355_v53, 0.0  ;;  %v4492_v11 = vmax.f32 %v17359_v54, 0.0 }
 0x17b   : > { %v18661_v13 = vsub.f32 %v4475_v55, %v6477_v1  ;;  %v18663_v15 = vsub.f32 %v4477_v57, %v6968_v2  ;;  %v4491_v16 = vmax.f32 %v17356_v56, 0.0  ;;  %v4493_v17 = vmax.f32 %v17360_v4, 0.0 }
 0x17c   : > { %v6565_v19 = vand.u32 4294901760, %v18657_v5  ;;  %v7056_v23 = vand.u32 4294901760, %v18659_v10  ;;  %v6483_v24 = vand.u32 4294901760, %v4490_v59  ;;  %v6974_v28 = vand.u32 4294901760, %v4492_v11 }
 0x17d   : > { %v6559_v29 = vand.u32 4294901760, %v18661_v13  ;;  %v7050_v30 = vand.u32 4294901760, %v18663_v15  ;;  %v6481_v32 = vand.u32 4294901760, %v4491_v16  ;;  %v6972_v33 = vand.u32 4294901760, %v4493_v17 }
 0x17e   : > { %v6566_v12 = vsub.f32 %v18657_v5, %v6565_v19  ;;  %v7057_v35 = vsub.f32 %v18659_v10, %v7056_v23  ;;  %v18671_v14 = vpack.c.bf16 %v6483_v24, %v6479_v58  ;;  %v6576_v39 = vsub.f32 %v4490_v59, %v6483_v24  ;;  %5980 = vmatmul.mubr.f32.vlgmr.msra.gmra.mrb[18].mxu0 %v18503_v20 }
 0x17f   : > { %v18674_v40 = vpack.c.bf16 %v6974_v28, %v6970_v0  ;;  %v7067_v42 = vsub.f32 %v4492_v11, %v6974_v28  ;;  %v6570_v43 = vsub.f32 %v4491_v16, %v6481_v32  ;;  %v7061_v41 = vsub.f32 %v4493_v17, %v6972_v33  ;;  %6471 = vmatmul.mubr.f32.vlgmr.msra.gmra.mrb[18].mxu1 %v18503_v20 }
 0x180   : > { %v6567_v46 = vand.u32 4294901760, %v6566_v12  ;;  %v6577_v37 = vand.u32 4294901760, %v6576_v39  ;;  %v18677_v38 = vpack.c.bf16 %v6481_v32, %v6477_v1  ;;  %6545 = vmatprep.mubr.f32.mxu0 %v17966_v3  ;;  %7036 = vmatprep.mubr.f32.mxu1 %v17966_v3  ;;  %v17073_v48 = vpack.c.bf16 %v6972_v33, %v6968_v2 }
 0x181   : > { %v7068_v44 = vand.u32 4294901760, %v7067_v42  ;;  %v6571_v45 = vand.u32 4294901760, %v6570_v43  ;;  %v7062_v47 = vand.u32 4294901760, %v7061_v41  ;;  %v6560_v50 = vsub.f32 %v18661_v13, %v6559_v29 }
 0x182   : > { %v6578_v49 = vsub.f32 %v6576_v39, %v6577_v37  ;;  %17050 = vmatprep.subr.bf16.mxu0 %v18677_v38  ;;  %v7051_v51 = vsub.f32 %v18663_v15, %v7050_v30  ;;  %v17057_v52 = vpack.c.bf16 %v6570_v43, %v18661_v13  ;;  %v7058_v55 = vand.u32 4294901760, %v7057_v35  ;;  %17074 = vmatprep.subr.bf16.mxu1 %v17073_v48 }
 0x183   : > { %v7069_v57 = vsub.f32 %v7067_v42, %v7068_v44  ;;  %17052 = vmatpush1.bf16.msra.mxu0 %v18671_v14  ;;  %v6572_v60 = vsub.f32 %v6570_v43, %v6571_v45  ;;  %v7063_v63 = vsub.f32 %v7061_v41, %v7062_v47  ;;  %17076 = vmatpush1.bf16.msra.mxu1 %v18674_v40  ;;  %v6561_v0 = vand.u32 4294901760, %v6560_v50 }
 0x184   : > { %v6579_v58 = vand.u32 4294901760, %v6578_v49  ;;  %v7052_v53 = vand.u32 4294901760, %v7051_v51  ;;  %v17081_v54 = vpack.c.bf16 %v7061_v41, %v18663_v15  ;;  %v17059_v2 = vpack.c.bf16 %v6576_v39, %v18657_v5 }
 0x185   : > { %v7070_v61 = vand.u32 4294901760, %v7069_v57  ;;  %v6573_v62 = vand.u32 4294901760, %v6572_v60  ;;  %v7064_v1 = vand.u32 4294901760, %v7063_v63  ;;  %v17083_v4 = vpack.c.bf16 %v7067_v42, %v18659_v10 }
 0x186   : > { %6551 = vmatmul.mubr.f32.vlgmr.msra.gmra.mrb[20].mxu0 %v18545_v27  ;;  %v17055_v56 = vpack.c.bf16 %v6579_v58, %v6567_v46  ;;  %v17065_v59 = vpack.c.bf16 %v6571_v45, %v6559_v29  ;;  %v17089_v11 = vpack.c.bf16 %v7062_v47, %v7050_v30  ;;  %7042 = vmatmul.mubr.f32.vlgmr.msra.gmra.mrb[20].mxu1 %v18545_v27 }
 0x187   : > { %v17053_v13 = vpack.c.bf16 %v6573_v62, %v6561_v0  ;;  %v17077_v16 = vpack.c.bf16 %v7064_v1, %v7052_v53  ;;  %v17079_v17 = vpack.c.bf16 %v7070_v61, %v7058_v55  ;;  %6641 = vmatprep.mubr.f32.mxu0 %v17966_v3  ;;  %7132 = vmatprep.mubr.f32.mxu1 %v17966_v3 }
 0x188   : > { %v17067_v15 = vpack.c.bf16 %v6577_v37, %v6565_v19  ;;  %v17091_v24 = vpack.c.bf16 %v7068_v44, %v7056_v23 }
 0x189   : > { %17054 = vmatprep.subr.bf16.mxu0 %v17053_v13  ;;  %17078 = vmatprep.subr.bf16.mxu1 %v17077_v16 }
 0x18a   : > { %17056 = vmatpush1.bf16.msra.mxu0 %v17055_v56  ;;  %17080 = vmatpush1.bf16.msra.mxu1 %v17079_v17 }
 0x18b   : > { %17058 = vmatprep.subr.bf16.mxu0 %v17057_v52  ;;  %17082 = vmatprep.subr.bf16.mxu1 %v17081_v54 }
 0x18e   : > { %6643 = vmatmul.mubr.f32.vlgmr.msra.gmra.mrb[20].mxu0 %v18503_v20  ;;  %7134 = vmatmul.mubr.f32.vlgmr.msra.gmra.mrb[20].mxu1 %v18503_v20 }
 0x18f   : > { %17060 = vmatpush1.bf16.msra.mxu0 %v17059_v2  ;;  %17084 = vmatpush1.bf16.msra.mxu1 %v17083_v4 }
 0x190   : > { %17062 = vmatprep.subr.bf16.mxu0 %v18677_v38  ;;  %17086 = vmatprep.subr.bf16.mxu1 %v17073_v48 }
 0x191   : > { %6721 = vmatprep.mubr.f32.mxu0 %v17966_v3  ;;  %7212 = vmatprep.mubr.f32.mxu1 %v17966_v3 }
 0x196   : > { %6724 = vmatmul.mubr.f32.vlgmr.msra.gmra.mrb[20].mxu0 %v18508_v22  ;;  %7215 = vmatmul.mubr.f32.vlgmr.msra.gmra.mrb[20].mxu1 %v18508_v22 }
 0x197   : > { %17064 = vmatpush1.bf16.msra.mxu0 %v18671_v14  ;;  %17088 = vmatpush1.bf16.msra.mxu1 %v18674_v40 }
 0x198   : > { %17066 = vmatprep.subr.bf16.mxu0 %v17065_v59  ;;  %17090 = vmatprep.subr.bf16.mxu1 %v17089_v11 }
 0x199   : > { %6798 = vmatprep.mubr.f32.mxu0 %v17966_v3  ;;  %7289 = vmatprep.mubr.f32.mxu1 %v17966_v3 }
 0x19e   : > { %6802 = vmatmul.mubr.f32.vlgmr.msra.gmra.mrb[20].mxu0 %v18511_v26  ;;  %7293 = vmatmul.mubr.f32.vlgmr.msra.gmra.mrb[20].mxu1 %v18511_v26 }
 0x19f   : > { %17068 = vmatpush1.bf16.msra.mxu0 %v17067_v15  ;;  %17092 = vmatpush1.bf16.msra.mxu1 %v17091_v24 }
 0x1a0   : > { %17070 = vmatprep.subr.bf16.mxu0 %v18677_v38  ;;  %17094 = vmatprep.subr.bf16.mxu1 %v17073_v48 }
 0x1a1   : > { %6884 = vmatprep.mubr.f32.mxu0 %v17966_v3  ;;  %7375 = vmatprep.mubr.f32.mxu1 %v17966_v3 }
 0x1a3   : > { %v3940_v5 = vpop.f32.mrb[12].mxu0  ;;  %v4454_v10 = vpop.f32.mrb[12].mxu1 }
 0x1a4   : > { %v17361_v19 = vadd.f32 %v3940_v5, %v18505_v21  ;;  %v17365_v23 = vadd.f32 %v4454_v10, %v18505_v21  ;;  %v3942_v28 = vpop.f32.mrb[13].mxu0  ;;  %v4456_v29 = vpop.f32.mrb[13].mxu1 }
 0x1a5   : > { %v17362_v30 = vadd.f32 %v3942_v28, %v18505_v21  ;;  %v17366_v32 = vadd.f32 %v4456_v29, %v18505_v21 }
 0x1a6   : > { %v4478_v33 = vmax.f32 %v17361_v19, 0.0  ;;  %v4480_v12 = vmax.f32 %v17365_v23, 0.0  ;;  %6886 = vmatmul.mubr.f32.vlgmr.msra.gmra.mrb[20].mxu0 %v18503_v20  ;;  %7377 = vmatmul.mubr.f32.vlgmr.msra.gmra.mrb[20].mxu1 %v18503_v20 }
 0x1a7   : > { %v4479_v35 = vmax.f32 %v17362_v30, 0.0  ;;  %v4481_v39 = vmax.f32 %v17366_v32, 0.0  ;;  %17072 = vmatpush1.bf16.msra.mxu0 %v18671_v14  ;;  %v3947_v42 = vpop.f32.mrb[14].mxu0  ;;  %v4461_v43 = vpop.f32.mrb[14].mxu1  ;;  %17096 = vmatpush1.bf16.msra.mxu1 %v18674_v40 }
 0x1a8   : > { %v7461_v41 = vand.u32 4294901760, %v4478_v33  ;;  %v7952_v46 = vand.u32 4294901760, %v4480_v12  ;;  %v17363_v37 = vadd.f32 %v3947_v42, %v18517_v34  ;;  %v17367_v38 = vadd.f32 %v4461_v43, %v18517_v34  ;;  %v3949_v44 = vpop.f32.mrb[15].mxu0  ;;  %v4463_v45 = vpop.f32.mrb[15].mxu1  ;;  %6960 = vmatprep.mubr.f32.mxu0 %v17966_v3  ;;  %7451 = vmatprep.mubr.f32.mxu1 %v17966_v3 }
 0x1a9   : > { %v7459_v47 = vand.u32 4294901760, %v4479_v35  ;;  %v7950_v48 = vand.u32 4294901760, %v4481_v39  ;;  %v17364_v14 = vadd.f32 %v3949_v44, %v18517_v34  ;;  %v17368_v49 = vadd.f32 %v4463_v45, %v18517_v34 }
 0x1aa   : > { %v18724_v50 = vsub.f32 %v4478_v33, %v7461_v41  ;;  %v18726_v51 = vsub.f32 %v4480_v12, %v7952_v46  ;;  %v4494_v40 = vmax.f32 %v17363_v37, 0.0  ;;  %v4496_v52 = vmax.f32 %v17367_v38, 0.0 }
 0x1ab   : > { %v18728_v55 = vsub.f32 %v4479_v35, %v7459_v47  ;;  %v18730_v57 = vsub.f32 %v4481_v39, %v7950_v48  ;;  %v4495_v60 = vmax.f32 %v17364_v14, 0.0  ;;  %v4497_v63 = vmax.f32 %v17368_v49, 0.0 }
 0x1ac   : > { %v7547_v58 = vand.u32 4294901760, %v18724_v50  ;;  %v8038_v0 = vand.u32 4294901760, %v18726_v51  ;;  %v7465_v53 = vand.u32 4294901760, %v4494_v40  ;;  %v7956_v54 = vand.u32 4294901760, %v4496_v52 }
 0x1ad   : > { %v7541_v61 = vand.u32 4294901760, %v18728_v55  ;;  %v8032_v62 = vand.u32 4294901760, %v18730_v57  ;;  %v7463_v1 = vand.u32 4294901760, %v4495_v60  ;;  %v7954_v2 = vand.u32 4294901760, %v4497_v63 }
 0x1ae   : > { %v7548_v56 = vsub.f32 %v18724_v50, %v7547_v58  ;;  %v8039_v4 = vsub.f32 %v18726_v51, %v8038_v0  ;;  %v18738_v59 = vpack.c.bf16 %v7465_v53, %v7461_v41  ;;  %v7558_v11 = vsub.f32 %v4494_v40, %v7465_v53  ;;  %6962 = vmatmul.mubr.f32.vlgmr.msra.gmra.mrb[20].mxu0 %v18503_v20 }
 0x1af   : > { %v18741_v13 = vpack.c.bf16 %v7956_v54, %v7952_v46  ;;  %v8049_v16 = vsub.f32 %v4496_v52, %v7956_v54  ;;  %v7552_v17 = vsub.f32 %v4495_v60, %v7463_v1  ;;  %v8043_v15 = vsub.f32 %v4497_v63, %v7954_v2  ;;  %7453 = vmatmul.mubr.f32.vlgmr.msra.gmra.mrb[20].mxu1 %v18503_v20 }
 0x1b0   : > { %v7549_v24 = vand.u32 4294901760, %v7548_v56  ;;  %v7559_v5 = vand.u32 4294901760, %v7558_v11  ;;  %v18744_v10 = vpack.c.bf16 %v7463_v1, %v7459_v47  ;;  %7527 = vmatprep.mubr.f32.mxu0 %v17966_v3  ;;  %8018 = vmatprep.mubr.f32.mxu1 %v17966_v3  ;;  %v18748_v29 = vpack.c.bf16 %v7954_v2, %v7950_v48 }
 0x1b1   : > { %v8050_v19 = vand.u32 4294901760, %v8049_v16  ;;  %v7553_v23 = vand.u32 4294901760, %v7552_v17  ;;  %v8044_v28 = vand.u32 4294901760, %v8043_v15  ;;  %v7542_v32 = vsub.f32 %v18728_v55, %v7541_v61 }
 0x1b2   : > { %v7560_v30 = vsub.f32 %v7558_v11, %v7559_v5  ;;  %17098 = vmatprep.subr.bf16.mxu0 %v18744_v10  ;;  %v8033_v33 = vsub.f32 %v18730_v57, %v8032_v62  ;;  %v17105_v12 = vpack.c.bf16 %v7552_v17, %v18728_v55  ;;  %v8040_v35 = vand.u32 4294901760, %v8039_v4  ;;  %17122 = vmatprep.subr.bf16.mxu1 %v18748_v29 }
 0x1b3   : > { %v8051_v39 = vsub.f32 %v8049_v16, %v8050_v19  ;;  %17100 = vmatpush1.bf16.msra.mxu0 %v18738_v59  ;;  %v7554_v42 = vsub.f32 %v7552_v17, %v7553_v23  ;;  %v8045_v43 = vsub.f32 %v8043_v15, %v8044_v28  ;;  %17124 = vmatpush1.bf16.msra.mxu1 %v18741_v13  ;;  %v7543_v46 = vand.u32 4294901760, %v7542_v32 }
 0x1b4   : > { %v7561_v41 = vand.u32 4294901760, %v7560_v30  ;;  %v8034_v37 = vand.u32 4294901760, %v8033_v33  ;;  %v17129_v38 = vpack.c.bf16 %v8043_v15, %v18730_v57  ;;  %v17107_v48 = vpack.c.bf16 %v7558_v11, %v18724_v50  ;;  %v16934_v50 = vld [vmem:[%s18041_s30 + $0x88] sm:$0x1f] }
 0x1b5   : > { %v8052_v44 = vand.u32 4294901760, %v8051_v39  ;;  %v7555_v45 = vand.u32 4294901760, %v7554_v42  ;;  %v8046_v47 = vand.u32 4294901760, %v8045_v43  ;;  %v17131_v49 = vpack.c.bf16 %v8049_v16, %v18726_v51  ;;  %v16936_v51 = vld [vmem:[%s18041_s30 + $0x98] sm:$0x1f] }
 0x1b6   : > { %7533 = vmatmul.mubr.f32.vlgmr.msra.gmra.mrb[22].mxu0 %v18545_v27  ;;  %v17103_v14 = vpack.c.bf16 %v7561_v41, %v7549_v24  ;;  %v17113_v40 = vpack.c.bf16 %v7553_v23, %v7541_v61  ;;  %v17137_v52 = vpack.c.bf16 %v8044_v28, %v8032_v62  ;;  %8024 = vmatmul.mubr.f32.vlgmr.msra.gmra.mrb[22].mxu1 %v18545_v27  ;;  %v8484_v54 = vsel %vm305_vm1, %v16936_v51, 0  ;;  %v16935_v61 = vld [vmem:[%s18041_s30 + $0x90] sm:$0x1f]  ;;  %v16940_v39 = vld [vmem:[%s18041_s30 + $0xb8] sm:$0x1f] }
 0x1b7   : > { %v17101_v55 = vpack.c.bf16 %v7555_v45, %v7543_v46  ;;  %v17125_v60 = vpack.c.bf16 %v8046_v47, %v8034_v37  ;;  %v17127_v63 = vpack.c.bf16 %v8052_v44, %v8040_v35  ;;  %7623 = vmatprep.mubr.f32.mxu0 %v17966_v3  ;;  %8114 = vmatprep.mubr.f32.mxu1 %v17966_v3  ;;  %v18786_v2 = vand.u32 4294901760, %v8484_v54  ;;  %v16938_v35 = vld [vmem:[%s18041_s30 + $0xa8] sm:$0x1f]  ;;  %v16937_v37 = vld [vmem:[%s18041_s30 + $0xa0] sm:$0x1f] }
 0x1b8   : > { %v17115_v57 = vpack.c.bf16 %v7559_v5, %v7547_v58  ;;  %v17139_v53 = vpack.c.bf16 %v8050_v19, %v8038_v0  ;;  %v8478_v58 = vsel %vm305_vm1, %v16934_v50, 0  ;;  %v16933_v0 = vld [vmem:[%s18041_s30 + $0x80] sm:$0x1f]  ;;  %v8481_v56 = vsel %vm305_vm1, %v16935_v61, 0 }
 0x1b9   : > { %17102 = vmatprep.subr.bf16.mxu0 %v17101_v55  ;;  %17126 = vmatprep.subr.bf16.mxu1 %v17125_v60  ;;  %v18782_v62 = vand.u32 4294901760, %v8478_v58  ;;  %v8475_v1 = vsel %vm305_vm1, %v16933_v0, 0  ;;  %v18795_v11 = vand.u32 4294901760, %v8481_v56  ;;  %v18802_v17 = vsub.f32 %v8484_v54, %v18786_v2 }
 0x1ba   : > { %17104 = vmatpush1.bf16.msra.mxu0 %v17103_v14  ;;  %17128 = vmatpush1.bf16.msra.mxu1 %v17127_v63  ;;  %v18791_v4 = vand.u32 4294901760, %v8475_v1  ;;  %v8490_v42 = vsel %vm305_vm1, %v16938_v35, 0  ;;  %v8496_v43 = vsel %vm305_vm1, %v16940_v39, 0  ;;  %v8487_v44 = vsel %vm305_vm1, %v16937_v37, 0 }
 0x1bb   : > { %17106 = vmatprep.subr.bf16.mxu0 %v17105_v12  ;;  %17130 = vmatprep.subr.bf16.mxu1 %v17129_v38  ;;  %v18798_v16 = vsub.f32 %v8478_v58, %v18782_v62  ;;  %v18808_v24 = vsub.f32 %v8481_v56, %v18795_v11  ;;  %v18872_v41 = vand.u32 4294901760, %v8490_v42  ;;  %v18875_v46 = vand.u32 4294901760, %v8496_v43  ;;  %v16939_v38 = vld [vmem:[%s18041_s30 + $0xb0] sm:$0x1f] }
 0x1bc   : > { %v18805_v15 = vsub.f32 %v8475_v1, %v18791_v4  ;;  %v8493_v47 = vsel %vm305_vm1, %v16939_v38, 0  ;;  %v18900_v14 = vand.u32 4294901760, %v8487_v44 }
 0x1bd   : > { %v8613_v5 = vand.u32 4294901760, %v18798_v16  ;;  %v9133_v28 = vand.u32 4294901760, %v18808_v24  ;;  %v18889_v45 = vsub.f32 %v8490_v42, %v18872_v41 }
 0x1be   : > { %7625 = vmatmul.mubr.f32.vlgmr.msra.gmra.mrb[22].mxu0 %v18503_v20  ;;  %8116 = vmatmul.mubr.f32.vlgmr.msra.gmra.mrb[22].mxu1 %v18503_v20  ;;  %v8619_v19 = vand.u32 4294901760, %v18805_v15  ;;  %v18912_v55 = vsub.f32 %v8487_v44, %v18900_v14 }
 0x1bf   : > { %17108 = vmatpush1.bf16.msra.mxu0 %v17107_v48  ;;  %17132 = vmatpush1.bf16.msra.mxu1 %v17131_v49  ;;  %v8614_v23 = vsub.f32 %v18798_v16, %v8613_v5  ;;  %v9134_v30 = vsub.f32 %v18808_v24, %v9133_v28  ;;  %v18895_v48 = vsub.f32 %v8496_v43, %v18875_v46  ;;  %v18902_v49 = vand.u32 4294901760, %v8493_v47 }
 0x1c0   : > { %17110 = vmatprep.subr.bf16.mxu0 %v18744_v10  ;;  %17134 = vmatprep.subr.bf16.mxu1 %v18748_v29 }
 0x1c1   : > { %7703 = vmatprep.mubr.f32.mxu0 %v17966_v3  ;;  %8194 = vmatprep.mubr.f32.mxu1 %v17966_v3  ;;  %v9135_v12 = vand.u32 4294901760, %v9134_v30  ;;  %v18917_v60 = vsub.f32 %v8493_v47, %v18902_v49 }
 0x1c3   : > { %v10161_v51 = vand.u32 4294901760, %v18917_v60 }
 0x1c5   : > { %v10162_v54 = vsub.f32 %v18917_v60, %v10161_v51 }
 0x1c6   : > { %7706 = vmatmul.mubr.f32.vlgmr.msra.gmra.mrb[22].mxu0 %v18508_v22  ;;  %8197 = vmatmul.mubr.f32.vlgmr.msra.gmra.mrb[22].mxu1 %v18508_v22 }
 0x1c7   : > { %17112 = vmatpush1.bf16.msra.mxu0 %v18738_v59  ;;  %17136 = vmatpush1.bf16.msra.mxu1 %v18741_v13 }
 0x1c8   : > { %17114 = vmatprep.subr.bf16.mxu0 %v17113_v40  ;;  %17138 = vmatprep.subr.bf16.mxu1 %v17137_v52  ;;  %v9641_v40 = vand.u32 4294901760, %v18889_v45  ;;  %v10155_v52 = vand.u32 4294901760, %v18895_v48 }
 0x1c9   : > { %7780 = vmatprep.mubr.f32.mxu0 %v17966_v3  ;;  %8271 = vmatprep.mubr.f32.mxu1 %v17966_v3 }
 0x1ca   : > { %v9642_v63 = vsub.f32 %v18889_v45, %v9641_v40 }
 0x1cc   : > { %v9643_v50 = vand.u32 4294901760, %v9642_v63 }
 0x1ce   : > { %7784 = vmatmul.mubr.f32.vlgmr.msra.gmra.mrb[22].mxu0 %v18511_v26  ;;  %8275 = vmatmul.mubr.f32.vlgmr.msra.gmra.mrb[22].mxu1 %v18511_v26 }
 0x1cf   : > { %17116 = vmatpush1.bf16.msra.mxu0 %v17115_v57  ;;  %17140 = vmatpush1.bf16.msra.mxu1 %v17139_v53  ;;  %v10156_v57 = vsub.f32 %v18895_v48, %v10155_v52  ;;  %v9647_v53 = vand.u32 4294901760, %v18912_v55 }
 0x1d0   : > { %17118 = vmatprep.subr.bf16.mxu0 %v18744_v10  ;;  %17142 = vmatprep.subr.bf16.mxu1 %v18748_v29  ;;  %v9127_v10 = vand.u32 4294901760, %v18802_v17  ;;  %v8615_v29 = vand.u32 4294901760, %v8614_v23 }
 0x1d1   : > { %7866 = vmatprep.mubr.f32.mxu0 %v17966_v3  ;;  %8357 = vmatprep.mubr.f32.mxu1 %v17966_v3  ;;  %v10157_v58 = vand.u32 4294901760, %v10156_v57  ;;  %v9648_v0 = vsub.f32 %v18912_v55, %v9647_v53 }
 0x1d3   : > { %v9649_v61 = vand.u32 4294901760, %v9648_v0 }
 0x1d6   : > { %7868 = vmatmul.mubr.f32.vlgmr.msra.gmra.mrb[22].mxu0 %v18503_v20  ;;  %8359 = vmatmul.mubr.f32.vlgmr.msra.gmra.mrb[22].mxu1 %v18503_v20 }
 0x1d7   : > { %17120 = vmatpush1.bf16.msra.mxu0 %v18738_v59  ;;  %17144 = vmatpush1.bf16.msra.mxu1 %v18741_v13  ;;  %v9128_v59 = vsub.f32 %v18802_v17, %v9127_v10  ;;  %v8620_v13 = vsub.f32 %v18805_v15, %v8619_v19 }
 0x1d8   : > { %7942 = vmatprep.mubr.f32.mxu0 %v17966_v3  ;;  %8433 = vmatprep.mubr.f32.mxu1 %v17966_v3 }
 0x1d9   : > { %8523 = vmatprep.subr.mxu0 %v18782_v62  ;;  %9037 = vmatprep.subr.mxu1 %v18786_v2  ;;  %v9129_v32 = vand.u32 4294901760, %v9128_v59  ;;  %v8621_v33 = vand.u32 4294901760, %v8620_v13 }
 0x1de   : > { %7944 = vmatmul.mubr.f32.vlgmr.msra.gmra.mrb[22].mxu0 %v18503_v20  ;;  %8435 = vmatmul.mubr.f32.vlgmr.msra.gmra.mrb[22].mxu1 %v18503_v20 }
 0x1df   : > { %8525 = vmatpush1.msra.mxu0 %v18791_v4  ;;  %8588 = vmatprep.mubr.f32.mxu0 %v17966_v3 }
 0x1e0   : > { %9039 = vmatpush1.msra.mxu1 %v18795_v11  ;;  %9102 = vmatprep.mubr.f32.mxu1 %v17966_v3 }
 0x1e1   : > { %8616 = vmatprep.subr.mxu0 %v8615_v29  ;;  %9130 = vmatprep.subr.mxu1 %v9129_v32 }
 0x1e2   : > { %8594 = vmatmul.mubr.f32.vlgmr.msra.gmra.mrb[24].mxu0 %v18085_v31  ;;  %9108 = vmatmul.mubr.f32.vlgmr.msra.gmra.mrb[24].mxu1 %v18085_v31 }
 0x1e3   : > { %8599 = vmatprep.mubr.f32.mxu0 %v17966_v3  ;;  %9113 = vmatprep.mubr.f32.mxu1 %v17966_v3 }
 0x1e4   : > { %8622 = vmatpush1.msra.mxu0 %v8621_v33  ;;  %9136 = vmatpush1.msra.mxu1 %v9135_v12 }
 0x1e5   : > { %8702 = vmatprep.subr.mxu0 %v18798_v16  ;;  %9216 = vmatprep.subr.mxu1 %v18802_v17  ;;  %v16944_v16 = vld [vmem:[%s18041_s30 + $0xd8] sm:$0x1f] }
 0x1e6   : > { %8605 = vmatmul.mubr.f32.gmra.mrb[26].mxu0 %v18092_v36  ;;  %9119 = vmatmul.mubr.f32.gmra.mrb[26].mxu1 %v18092_v36 }
 0x1e7   : > { %8685 = vmatprep.mubr.f32.mxu0 %v17966_v3  ;;  %9199 = vmatprep.mubr.f32.mxu1 %v17966_v3 }
 0x1ea   : > { %8687 = vmatmul.mubr.f32.vlgmr.msra.gmra.mrb[24].mxu0 %v18030_v6  ;;  %9201 = vmatmul.mubr.f32.vlgmr.msra.gmra.mrb[24].mxu1 %v18030_v6 }
 0x1eb   : > { %8692 = vmatprep.mubr.f32.mxu0 %v17966_v3  ;;  %9206 = vmatprep.mubr.f32.mxu1 %v17966_v3 }
 0x1ec   : > { %8705 = vmatpush1.msra.mxu0 %v18805_v15  ;;  %9219 = vmatpush1.msra.mxu1 %v18808_v24  ;;  %v8508_v15 = vsel %vm305_vm1, %v16944_v16, 0 }
 0x1ed   : > { %8786 = vmatprep.subr.mxu0 %v18782_v62  ;;  %9300 = vmatprep.subr.mxu1 %v18786_v2 }
 0x1ee   : > { %8694 = vmatmul.mubr.f32.gmra.mrb[26].mxu0 %v18032_v7  ;;  %9208 = vmatmul.mubr.f32.gmra.mrb[26].mxu1 %v18032_v7 }
 0x1ef   : > { %8768 = vmatprep.mubr.f32.mxu0 %v17966_v3  ;;  %9282 = vmatprep.mubr.f32.mxu1 %v17966_v3 }
 0x1f2   : > { %8771 = vmatmul.mubr.f32.vlgmr.msra.gmra.mrb[24].mxu0 %v18036_v8  ;;  %9285 = vmatmul.mubr.f32.vlgmr.msra.gmra.mrb[24].mxu1 %v18036_v8 }
 0x1f3   : > { %8776 = vmatprep.mubr.f32.mxu0 %v17966_v3  ;;  %9290 = vmatprep.mubr.f32.mxu1 %v17966_v3 }
 0x1f4   : > { %8788 = vmatpush1.msra.mxu0 %v18791_v4  ;;  %9302 = vmatpush1.msra.mxu1 %v18795_v11 }
 0x1f5   : > { %8873 = vmatprep.subr.mxu0 %v8613_v5  ;;  %9387 = vmatprep.subr.mxu1 %v9127_v10  ;;  %v18999_v5 = vand.u32 4294901760, %v8508_v15  ;;  %v16941_v10 = vld [vmem:[%s18041_s30 + $0xc0] sm:$0x1f] }
 0x1f6   : > { %8779 = vmatmul.mubr.f32.gmra.mrb[26].mxu0 %v18044_v9  ;;  %9293 = vmatmul.mubr.f32.gmra.mrb[26].mxu1 %v18044_v9  ;;  %v8499_v23 = vsel %vm305_vm1, %v16941_v10, 0 }
 0x1f7   : > { %8851 = vmatprep.mubr.f32.mxu0 %v17966_v3  ;;  %9365 = vmatprep.mubr.f32.mxu1 %v17966_v3  ;;  %v19019_v13 = vsub.f32 %v8508_v15, %v18999_v5  ;;  %v19024_v29 = vand.u32 4294901760, %v8499_v23 }
 0x1f9   : > { %v11183_v33 = vand.u32 4294901760, %v19019_v13  ;;  %v19036_v12 = vsub.f32 %v8499_v23, %v19024_v29 }
 0x1fa   : > { %8855 = vmatmul.mubr.f32.vlgmr.msra.gmra.mrb[24].mxu0 %v18054_v18  ;;  %9369 = vmatmul.mubr.f32.vlgmr.msra.gmra.mrb[24].mxu1 %v18054_v18 }
 0x1fb   : > { %8860 = vmatprep.mubr.f32.mxu0 %v17966_v3  ;;  %9374 = vmatprep.mubr.f32.mxu1 %v17966_v3  ;;  %v11184_v42 = vsub.f32 %v19019_v13, %v11183_v33  ;;  %v10675_v43 = vand.u32 4294901760, %v19036_v12 }
 0x1fc   : > { %8877 = vmatpush1.msra.mxu0 %v8619_v19  ;;  %9391 = vmatpush1.msra.mxu1 %v9133_v28  ;;  %v16943_v19 = vld [vmem:[%s18041_s30 + $0xd0] sm:$0x1f] }
 0x1fd   : > { %8956 = vmatprep.subr.mxu0 %v18782_v62  ;;  %9470 = vmatprep.subr.mxu1 %v18786_v2  ;;  %v10163_v62 = vand.u32 4294901760, %v10162_v54  ;;  %v8505_v59 = vsel %vm305_vm1, %v16943_v19, 0  ;;  %v11185_v37 = vand.u32 4294901760, %v11184_v42  ;;  %v10676_v38 = vsub.f32 %v19036_v12, %v10675_v43 }
 0x1fe   : > { %8864 = vmatmul.mubr.f32.gmra.mrb[26].mxu0 %v18068_v25  ;;  %9378 = vmatmul.mubr.f32.gmra.mrb[26].mxu1 %v18068_v25  ;;  %v19026_v30 = vand.u32 4294901760, %v8505_v59 }
 0x1ff   : > { %8940 = vmatprep.mubr.f32.mxu0 %v17966_v3  ;;  %9454 = vmatprep.mubr.f32.mxu1 %v17966_v3 }
 0x200   : > { %v19041_v35 = vsub.f32 %v8505_v59, %v19026_v30 }
 0x202   : > { %8942 = vmatmul.mubr.f32.vlgmr.msra.gmra.mrb[24].mxu0 %v18030_v6  ;;  %9456 = vmatmul.mubr.f32.vlgmr.msra.gmra.mrb[24].mxu1 %v18030_v6 }
 0x203   : > { %8947 = vmatprep.mubr.f32.mxu0 %v17966_v3  ;;  %9461 = vmatprep.mubr.f32.mxu1 %v17966_v3 }
 0x204   : > { %8958 = vmatpush1.msra.mxu0 %v18791_v4  ;;  %9472 = vmatpush1.msra.mxu1 %v18795_v11  ;;  %v16942_v11 = vld [vmem:[%s18041_s30 + $0xc8] sm:$0x1f] }
 0x205   : > { %9551 = vmatprep.subr.mxu0 %v18872_v41  ;;  %10065 = vmatprep.subr.mxu1 %v18875_v46  ;;  %v8502_v17 = vsel %vm305_vm1, %v16942_v11, 0 }
 0x206   : > { %8949 = vmatmul.mubr.f32.gmra.mrb[26].mxu0 %v18032_v7  ;;  %9463 = vmatmul.mubr.f32.gmra.mrb[26].mxu1 %v18032_v7  ;;  %v18996_v24 = vand.u32 4294901760, %v8502_v17 }
 0x207   : > { %9021 = vmatprep.mubr.f32.mxu0 %v17966_v3  ;;  %9535 = vmatprep.mubr.f32.mxu1 %v17966_v3 }
 0x208   : > { %v19013_v28 = vsub.f32 %v8502_v17, %v18996_v24 }
 0x20a   : > { %9023 = vmatmul.mubr.f32.vlgmr.msra.gmra.mrb[24].mxu0 %v18030_v6  ;;  %9537 = vmatmul.mubr.f32.vlgmr.msra.gmra.mrb[24].mxu1 %v18030_v6  ;;  %v10669_v32 = vand.u32 4294901760, %v19013_v28 }
 0x20b   : > { %9028 = vmatprep.mubr.f32.mxu0 %v17966_v3  ;;  %9542 = vmatprep.mubr.f32.mxu1 %v17966_v3 }
 0x20c   : > { %9553 = vmatpush1.msra.mxu0 %v18900_v14  ;;  %10067 = vmatpush1.msra.mxu1 %v18902_v49  ;;  %v10670_v39 = vsub.f32 %v19013_v28, %v10669_v32 }
 0x20d   : > { %9644 = vmatprep.subr.mxu0 %v9643_v50  ;;  %10158 = vmatprep.subr.mxu1 %v10157_v58  ;;  %v16945_v50 = vld [vmem:[%s18041_s30 + $0xe0] sm:$0x1f] }
 0x20e   : > { %9030 = vmatmul.mubr.f32.gmra.mrb[26].mxu0 %v18032_v7  ;;  %9544 = vmatmul.mubr.f32.gmra.mrb[26].mxu1 %v18032_v7  ;;  %v8511_v58 = vsel %vm305_vm1, %v16945_v50, 0 }
 0x20f   : > { %9616 = vmatprep.mubr.f32.mxu0 %v17966_v3  ;;  %10130 = vmatprep.mubr.f32.mxu1 %v17966_v3 }
 0x212   : > { %9622 = vmatmul.mubr.f32.vlgmr.msra.gmra.mrb[28].mxu0 %v18085_v31  ;;  %10136 = vmatmul.mubr.f32.vlgmr.msra.gmra.mrb[28].mxu1 %v18085_v31 }
 0x213   : > { %9627 = vmatprep.mubr.f32.mxu0 %v17966_v3  ;;  %10141 = vmatprep.mubr.f32.mxu1 %v17966_v3 }
 0x214   : > { %9650 = vmatpush1.msra.mxu0 %v9649_v61  ;;  %10164 = vmatpush1.msra.mxu1 %v10163_v62  ;;  %v19148_v62 = vand.u32 4294901760, %v8511_v58 }
 0x215   : > { %9730 = vmatprep.subr.mxu0 %v18889_v45  ;;  %10244 = vmatprep.subr.mxu1 %v18895_v48  ;;  %v10677_v45 = vand.u32 4294901760, %v10676_v38 }
 0x216   : > { %9633 = vmatmul.mubr.f32.gmra.mrb[30].mxu0 %v18092_v36  ;;  %10147 = vmatmul.mubr.f32.gmra.mrb[30].mxu1 %v18092_v36  ;;  %v19160_v15 = vsub.f32 %v8511_v58, %v19148_v62 }
 0x217   : > { %9713 = vmatprep.mubr.f32.mxu0 %v17966_v3  ;;  %10227 = vmatprep.mubr.f32.mxu1 %v17966_v3 }
 0x218   : > { %v11703_v19 = vand.u32 4294901760, %v19160_v15 }
 0x21a   : > { %9715 = vmatmul.mubr.f32.vlgmr.msra.gmra.mrb[28].mxu0 %v18030_v6  ;;  %10229 = vmatmul.mubr.f32.vlgmr.msra.gmra.mrb[28].mxu1 %v18030_v6 }
 0x21b   : > { %9720 = vmatprep.mubr.f32.mxu0 %v17966_v3  ;;  %10234 = vmatprep.mubr.f32.mxu1 %v17966_v3 }
 0x21c   : > { %9733 = vmatpush1.msra.mxu0 %v18912_v55  ;;  %10247 = vmatpush1.msra.mxu1 %v18917_v60  ;;  %v16948_v55 = vld [vmem:[%s18041_s30 + $0xf8] sm:$0x1f] }
 0x21d   : > { %9814 = vmatprep.subr.mxu0 %v18872_v41  ;;  %10328 = vmatprep.subr.mxu1 %v18875_v46  ;;  %v8520_v63 = vsel %vm305_vm1, %v16948_v55, 0 }
 0x21e   : > { %9722 = vmatmul.mubr.f32.gmra.mrb[30].mxu0 %v18032_v7  ;;  %10236 = vmatmul.mubr.f32.gmra.mrb[30].mxu1 %v18032_v7 }
 0x21f   : > { %9796 = vmatprep.mubr.f32.mxu0 %v17966_v3  ;;  %10310 = vmatprep.mubr.f32.mxu1 %v17966_v3 }
 0x221   : > { %v18970_v1 = vpop.f32.mrb[16].mxu0 }
 0x222   : > { %v18972_v2 = vpop.f32.mrb[16].mxu1  ;;  %v18974_v56 = vpop.f32.mrb[17].mxu0  ;;  %9799 = vmatmul.mubr.f32.vlgmr.msra.gmra.mrb[28].mxu0 %v18036_v8  ;;  %10313 = vmatmul.mubr.f32.vlgmr.msra.gmra.mrb[28].mxu1 %v18036_v8 }
 0x223   : > { %v18977_v4 = vpop.f32.mrb[17].mxu1  ;;  %9804 = vmatprep.mubr.f32.mxu0 %v17966_v3  ;;  %10318 = vmatprep.mubr.f32.mxu1 %v17966_v3 }
 0x224   : > { %9816 = vmatpush1.msra.mxu0 %v18900_v14  ;;  %10330 = vmatpush1.msra.mxu1 %v18902_v49 }
 0x225   : > { %9901 = vmatprep.subr.mxu0 %v9641_v40  ;;  %10415 = vmatprep.subr.mxu1 %v10155_v52  ;;  %v16946_v52 = vld [vmem:[%s18041_s30 + $0xe8] sm:$0x1f] }
 0x226   : > { %9807 = vmatmul.mubr.f32.gmra.mrb[30].mxu0 %v18044_v9  ;;  %10321 = vmatmul.mubr.f32.gmra.mrb[30].mxu1 %v18044_v9  ;;  %v8514_v60 = vsel %vm305_vm1, %v16946_v52, 0 }
 0x227   : > { %9879 = vmatprep.mubr.f32.mxu0 %v17966_v3  ;;  %10393 = vmatprep.mubr.f32.mxu1 %v17966_v3  ;;  %v19120_v57 = vand.u32 4294901760, %v8514_v60 }
 0x229   : > { %v19137_v0 = vsub.f32 %v8514_v60, %v19120_v57 }
 0x22a   : > { %9883 = vmatmul.mubr.f32.vlgmr.msra.gmra.mrb[28].mxu0 %v18054_v18  ;;  %10397 = vmatmul.mubr.f32.vlgmr.msra.gmra.mrb[28].mxu1 %v18054_v18 }
 0x22b   : > { %9888 = vmatprep.mubr.f32.mxu0 %v17966_v3  ;;  %10402 = vmatprep.mubr.f32.mxu1 %v17966_v3  ;;  %v11697_v16 = vand.u32 4294901760, %v19137_v0 }
 0x22c   : > { %9905 = vmatpush1.msra.mxu0 %v9647_v53  ;;  %10419 = vmatpush1.msra.mxu1 %v10161_v51  ;;  %v19123_v53 = vand.u32 4294901760, %v8520_v63  ;;  %v16947_v51 = vld [vmem:[%s18041_s30 + $0xf0] sm:$0x1f] }
 0x22d   : > { %9984 = vmatprep.subr.mxu0 %v18872_v41  ;;  %10498 = vmatprep.subr.mxu1 %v18875_v46  ;;  %v10671_v41 = vand.u32 4294901760, %v10670_v39  ;;  %v11189_v46 = vand.u32 4294901760, %v19041_v35  ;;  %v8517_v54 = vsel %vm305_vm1, %v16947_v51, 0 }
 0x22e   : > { %9892 = vmatmul.mubr.f32.gmra.mrb[30].mxu0 %v18068_v25  ;;  %10406 = vmatmul.mubr.f32.gmra.mrb[30].mxu1 %v18068_v25  ;;  %v19143_v61 = vsub.f32 %v8520_v63, %v19123_v53  ;;  %v19150_v11 = vand.u32 4294901760, %v8517_v54 }
 0x22f   : > { %9968 = vmatprep.mubr.f32.mxu0 %v17966_v3  ;;  %10482 = vmatprep.mubr.f32.mxu1 %v17966_v3  ;;  %v11190_v44 = vsub.f32 %v19041_v35, %v11189_v46 }
 0x230   : > { %v12211_v17 = vand.u32 4294901760, %v19143_v61 }
 0x231   : > { %v11191_v47 = vand.u32 4294901760, %v11190_v44 }
 0x232   : > { %9970 = vmatmul.mubr.f32.vlgmr.msra.gmra.mrb[28].mxu0 %v18030_v6  ;;  %10484 = vmatmul.mubr.f32.vlgmr.msra.gmra.mrb[28].mxu1 %v18030_v6  ;;  %v12212_v10 = vsub.f32 %v19143_v61, %v12211_v17 }
 0x233   : > { %9975 = vmatprep.mubr.f32.mxu0 %v17966_v3  ;;  %10489 = vmatprep.mubr.f32.mxu1 %v17966_v3 }
 0x234   : > { %9986 = vmatpush1.msra.mxu0 %v18900_v14  ;;  %10500 = vmatpush1.msra.mxu1 %v18902_v49  ;;  %v12213_v59 = vand.u32 4294901760, %v12212_v10 }
 0x235   : > { %10579 = vmatprep.subr.mxu0 %v18996_v24  ;;  %11093 = vmatprep.subr.mxu1 %v18999_v5 }
 0x236   : > { %9977 = vmatmul.mubr.f32.gmra.mrb[30].mxu0 %v18032_v7  ;;  %10491 = vmatmul.mubr.f32.gmra.mrb[30].mxu1 %v18032_v7 }
 0x237   : > { %10049 = vmatprep.mubr.f32.mxu0 %v17966_v3  ;;  %10563 = vmatprep.mubr.f32.mxu1 %v17966_v3 }
 0x23a   : > { %10051 = vmatmul.mubr.f32.vlgmr.msra.gmra.mrb[28].mxu0 %v18030_v6  ;;  %10565 = vmatmul.mubr.f32.vlgmr.msra.gmra.mrb[28].mxu1 %v18030_v6 }
 0x23b   : > { %10056 = vmatprep.mubr.f32.mxu0 %v17966_v3  ;;  %10570 = vmatprep.mubr.f32.mxu1 %v17966_v3 }
 0x23c   : > { %10581 = vmatpush1.msra.mxu0 %v19024_v29  ;;  %11095 = vmatpush1.msra.mxu1 %v19026_v30 }
 0x23d   : > { %10672 = vmatprep.subr.mxu0 %v10671_v41  ;;  %11186 = vmatprep.subr.mxu1 %v11185_v37 }
 0x23e   : > { %10058 = vmatmul.mubr.f32.gmra.mrb[30].mxu0 %v18032_v7  ;;  %10572 = vmatmul.mubr.f32.gmra.mrb[30].mxu1 %v18032_v7 }
 0x23f   : > { %10644 = vmatprep.mubr.f32.mxu0 %v17966_v3  ;;  %11158 = vmatprep.mubr.f32.mxu1 %v17966_v3 }
 0x242   : > { %10650 = vmatmul.mubr.f32.vlgmr.msra.gmra.mrb[32].mxu0 %v18085_v31  ;;  %11164 = vmatmul.mubr.f32.vlgmr.msra.gmra.mrb[32].mxu1 %v18085_v31 }
 0x243   : > { %10655 = vmatprep.mubr.f32.mxu0 %v17966_v3  ;;  %11169 = vmatprep.mubr.f32.mxu1 %v17966_v3 }
 0x244   : > { %10678 = vmatpush1.msra.mxu0 %v10677_v45  ;;  %11192 = vmatpush1.msra.mxu1 %v11191_v47 }
 0x245   : > { %10758 = vmatprep.subr.mxu0 %v19013_v28  ;;  %11272 = vmatprep.subr.mxu1 %v19019_v13  ;;  %v11704_v13 = vsub.f32 %v19160_v15, %v11703_v19 }
 0x246   : > { %10661 = vmatmul.mubr.f32.gmra.mrb[34].mxu0 %v18092_v36  ;;  %11175 = vmatmul.mubr.f32.gmra.mrb[34].mxu1 %v18092_v36 }
 0x247   : > { %10741 = vmatprep.mubr.f32.mxu0 %v17966_v3  ;;  %11255 = vmatprep.mubr.f32.mxu1 %v17966_v3 }
 0x24a   : > { %10743 = vmatmul.mubr.f32.vlgmr.msra.gmra.mrb[32].mxu0 %v18030_v6  ;;  %11257 = vmatmul.mubr.f32.vlgmr.msra.gmra.mrb[32].mxu1 %v18030_v6 }
 0x24b   : > { %10748 = vmatprep.mubr.f32.mxu0 %v17966_v3  ;;  %11262 = vmatprep.mubr.f32.mxu1 %v17966_v3 }
 0x24c   : > { %10761 = vmatpush1.msra.mxu0 %v19036_v12  ;;  %11275 = vmatpush1.msra.mxu1 %v19041_v35 }
 0x24d   : > { %10842 = vmatprep.subr.mxu0 %v18996_v24  ;;  %11356 = vmatprep.subr.mxu1 %v18999_v5 }
 0x24e   : > { %10750 = vmatmul.mubr.f32.gmra.mrb[34].mxu0 %v18032_v7  ;;  %11264 = vmatmul.mubr.f32.gmra.mrb[34].mxu1 %v18032_v7 }
 0x24f   : > { %10824 = vmatprep.mubr.f32.mxu0 %v17966_v3  ;;  %11338 = vmatprep.mubr.f32.mxu1 %v17966_v3 }
 0x251   : > { %v19094_v48 = vpop.f32.mrb[18].mxu0 }
 0x252   : > { %v19096_v14 = vpop.f32.mrb[18].mxu1  ;;  %v19098_v49 = vpop.f32.mrb[19].mxu0  ;;  %10827 = vmatmul.mubr.f32.vlgmr.msra.gmra.mrb[32].mxu0 %v18036_v8  ;;  %11341 = vmatmul.mubr.f32.vlgmr.msra.gmra.mrb[32].mxu1 %v18036_v8 }
 0x253   : > { %v19101_v40 = vpop.f32.mrb[19].mxu1  ;;  %10832 = vmatprep.mubr.f32.mxu0 %v17966_v3  ;;  %11346 = vmatprep.mubr.f32.mxu1 %v17966_v3 }
 0x254   : > { %10844 = vmatpush1.msra.mxu0 %v19024_v29  ;;  %11358 = vmatpush1.msra.mxu1 %v19026_v30 }
 0x255   : > { %10929 = vmatprep.subr.mxu0 %v10669_v32  ;;  %11443 = vmatprep.subr.mxu1 %v11183_v33 }
 0x256   : > { %10835 = vmatmul.mubr.f32.gmra.mrb[34].mxu0 %v18044_v9  ;;  %11349 = vmatmul.mubr.f32.gmra.mrb[34].mxu1 %v18044_v9 }
 0x257   : > { %10907 = vmatprep.mubr.f32.mxu0 %v17966_v3  ;;  %11421 = vmatprep.mubr.f32.mxu1 %v17966_v3 }
 0x25a   : > { %10911 = vmatmul.mubr.f32.vlgmr.msra.gmra.mrb[32].mxu0 %v18054_v18  ;;  %11425 = vmatmul.mubr.f32.vlgmr.msra.gmra.mrb[32].mxu1 %v18054_v18 }
 0x25b   : > { %10916 = vmatprep.mubr.f32.mxu0 %v17966_v3  ;;  %11430 = vmatprep.mubr.f32.mxu1 %v17966_v3 }
 0x25c   : > { %10933 = vmatpush1.msra.mxu0 %v10675_v43  ;;  %11447 = vmatpush1.msra.mxu1 %v11189_v46 }
 0x25d   : > { %11012 = vmatprep.subr.mxu0 %v18996_v24  ;;  %11526 = vmatprep.subr.mxu1 %v18999_v5  ;;  %v19165_v24 = vsub.f32 %v8517_v54, %v19150_v11  ;;  %v11698_v5 = vsub.f32 %v19137_v0, %v11697_v16 }
 0x25e   : > { %10920 = vmatmul.mubr.f32.gmra.mrb[34].mxu0 %v18068_v25  ;;  %11434 = vmatmul.mubr.f32.gmra.mrb[34].mxu1 %v18068_v25 }
 0x25f   : > { %10996 = vmatprep.mubr.f32.mxu0 %v17966_v3  ;;  %11510 = vmatprep.mubr.f32.mxu1 %v17966_v3  ;;  %v11699_v23 = vand.u32 4294901760, %v11698_v5  ;;  %v12217_v28 = vand.u32 4294901760, %v19165_v24 }
 0x262   : > { %10998 = vmatmul.mubr.f32.vlgmr.msra.gmra.mrb[32].mxu0 %v18030_v6  ;;  %11512 = vmatmul.mubr.f32.vlgmr.msra.gmra.mrb[32].mxu1 %v18030_v6 }
 0x263   : > { %11003 = vmatprep.mubr.f32.mxu0 %v17966_v3  ;;  %11517 = vmatprep.mubr.f32.mxu1 %v17966_v3 }
 0x264   : > { %11014 = vmatpush1.msra.mxu0 %v19024_v29  ;;  %11528 = vmatpush1.msra.mxu1 %v19026_v30  ;;  %v12218_v29 = vsub.f32 %v19165_v24, %v12217_v28  ;;  %v11705_v30 = vand.u32 4294901760, %v11704_v13 }
 0x265   : > { %11607 = vmatprep.subr.mxu0 %v19120_v57  ;;  %12121 = vmatprep.subr.mxu1 %v19123_v53 }
 0x266   : > { %11005 = vmatmul.mubr.f32.gmra.mrb[34].mxu0 %v18032_v7  ;;  %11519 = vmatmul.mubr.f32.gmra.mrb[34].mxu1 %v18032_v7  ;;  %v12219_v32 = vand.u32 4294901760, %v12218_v29 }
 0x267   : > { %11077 = vmatprep.mubr.f32.mxu0 %v17966_v3  ;;  %11591 = vmatprep.mubr.f32.mxu1 %v17966_v3 }
 0x26a   : > { %11079 = vmatmul.mubr.f32.vlgmr.msra.gmra.mrb[32].mxu0 %v18030_v6  ;;  %11593 = vmatmul.mubr.f32.vlgmr.msra.gmra.mrb[32].mxu1 %v18030_v6 }
 0x26b   : > { %11084 = vmatprep.mubr.f32.mxu0 %v17966_v3  ;;  %11598 = vmatprep.mubr.f32.mxu1 %v17966_v3 }
 0x26c   : > { %11609 = vmatpush1.msra.mxu0 %v19148_v62  ;;  %12123 = vmatpush1.msra.mxu1 %v19150_v11 }
 0x26d   : > { %11700 = vmatprep.subr.mxu0 %v11699_v23  ;;  %12214 = vmatprep.subr.mxu1 %v12213_v59 }
 0x26e   : > { %11086 = vmatmul.mubr.f32.gmra.mrb[34].mxu0 %v18032_v7  ;;  %11600 = vmatmul.mubr.f32.gmra.mrb[34].mxu1 %v18032_v7 }
 0x26f   : > { %11672 = vmatprep.mubr.f32.mxu0 %v17966_v3  ;;  %12186 = vmatprep.mubr.f32.mxu1 %v17966_v3 }
 0x272   : > { %11678 = vmatmul.mubr.f32.vlgmr.msra.gmra.mrb[36].mxu0 %v18085_v31  ;;  %12192 = vmatmul.mubr.f32.vlgmr.msra.gmra.mrb[36].mxu1 %v18085_v31 }
 0x273   : > { %11683 = vmatprep.mubr.f32.mxu0 %v17966_v3  ;;  %12197 = vmatprep.mubr.f32.mxu1 %v17966_v3 }
 0x274   : > { %11706 = vmatpush1.msra.mxu0 %v11705_v30  ;;  %12220 = vmatpush1.msra.mxu1 %v12219_v32 }
 0x275   : > { %11786 = vmatprep.subr.mxu0 %v19137_v0  ;;  %12300 = vmatprep.subr.mxu1 %v19143_v61 }
 0x276   : > { %11689 = vmatmul.mubr.f32.gmra.mrb[38].mxu0 %v18092_v36  ;;  %12203 = vmatmul.mubr.f32.gmra.mrb[38].mxu1 %v18092_v36 }
 0x277   : > { %11769 = vmatprep.mubr.f32.mxu0 %v17966_v3  ;;  %12283 = vmatprep.mubr.f32.mxu1 %v17966_v3 }
 0x27a   : > { %11771 = vmatmul.mubr.f32.vlgmr.msra.gmra.mrb[36].mxu0 %v18030_v6  ;;  %12285 = vmatmul.mubr.f32.vlgmr.msra.gmra.mrb[36].mxu1 %v18030_v6 }
 0x27b   : > { %11776 = vmatprep.mubr.f32.mxu0 %v17966_v3  ;;  %12290 = vmatprep.mubr.f32.mxu1 %v17966_v3 }
 0x27c   : > { %11789 = vmatpush1.msra.mxu0 %v19160_v15  ;;  %12303 = vmatpush1.msra.mxu1 %v19165_v24 }
 0x27d   : > { %11870 = vmatprep.subr.mxu0 %v19120_v57  ;;  %12384 = vmatprep.subr.mxu1 %v19123_v53 }
 0x27e   : > { %11778 = vmatmul.mubr.f32.gmra.mrb[38].mxu0 %v18032_v7  ;;  %12292 = vmatmul.mubr.f32.gmra.mrb[38].mxu1 %v18032_v7 }
 0x27f   : > { %11852 = vmatprep.mubr.f32.mxu0 %v17966_v3  ;;  %12366 = vmatprep.mubr.f32.mxu1 %v17966_v3 }
 0x281   : > { %v19216_v31 = vpop.f32.mrb[20].mxu0 }
 0x282   : > { %v19218_v36 = vpop.f32.mrb[20].mxu1  ;;  %v19220_v33 = vpop.f32.mrb[21].mxu0  ;;  %11855 = vmatmul.mubr.f32.vlgmr.msra.gmra.mrb[36].mxu0 %v18036_v8  ;;  %12369 = vmatmul.mubr.f32.vlgmr.msra.gmra.mrb[36].mxu1 %v18036_v8 }
 0x283   : > { %v19223_v12 = vpop.f32.mrb[21].mxu1  ;;  %11860 = vmatprep.mubr.f32.mxu0 %v17966_v3  ;;  %12374 = vmatprep.mubr.f32.mxu1 %v17966_v3 }
 0x284   : > { %11872 = vmatpush1.msra.mxu0 %v19148_v62  ;;  %12386 = vmatpush1.msra.mxu1 %v19150_v11 }
 0x285   : > { %11957 = vmatprep.subr.mxu0 %v11697_v16  ;;  %12471 = vmatprep.subr.mxu1 %v12211_v17 }
 0x286   : > { %11863 = vmatmul.mubr.f32.gmra.mrb[38].mxu0 %v18044_v9  ;;  %12377 = vmatmul.mubr.f32.gmra.mrb[38].mxu1 %v18044_v9 }
 0x287   : > { %11935 = vmatprep.mubr.f32.mxu0 %v17966_v3  ;;  %12449 = vmatprep.mubr.f32.mxu1 %v17966_v3 }
 0x28a   : > { %11939 = vmatmul.mubr.f32.vlgmr.msra.gmra.mrb[36].mxu0 %v18054_v18  ;;  %12453 = vmatmul.mubr.f32.vlgmr.msra.gmra.mrb[36].mxu1 %v18054_v18 }
 0x28b   : > { %11944 = vmatprep.mubr.f32.mxu0 %v17966_v3  ;;  %12458 = vmatprep.mubr.f32.mxu1 %v17966_v3 }
 0x28c   : > { %11961 = vmatpush1.msra.mxu0 %v11703_v19  ;;  %12475 = vmatpush1.msra.mxu1 %v12217_v28 }
 0x28d   : > { %12040 = vmatprep.subr.mxu0 %v19120_v57  ;;  %12554 = vmatprep.subr.mxu1 %v19123_v53 }
 0x28e   : > { %11948 = vmatmul.mubr.f32.gmra.mrb[38].mxu0 %v18068_v25  ;;  %12462 = vmatmul.mubr.f32.gmra.mrb[38].mxu1 %v18068_v25 }
 0x28f   : > { %12024 = vmatprep.mubr.f32.mxu0 %v17966_v3  ;;  %12538 = vmatprep.mubr.f32.mxu1 %v17966_v3 }
 0x292   : > { %12026 = vmatmul.mubr.f32.vlgmr.msra.gmra.mrb[36].mxu0 %v18030_v6  ;;  %12540 = vmatmul.mubr.f32.vlgmr.msra.gmra.mrb[36].mxu1 %v18030_v6 }
 0x293   : > { %12031 = vmatprep.mubr.f32.mxu0 %v17966_v3  ;;  %12545 = vmatprep.mubr.f32.mxu1 %v17966_v3 }
 0x294   : > { %12042 = vmatpush1.msra.mxu0 %v19148_v62  ;;  %12556 = vmatpush1.msra.mxu1 %v19150_v11 }
 0x296   : > { %12033 = vmatmul.mubr.f32.gmra.mrb[38].mxu0 %v18032_v7  ;;  %12547 = vmatmul.mubr.f32.gmra.mrb[38].mxu1 %v18032_v7 }
 0x297   : > { %12105 = vmatprep.mubr.f32.mxu0 %v17966_v3  ;;  %12619 = vmatprep.mubr.f32.mxu1 %v17966_v3 }
 0x29a   : > { %12107 = vmatmul.mubr.f32.vlgmr.msra.gmra.mrb[36].mxu0 %v18030_v6  ;;  %12621 = vmatmul.mubr.f32.vlgmr.msra.gmra.mrb[36].mxu1 %v18030_v6 }
 0x29b   : > { %12112 = vmatprep.mubr.f32.mxu0 %v17966_v3  ;;  %12626 = vmatprep.mubr.f32.mxu1 %v17966_v3 }
 0x29e   : > { %12114 = vmatmul.mubr.f32.gmra.mrb[38].mxu0 %v18032_v7  ;;  %12628 = vmatmul.mubr.f32.gmra.mrb[38].mxu1 %v18032_v7 }
 0x29f   : > { %12734 = vmatprep.mubr.f32.mxu0 %v17966_v3  ;;  %13225 = vmatprep.mubr.f32.mxu1 %v17966_v3 }
 0x2b1   : > { %v19268_v8 = vpop.f32.mrb[22].mxu0  ;;  %v19270_v9 = vpop.f32.mrb[22].mxu1 }
 0x2b2   : > { %v19272_v18 = vpop.f32.mrb[23].mxu0  ;;  %v19274_v25 = vpop.f32.mrb[23].mxu1 }
 0x2dd   : > { %v9024_v6 = vpop.f32.mrb[24].mxu0  ;;  %v9538_v39 = vpop.f32.mrb[24].mxu1 }
 0x2de   : > { %v17385_v35 = vadd.f32 %v9024_v6, %v18505_v21  ;;  %v9026_v42 = vpop.f32.mrb[25].mxu0  ;;  %v17389_v43 = vadd.f32 %v9538_v39, %v18505_v21  ;;  %v9540_v41 = vpop.f32.mrb[25].mxu1 }
 0x2df   : > { %v17386_v7 = vadd.f32 %v9026_v42, %v18505_v21  ;;  %v17390_v37 = vadd.f32 %v9540_v41, %v18505_v21 }
 0x2e0   : > { %v12634_v46 = vmax.f32 %v17385_v35, 0.0  ;;  %v12636_v38 = vmax.f32 %v17389_v43, 0.0 }
 0x2e1   : > { %v12635_v44 = vmax.f32 %v17386_v7, 0.0  ;;  %v9031_v45 = vpop.f32.mrb[26].mxu0  ;;  %v12637_v52 = vmax.f32 %v17390_v37, 0.0  ;;  %v9545_v60 = vpop.f32.mrb[26].mxu1 }
 0x2e2   : > { %v12668_v47 = vand.u32 4294901760, %v12634_v46  ;;  %v17387_v55 = vadd.f32 %v9031_v45, %v18517_v34  ;;  %v9033_v63 = vpop.f32.mrb[27].mxu0  ;;  %v13159_v57 = vand.u32 4294901760, %v12636_v38  ;;  %v17391_v50 = vadd.f32 %v9545_v60, %v18517_v34  ;;  %v9547_v58 = vpop.f32.mrb[27].mxu1 }
 0x2e3   : > { %v12666_v53 = vand.u32 4294901760, %v12635_v44  ;;  %v17388_v51 = vadd.f32 %v9033_v63, %v18517_v34  ;;  %v13157_v54 = vand.u32 4294901760, %v12637_v52  ;;  %v17392_v62 = vadd.f32 %v9547_v58, %v18517_v34 }
 0x2e4   : > { %v19283_v0 = vsub.f32 %v12634_v46, %v12668_v47  ;;  %v12650_v61 = vmax.f32 %v17387_v55, 0.0  ;;  %v19286_v11 = vsub.f32 %v12636_v38, %v13159_v57  ;;  %v12652_v17 = vmax.f32 %v17391_v50, 0.0 }
 0x2e5   : > { %v19288_v16 = vsub.f32 %v12635_v44, %v12666_v53  ;;  %v12651_v15 = vmax.f32 %v17388_v51, 0.0  ;;  %v13238_v5 = vsub.f32 %v12637_v52, %v13157_v54  ;;  %v12653_v19 = vmax.f32 %v17392_v62, 0.0 }
 0x2e6   : > { %v12754_v24 = vand.u32 4294901760, %v19283_v0  ;;  %v12672_v10 = vand.u32 4294901760, %v12650_v61  ;;  %v13245_v23 = vand.u32 4294901760, %v19286_v11  ;;  %v13163_v59 = vand.u32 4294901760, %v12652_v17 }
 0x2e7   : > { %v12748_v28 = vand.u32 4294901760, %v19288_v16  ;;  %v12670_v13 = vand.u32 4294901760, %v12651_v15  ;;  %v13239_v30 = vand.u32 4294901760, %v13238_v5  ;;  %v13161_v41 = vand.u32 4294901760, %v12653_v19 }
 0x2e8   : > { %v12755_v29 = vsub.f32 %v19283_v0, %v12754_v24  ;;  %v19294_v32 = vpack.c.bf16 %v12672_v10, %v12668_v47  ;;  %v12765_v6 = vsub.f32 %v12650_v61, %v12672_v10  ;;  %v13246_v35 = vsub.f32 %v19286_v11, %v13245_v23 }
 0x2e9   : > { %v19297_v39 = vpack.c.bf16 %v13163_v59, %v13159_v57  ;;  %v13256_v42 = vsub.f32 %v12652_v17, %v13163_v59  ;;  %v12759_v43 = vsub.f32 %v12651_v15, %v12670_v13  ;;  %v19299_v46 = vpack.c.bf16 %v12670_v13, %v12666_v53 }
 0x2ea   : > { %v12766_v7 = vand.u32 4294901760, %v12765_v6  ;;  %v12756_v37 = vand.u32 4294901760, %v12755_v29  ;;  %v12749_v45 = vsub.f32 %v19288_v16, %v12748_v28  ;;  %v13247_v52 = vand.u32 4294901760, %v13246_v35 }
 0x2eb   : > { %v13257_v38 = vand.u32 4294901760, %v13256_v42  ;;  %v12760_v44 = vand.u32 4294901760, %v12759_v43  ;;  %v13250_v47 = vsub.f32 %v12653_v19, %v13161_v41  ;;  %17146 = vmatprep.subr.bf16.mxu0 %v19299_v46  ;;  %v17169_v60 = vpack.c.bf16 %v13161_v41, %v13157_v54 }
 0x2ec   : > { %v12767_v55 = vsub.f32 %v12765_v6, %v12766_v7  ;;  %17148 = vmatpush1.bf16.msra.mxu0 %v19294_v32  ;;  %v13240_v50 = vsub.f32 %v13238_v5, %v13239_v30  ;;  %v17153_v51 = vpack.c.bf16 %v12759_v43, %v19288_v16  ;;  %v12750_v61 = vand.u32 4294901760, %v12749_v45 }
 0x2ed   : > { %v13258_v63 = vsub.f32 %v13256_v42, %v13257_v38  ;;  %v12761_v57 = vsub.f32 %v12759_v43, %v12760_v44  ;;  %v13251_v58 = vand.u32 4294901760, %v13250_v47  ;;  %17170 = vmatprep.subr.bf16.mxu1 %v17169_v60  ;;  %v17177_v62 = vpack.c.bf16 %v13250_v47, %v13238_v5 }
 0x2ee   : > { %v12768_v53 = vand.u32 4294901760, %v12767_v55  ;;  %17172 = vmatpush1.bf16.msra.mxu1 %v19297_v39  ;;  %v17155_v10 = vpack.c.bf16 %v12765_v6, %v19283_v0  ;;  %v17179_v54 = vpack.c.bf16 %v13256_v42, %v19286_v11  ;;  %v17161_v13 = vpack.c.bf16 %v12760_v44, %v12748_v28 }
 0x2ef   : > { %v13259_v17 = vand.u32 4294901760, %v13258_v63  ;;  %v12762_v15 = vand.u32 4294901760, %v12761_v57  ;;  %12740 = vmatmul.mubr.f32.vlgmr.msra.gmra.mrb[40].mxu0 %v18545_v27  ;;  %v13252_v19 = vsub.f32 %v13250_v47, %v13251_v58  ;;  %v17185_v29 = vpack.c.bf16 %v13251_v58, %v13239_v30 }
 0x2f0   : > { %v17151_v59 = vpack.c.bf16 %v12768_v53, %v12756_v37  ;;  %12830 = vmatprep.mubr.f32.mxu0 %v17966_v3  ;;  %v17163_v43 = vpack.c.bf16 %v12766_v7, %v12754_v24  ;;  %v17187_v5 = vpack.c.bf16 %v13257_v38, %v13245_v23  ;;  %v13241_v41 = vand.u32 4294901760, %v13240_v50 }
 0x2f1   : > { %v17149_v16 = vpack.c.bf16 %v12762_v15, %v12750_v61  ;;  %v17175_v35 = vpack.c.bf16 %v13259_v17, %v13247_v52  ;;  %13231 = vmatmul.mubr.f32.vlgmr.msra.gmra.mrb[40].mxu1 %v18545_v27  ;;  %v13253_v45 = vand.u32 4294901760, %v13252_v19 }
 0x2f2   : > { %13321 = vmatprep.mubr.f32.mxu1 %v17966_v3 }
 0x2f3   : > { %17150 = vmatprep.subr.bf16.mxu0 %v17149_v16  ;;  %v17173_v0 = vpack.c.bf16 %v13253_v45, %v13241_v41 }
 0x2f4   : > { %17152 = vmatpush1.bf16.msra.mxu0 %v17151_v59 }
 0x2f5   : > { %17154 = vmatprep.subr.bf16.mxu0 %v17153_v51  ;;  %17174 = vmatprep.subr.bf16.mxu1 %v17173_v0 }
 0x2f6   : > { %17176 = vmatpush1.bf16.msra.mxu1 %v17175_v35 }
 0x2f7   : > { %17178 = vmatprep.subr.bf16.mxu1 %v17177_v62  ;;  %12832 = vmatmul.mubr.f32.vlgmr.msra.gmra.mrb[40].mxu0 %v18503_v20 }
 0x2f8   : > { %17156 = vmatpush1.bf16.msra.mxu0 %v17155_v10  ;;  %12910 = vmatprep.mubr.f32.mxu0 %v17966_v3 }
 0x2f9   : > { %13323 = vmatmul.mubr.f32.vlgmr.msra.gmra.mrb[40].mxu1 %v18503_v20  ;;  %17158 = vmatprep.subr.bf16.mxu0 %v19299_v46 }
 0x2fa   : > { %17180 = vmatpush1.bf16.msra.mxu1 %v17179_v54  ;;  %13401 = vmatprep.mubr.f32.mxu1 %v17966_v3 }
 0x2fb   : > { %17182 = vmatprep.subr.bf16.mxu1 %v17169_v60 }
 0x2ff   : > { %12913 = vmatmul.mubr.f32.vlgmr.msra.gmra.mrb[40].mxu0 %v18508_v22 }
 0x300   : > { %17160 = vmatpush1.bf16.msra.mxu0 %v19294_v32  ;;  %12987 = vmatprep.mubr.f32.mxu0 %v17966_v3 }
 0x301   : > { %13404 = vmatmul.mubr.f32.vlgmr.msra.gmra.mrb[40].mxu1 %v18508_v22  ;;  %17162 = vmatprep.subr.bf16.mxu0 %v17161_v13 }
 0x302   : > { %17184 = vmatpush1.bf16.msra.mxu1 %v19297_v39  ;;  %13478 = vmatprep.mubr.f32.mxu1 %v17966_v3 }
 0x303   : > { %17186 = vmatprep.subr.bf16.mxu1 %v17185_v29 }
 0x307   : > { %12991 = vmatmul.mubr.f32.vlgmr.msra.gmra.mrb[40].mxu0 %v18511_v26 }
 0x308   : > { %17164 = vmatpush1.bf16.msra.mxu0 %v17163_v43  ;;  %13073 = vmatprep.mubr.f32.mxu0 %v17966_v3 }
 0x309   : > { %13482 = vmatmul.mubr.f32.vlgmr.msra.gmra.mrb[40].mxu1 %v18511_v26  ;;  %17166 = vmatprep.subr.bf16.mxu0 %v19299_v46 }
 0x30a   : > { %17188 = vmatpush1.bf16.msra.mxu1 %v17187_v5  ;;  %13564 = vmatprep.mubr.f32.mxu1 %v17966_v3 }
 0x30b   : > { %17190 = vmatprep.subr.bf16.mxu1 %v17169_v60 }
 0x30d   : > { %v10052_v11 = vpop.f32.mrb[28].mxu0  ;;  %v10566_v23 = vpop.f32.mrb[28].mxu1 }
 0x30e   : > { %v17393_v24 = vadd.f32 %v10052_v11, %v18505_v21  ;;  %v10054_v28 = vpop.f32.mrb[29].mxu0  ;;  %v17397_v30 = vadd.f32 %v10566_v23, %v18505_v21  ;;  %v10568_v42 = vpop.f32.mrb[29].mxu1 }
 0x30f   : > { %v17394_v6 = vadd.f32 %v10054_v28, %v18505_v21  ;;  %v17398_v37 = vadd.f32 %v10568_v42, %v18505_v21  ;;  %13075 = vmatmul.mubr.f32.vlgmr.msra.gmra.mrb[40].mxu0 %v18503_v20 }
 0x310   : > { %v12638_v7 = vmax.f32 %v17393_v24, 0.0  ;;  %v12640_v46 = vmax.f32 %v17397_v30, 0.0  ;;  %17168 = vmatpush1.bf16.msra.mxu0 %v19294_v32  ;;  %13149 = vmatprep.mubr.f32.mxu0 %v17966_v3 }
 0x311   : > { %v12639_v38 = vmax.f32 %v17394_v6, 0.0  ;;  %v10059_v44 = vpop.f32.mrb[30].mxu0  ;;  %v12641_v55 = vmax.f32 %v17398_v37, 0.0  ;;  %13566 = vmatmul.mubr.f32.vlgmr.msra.gmra.mrb[40].mxu1 %v18503_v20  ;;  %v10573_v60 = vpop.f32.mrb[30].mxu1 }
 0x312   : > { %v13650_v52 = vand.u32 4294901760, %v12638_v7  ;;  %v17395_v47 = vadd.f32 %v10059_v44, %v18517_v34  ;;  %v10061_v63 = vpop.f32.mrb[31].mxu0  ;;  %v14141_v57 = vand.u32 4294901760, %v12640_v46  ;;  %17192 = vmatpush1.bf16.msra.mxu1 %v19297_v39  ;;  %v17399_v51 = vadd.f32 %v10573_v60, %v18517_v34  ;;  %v10575_v32 = vpop.f32.mrb[31].mxu1  ;;  %13640 = vmatprep.mubr.f32.mxu1 %v17966_v3 }
 0x313   : > { %v13648_v50 = vand.u32 4294901760, %v12639_v38  ;;  %v17396_v53 = vadd.f32 %v10061_v63, %v18517_v34  ;;  %v14139_v61 = vand.u32 4294901760, %v12641_v55  ;;  %v17400_v17 = vadd.f32 %v10575_v32, %v18517_v34 }
 0x314   : > { %v19341_v58 = vsub.f32 %v12638_v7, %v13650_v52  ;;  %v12654_v62 = vmax.f32 %v17395_v47, 0.0  ;;  %v19344_v15 = vsub.f32 %v12640_v46, %v14141_v57  ;;  %v12656_v54 = vmax.f32 %v17399_v51, 0.0 }
 0x315   : > { %v19346_v10 = vsub.f32 %v12639_v38, %v13648_v50  ;;  %v12655_v19 = vmax.f32 %v17396_v53, 0.0  ;;  %v19349_v59 = vsub.f32 %v12641_v55, %v14139_v61  ;;  %v12657_v29 = vmax.f32 %v17400_v17, 0.0 }
 0x316   : > { %v13736_v39 = vand.u32 4294901760, %v19341_v58  ;;  %v13654_v13 = vand.u32 4294901760, %v12654_v62  ;;  %v14227_v16 = vand.u32 4294901760, %v19344_v15  ;;  %v14145_v43 = vand.u32 4294901760, %v12656_v54 }
 0x317   : > { %v13730_v35 = vand.u32 4294901760, %v19346_v10  ;;  %v13652_v5 = vand.u32 4294901760, %v12655_v19  ;;  %v14221_v45 = vand.u32 4294901760, %v19349_v59  ;;  %13151 = vmatmul.mubr.f32.vlgmr.msra.gmra.mrb[40].mxu0 %v18503_v20  ;;  %v14143_v42 = vand.u32 4294901760, %v12657_v29 }
 0x318   : > { %v13737_v41 = vsub.f32 %v19341_v58, %v13736_v39  ;;  %v19355_v0 = vpack.c.bf16 %v13654_v13, %v13650_v52  ;;  %v13747_v11 = vsub.f32 %v12654_v62, %v13654_v13  ;;  %v14228_v24 = vsub.f32 %v19344_v15, %v14227_v16  ;;  %13716 = vmatprep.mubr.f32.mxu0 %v17966_v3 }
 0x319   : > { %v19359_v23 = vpack.c.bf16 %v14145_v43, %v14141_v57  ;;  %v14238_v28 = vsub.f32 %v12656_v54, %v14145_v43  ;;  %v13741_v30 = vsub.f32 %v12655_v19, %v13652_v5  ;;  %13642 = vmatmul.mubr.f32.vlgmr.msra.gmra.mrb[40].mxu1 %v18503_v20  ;;  %v19363_v7 = vpack.c.bf16 %v13652_v5, %v13648_v50 }
 0x31a   : > { %v13748_v6 = vand.u32 4294901760, %v13747_v11  ;;  %v13738_v37 = vand.u32 4294901760, %v13737_v41  ;;  %14207 = vmatprep.mubr.f32.mxu1 %v17966_v3  ;;  %v13731_v44 = vsub.f32 %v19346_v10, %v13730_v35  ;;  %v14229_v52 = vand.u32 4294901760, %v14228_v24 }
 0x31b   : > { %v14239_v46 = vand.u32 4294901760, %v14238_v28  ;;  %v13742_v38 = vand.u32 4294901760, %v13741_v30  ;;  %v14232_v47 = vsub.f32 %v12657_v29, %v14143_v42  ;;  %17194 = vmatprep.subr.bf16.mxu0 %v19363_v7  ;;  %v17217_v60 = vpack.c.bf16 %v14143_v42, %v14139_v61 }
 0x31c   : > { %v13749_v55 = vsub.f32 %v13747_v11, %v13748_v6  ;;  %17196 = vmatpush1.bf16.msra.mxu0 %v19355_v0  ;;  %v14222_v50 = vsub.f32 %v19349_v59, %v14221_v45  ;;  %v17201_v51 = vpack.c.bf16 %v13741_v30, %v19346_v10  ;;  %v13732_v62 = vand.u32 4294901760, %v13731_v44 }
 0x31d   : > { %v14240_v63 = vsub.f32 %v14238_v28, %v14239_v46  ;;  %v13743_v57 = vsub.f32 %v13741_v30, %v13742_v38  ;;  %v14233_v32 = vand.u32 4294901760, %v14232_v47  ;;  %17218 = vmatprep.subr.bf16.mxu1 %v17217_v60  ;;  %v17225_v17 = vpack.c.bf16 %v14232_v47, %v19349_v59 }
 0x31e   : > { %v13750_v53 = vand.u32 4294901760, %v13749_v55  ;;  %17220 = vmatpush1.bf16.msra.mxu1 %v19359_v23  ;;  %v17203_v61 = vpack.c.bf16 %v13747_v11, %v19341_v58  ;;  %v17227_v13 = vpack.c.bf16 %v14238_v28, %v19344_v15  ;;  %v17209_v5 = vpack.c.bf16 %v13742_v38, %v13730_v35 }
 0x31f   : > { %v14241_v54 = vand.u32 4294901760, %v14240_v63  ;;  %v13744_v19 = vand.u32 4294901760, %v13743_v57  ;;  %13722 = vmatmul.mubr.f32.vlgmr.msra.gmra.mrb[42].mxu0 %v18545_v27  ;;  %v14234_v29 = vsub.f32 %v14232_v47, %v14233_v32  ;;  %v17233_v10 = vpack.c.bf16 %v14233_v32, %v14221_v45 }
 0x320   : > { %v17199_v43 = vpack.c.bf16 %v13750_v53, %v13738_v37  ;;  %13812 = vmatprep.mubr.f32.mxu0 %v17966_v3  ;;  %v17211_v30 = vpack.c.bf16 %v13748_v6, %v13736_v39  ;;  %v17235_v59 = vpack.c.bf16 %v14239_v46, %v14227_v16  ;;  %v14223_v42 = vand.u32 4294901760, %v14222_v50 }
 0x321   : > { %v17197_v41 = vpack.c.bf16 %v13744_v19, %v13732_v62  ;;  %v17223_v24 = vpack.c.bf16 %v14241_v54, %v14229_v52  ;;  %14213 = vmatmul.mubr.f32.vlgmr.msra.gmra.mrb[42].mxu1 %v18545_v27  ;;  %v14235_v44 = vand.u32 4294901760, %v14234_v29 }
 0x322   : > { %14303 = vmatprep.mubr.f32.mxu1 %v17966_v3 }
 0x323   : > { %17198 = vmatprep.subr.bf16.mxu0 %v17197_v41  ;;  %v17221_v58 = vpack.c.bf16 %v14235_v44, %v14223_v42 }
 0x324   : > { %17200 = vmatpush1.bf16.msra.mxu0 %v17199_v43 }
 0x325   : > { %17202 = vmatprep.subr.bf16.mxu0 %v17201_v51  ;;  %17222 = vmatprep.subr.bf16.mxu1 %v17221_v58 }
 0x326   : > { %17224 = vmatpush1.bf16.msra.mxu1 %v17223_v24 }
 0x327   : > { %17226 = vmatprep.subr.bf16.mxu1 %v17225_v17  ;;  %13814 = vmatmul.mubr.f32.vlgmr.msra.gmra.mrb[42].mxu0 %v18503_v20 }
 0x328   : > { %17204 = vmatpush1.bf16.msra.mxu0 %v17203_v61  ;;  %13892 = vmatprep.mubr.f32.mxu0 %v17966_v3 }
 0x329   : > { %14305 = vmatmul.mubr.f32.vlgmr.msra.gmra.mrb[42].mxu1 %v18503_v20  ;;  %17206 = vmatprep.subr.bf16.mxu0 %v19363_v7 }
 0x32a   : > { %17228 = vmatpush1.bf16.msra.mxu1 %v17227_v13  ;;  %14383 = vmatprep.mubr.f32.mxu1 %v17966_v3 }
 0x32b   : > { %17230 = vmatprep.subr.bf16.mxu1 %v17217_v60 }
 0x32f   : > { %13895 = vmatmul.mubr.f32.vlgmr.msra.gmra.mrb[42].mxu0 %v18508_v22 }
 0x330   : > { %17208 = vmatpush1.bf16.msra.mxu0 %v19355_v0  ;;  %13969 = vmatprep.mubr.f32.mxu0 %v17966_v3 }
 0x331   : > { %14386 = vmatmul.mubr.f32.vlgmr.msra.gmra.mrb[42].mxu1 %v18508_v22  ;;  %17210 = vmatprep.subr.bf16.mxu0 %v17209_v5 }
 0x332   : > { %17232 = vmatpush1.bf16.msra.mxu1 %v19359_v23  ;;  %14460 = vmatprep.mubr.f32.mxu1 %v17966_v3 }
 0x333   : > { %17234 = vmatprep.subr.bf16.mxu1 %v17233_v10 }
 0x337   : > { %13973 = vmatmul.mubr.f32.vlgmr.msra.gmra.mrb[42].mxu0 %v18511_v26 }
 0x338   : > { %17212 = vmatpush1.bf16.msra.mxu0 %v17211_v30  ;;  %14055 = vmatprep.mubr.f32.mxu0 %v17966_v3 }
 0x339   : > { %14464 = vmatmul.mubr.f32.vlgmr.msra.gmra.mrb[42].mxu1 %v18511_v26  ;;  %17214 = vmatprep.subr.bf16.mxu0 %v19363_v7 }
 0x33a   : > { %17236 = vmatpush1.bf16.msra.mxu1 %v17235_v59  ;;  %14546 = vmatprep.mubr.f32.mxu1 %v17966_v3 }
 0x33b   : > { %17238 = vmatprep.subr.bf16.mxu1 %v17217_v60 }
 0x33d   : > { %v11080_v15 = vpop.f32.mrb[32].mxu0  ;;  %v11594_v16 = vpop.f32.mrb[32].mxu1 }
 0x33e   : > { %v17401_v39 = vadd.f32 %v11080_v15, %v18505_v21  ;;  %v11082_v35 = vpop.f32.mrb[33].mxu0  ;;  %v17405_v45 = vadd.f32 %v11594_v16, %v18505_v21  ;;  %v11596_v28 = vpop.f32.mrb[33].mxu1 }
 0x33f   : > { %v17402_v11 = vadd.f32 %v11082_v35, %v18505_v21  ;;  %v17406_v37 = vadd.f32 %v11596_v28, %v18505_v21  ;;  %14057 = vmatmul.mubr.f32.vlgmr.msra.gmra.mrb[42].mxu0 %v18503_v20 }
 0x340   : > { %v12642_v6 = vmax.f32 %v17401_v39, 0.0  ;;  %v12644_v7 = vmax.f32 %v17405_v45, 0.0  ;;  %17216 = vmatpush1.bf16.msra.mxu0 %v19355_v0  ;;  %14131 = vmatprep.mubr.f32.mxu0 %v17966_v3 }
 0x341   : > { %v12643_v46 = vmax.f32 %v17402_v11, 0.0  ;;  %v11087_v38 = vpop.f32.mrb[34].mxu0  ;;  %v12645_v55 = vmax.f32 %v17406_v37, 0.0  ;;  %14548 = vmatmul.mubr.f32.vlgmr.msra.gmra.mrb[42].mxu1 %v18503_v20  ;;  %v11601_v60 = vpop.f32.mrb[34].mxu1 }
 0x342   : > { %v14632_v52 = vand.u32 4294901760, %v12642_v6  ;;  %v17403_v47 = vadd.f32 %v11087_v38, %v18517_v34  ;;  %v11089_v63 = vpop.f32.mrb[35].mxu0  ;;  %v15123_v57 = vand.u32 4294901760, %v12644_v7  ;;  %17240 = vmatpush1.bf16.msra.mxu1 %v19359_v23  ;;  %v17407_v51 = vadd.f32 %v11601_v60, %v18517_v34  ;;  %v11603_v0 = vpop.f32.mrb[35].mxu1  ;;  %14622 = vmatprep.mubr.f32.mxu1 %v17966_v3 }
 0x343   : > { %v14630_v50 = vand.u32 4294901760, %v12643_v46  ;;  %v17404_v53 = vadd.f32 %v11089_v63, %v18517_v34  ;;  %v15121_v62 = vand.u32 4294901760, %v12645_v55  ;;  %v17408_v54 = vadd.f32 %v11603_v0, %v18517_v34 }
 0x344   : > { %v19408_v32 = vsub.f32 %v12642_v6, %v14632_v52  ;;  %v12658_v17 = vmax.f32 %v17403_v47, 0.0  ;;  %v19411_v19 = vsub.f32 %v12644_v7, %v15123_v57  ;;  %v12660_v13 = vmax.f32 %v17407_v51, 0.0 }
 0x345   : > { %v19413_v61 = vsub.f32 %v12643_v46, %v14630_v50  ;;  %v12659_v29 = vmax.f32 %v17404_v53, 0.0  ;;  %v19416_v43 = vsub.f32 %v12645_v55, %v15121_v62  ;;  %v12661_v10 = vmax.f32 %v17408_v54, 0.0 }
 0x346   : > { %v14718_v23 = vand.u32 4294901760, %v19408_v32  ;;  %v14636_v5 = vand.u32 4294901760, %v12658_v17  ;;  %v15209_v41 = vand.u32 4294901760, %v19411_v19  ;;  %v15127_v30 = vand.u32 4294901760, %v12660_v13 }
 0x347   : > { %v14712_v24 = vand.u32 4294901760, %v19413_v61  ;;  %v14634_v59 = vand.u32 4294901760, %v12659_v29  ;;  %v15203_v44 = vand.u32 4294901760, %v19416_v43  ;;  %14133 = vmatmul.mubr.f32.vlgmr.msra.gmra.mrb[42].mxu0 %v18503_v20  ;;  %v15125_v28 = vand.u32 4294901760, %v12661_v10 }
 0x348   : > { %v14719_v42 = vsub.f32 %v19408_v32, %v14718_v23  ;;  %v19422_v58 = vpack.c.bf16 %v14636_v5, %v14632_v52  ;;  %v14729_v15 = vsub.f32 %v12658_v17, %v14636_v5  ;;  %v15210_v39 = vsub.f32 %v19411_v19, %v15209_v41  ;;  %14698 = vmatprep.mubr.f32.mxu0 %v17966_v3 }
 0x349   : > { %v19426_v16 = vpack.c.bf16 %v15127_v30, %v15123_v57  ;;  %v15220_v35 = vsub.f32 %v12660_v13, %v15127_v30  ;;  %v14723_v45 = vsub.f32 %v12659_v29, %v14634_v59  ;;  %14624 = vmatmul.mubr.f32.vlgmr.msra.gmra.mrb[42].mxu1 %v18503_v20  ;;  %v19430_v6 = vpack.c.bf16 %v14634_v59, %v14630_v50 }
 0x34a   : > { %v14730_v11 = vand.u32 4294901760, %v14729_v15  ;;  %v14720_v37 = vand.u32 4294901760, %v14719_v42  ;;  %15189 = vmatprep.mubr.f32.mxu1 %v17966_v3  ;;  %v14713_v38 = vsub.f32 %v19413_v61, %v14712_v24  ;;  %v15211_v52 = vand.u32 4294901760, %v15210_v39 }
 0x34b   : > { %v15221_v7 = vand.u32 4294901760, %v15220_v35  ;;  %v14724_v46 = vand.u32 4294901760, %v14723_v45  ;;  %v15214_v47 = vsub.f32 %v12661_v10, %v15125_v28  ;;  %17242 = vmatprep.subr.bf16.mxu0 %v19430_v6  ;;  %v17265_v60 = vpack.c.bf16 %v15125_v28, %v15121_v62 }
 0x34c   : > { %v14731_v55 = vsub.f32 %v14729_v15, %v14730_v11  ;;  %17244 = vmatpush1.bf16.msra.mxu0 %v19422_v58  ;;  %v15204_v50 = vsub.f32 %v19416_v43, %v15203_v44  ;;  %v17249_v51 = vpack.c.bf16 %v14723_v45, %v19413_v61  ;;  %v14714_v17 = vand.u32 4294901760, %v14713_v38 }
 0x34d   : > { %v15222_v63 = vsub.f32 %v15220_v35, %v15221_v7  ;;  %v14725_v57 = vsub.f32 %v14723_v45, %v14724_v46  ;;  %v15215_v0 = vand.u32 4294901760, %v15214_v47  ;;  %17266 = vmatprep.subr.bf16.mxu1 %v17265_v60  ;;  %v17273_v54 = vpack.c.bf16 %v15214_v47, %v19416_v43 }
 0x34e   : > { %v14732_v53 = vand.u32 4294901760, %v14731_v55  ;;  %17268 = vmatpush1.bf16.msra.mxu1 %v19426_v16  ;;  %v17251_v62 = vpack.c.bf16 %v14729_v15, %v19408_v32  ;;  %v17275_v5 = vpack.c.bf16 %v15220_v35, %v19411_v19  ;;  %v17257_v59 = vpack.c.bf16 %v14724_v46, %v14712_v24 }
 0x34f   : > { %v15223_v13 = vand.u32 4294901760, %v15222_v63  ;;  %v14726_v29 = vand.u32 4294901760, %v14725_v57  ;;  %14704 = vmatmul.mubr.f32.vlgmr.msra.gmra.mrb[44].mxu0 %v18545_v27  ;;  %v15216_v10 = vsub.f32 %v15214_v47, %v15215_v0  ;;  %v17281_v61 = vpack.c.bf16 %v15215_v0, %v15203_v44 }
 0x350   : > { %v17247_v30 = vpack.c.bf16 %v14732_v53, %v14720_v37  ;;  %14794 = vmatprep.mubr.f32.mxu0 %v17966_v3  ;;  %v17259_v45 = vpack.c.bf16 %v14730_v11, %v14718_v23  ;;  %v17283_v43 = vpack.c.bf16 %v15221_v7, %v15209_v41  ;;  %v15205_v28 = vand.u32 4294901760, %v15204_v50 }
 0x351   : > { %v17245_v42 = vpack.c.bf16 %v14726_v29, %v14714_v17  ;;  %v17271_v39 = vpack.c.bf16 %v15223_v13, %v15211_v52  ;;  %15195 = vmatmul.mubr.f32.vlgmr.msra.gmra.mrb[44].mxu1 %v18545_v27  ;;  %v15217_v38 = vand.u32 4294901760, %v15216_v10 }
 0x352   : > { %15285 = vmatprep.mubr.f32.mxu1 %v17966_v3 }
 0x353   : > { %17246 = vmatprep.subr.bf16.mxu0 %v17245_v42  ;;  %v17269_v32 = vpack.c.bf16 %v15217_v38, %v15205_v28 }
 0x354   : > { %17248 = vmatpush1.bf16.msra.mxu0 %v17247_v30 }
 0x355   : > { %17250 = vmatprep.subr.bf16.mxu0 %v17249_v51  ;;  %17270 = vmatprep.subr.bf16.mxu1 %v17269_v32 }
 0x356   : > { %17272 = vmatpush1.bf16.msra.mxu1 %v17271_v39 }
 0x357   : > { %17274 = vmatprep.subr.bf16.mxu1 %v17273_v54  ;;  %14796 = vmatmul.mubr.f32.vlgmr.msra.gmra.mrb[44].mxu0 %v18503_v20 }
 0x358   : > { %17252 = vmatpush1.bf16.msra.mxu0 %v17251_v62  ;;  %14874 = vmatprep.mubr.f32.mxu0 %v17966_v3 }
 0x359   : > { %15287 = vmatmul.mubr.f32.vlgmr.msra.gmra.mrb[44].mxu1 %v18503_v20  ;;  %17254 = vmatprep.subr.bf16.mxu0 %v19430_v6 }
 0x35a   : > { %17276 = vmatpush1.bf16.msra.mxu1 %v17275_v5  ;;  %15365 = vmatprep.mubr.f32.mxu1 %v17966_v3 }
 0x35b   : > { %17278 = vmatprep.subr.bf16.mxu1 %v17265_v60 }
 0x35f   : > { %14877 = vmatmul.mubr.f32.vlgmr.msra.gmra.mrb[44].mxu0 %v18508_v22 }
 0x360   : > { %17256 = vmatpush1.bf16.msra.mxu0 %v19422_v58  ;;  %14951 = vmatprep.mubr.f32.mxu0 %v17966_v3 }
 0x361   : > { %15368 = vmatmul.mubr.f32.vlgmr.msra.gmra.mrb[44].mxu1 %v18508_v22  ;;  %17258 = vmatprep.subr.bf16.mxu0 %v17257_v59 }
 0x362   : > { %17280 = vmatpush1.bf16.msra.mxu1 %v19426_v16  ;;  %15442 = vmatprep.mubr.f32.mxu1 %v17966_v3 }
 0x363   : > { %17282 = vmatprep.subr.bf16.mxu1 %v17281_v61 }
 0x367   : > { %14955 = vmatmul.mubr.f32.vlgmr.msra.gmra.mrb[44].mxu0 %v18511_v26 }
 0x368   : > { %17260 = vmatpush1.bf16.msra.mxu0 %v17259_v45  ;;  %15037 = vmatprep.mubr.f32.mxu0 %v17966_v3 }
 0x369   : > { %15446 = vmatmul.mubr.f32.vlgmr.msra.gmra.mrb[44].mxu1 %v18511_v26  ;;  %17262 = vmatprep.subr.bf16.mxu0 %v19430_v6 }
 0x36a   : > { %17284 = vmatpush1.bf16.msra.mxu1 %v17283_v43  ;;  %15528 = vmatprep.mubr.f32.mxu1 %v17966_v3 }
 0x36b   : > { %17286 = vmatprep.subr.bf16.mxu1 %v17265_v60 }
 0x36d   : > { %v12108_v19 = vpop.f32.mrb[36].mxu0  ;;  %v12622_v41 = vpop.f32.mrb[36].mxu1 }
 0x36e   : > { %v17409_v23 = vadd.f32 %v12108_v19, %v18505_v21  ;;  %v12110_v24 = vpop.f32.mrb[37].mxu0  ;;  %v17413_v44 = vadd.f32 %v12622_v41, %v18505_v21  ;;  %v12624_v35 = vpop.f32.mrb[37].mxu1 }
 0x36f   : > { %v17410_v15 = vadd.f32 %v12110_v24, %v18505_v21  ;;  %v17414_v37 = vadd.f32 %v12624_v35, %v18505_v21  ;;  %15039 = vmatmul.mubr.f32.vlgmr.msra.gmra.mrb[44].mxu0 %v18503_v20 }
 0x370   : > { %v12646_v11 = vmax.f32 %v17409_v23, 0.0  ;;  %v12648_v6 = vmax.f32 %v17413_v44, 0.0  ;;  %17264 = vmatpush1.bf16.msra.mxu0 %v19422_v58  ;;  %15113 = vmatprep.mubr.f32.mxu0 %v17966_v3 }
 0x371   : > { %v12647_v7 = vmax.f32 %v17410_v15, 0.0  ;;  %v12115_v46 = vpop.f32.mrb[38].mxu0  ;;  %v12649_v55 = vmax.f32 %v17414_v37, 0.0  ;;  %15530 = vmatmul.mubr.f32.vlgmr.msra.gmra.mrb[44].mxu1 %v18503_v20  ;;  %v12629_v60 = vpop.f32.mrb[38].mxu1 }
 0x372   : > { %v15614_v52 = vand.u32 4294901760, %v12646_v11  ;;  %v17411_v47 = vadd.f32 %v12115_v46, %v18517_v34  ;;  %v12117_v63 = vpop.f32.mrb[39].mxu0  ;;  %v16105_v57 = vand.u32 4294901760, %v12648_v6  ;;  %17288 = vmatpush1.bf16.msra.mxu1 %v19426_v16  ;;  %v17415_v21 = vadd.f32 %v12629_v60, %v18517_v34  ;;  %v12631_v58 = vpop.f32.mrb[39].mxu1  ;;  %15604 = vmatprep.mubr.f32.mxu1 %v17966_v3 }
 0x373   : > { %v15612_v50 = vand.u32 4294901760, %v12647_v7  ;;  %v17412_v51 = vadd.f32 %v12117_v63, %v18517_v34  ;;  %v16103_v0 = vand.u32 4294901760, %v12649_v55  ;;  %v17416_v54 = vadd.f32 %v12631_v58, %v18517_v34 }
 0x374   : > { %v19475_v53 = vsub.f32 %v12646_v11, %v15614_v52  ;;  %v12662_v17 = vmax.f32 %v17411_v47, 0.0  ;;  %v19478_v13 = vsub.f32 %v12648_v6, %v16105_v57  ;;  %v12664_v62 = vmax.f32 %v17415_v21, 0.0 }
 0x375   : > { %v19480_v29 = vsub.f32 %v12647_v7, %v15612_v50  ;;  %v12663_v5 = vmax.f32 %v17412_v51, 0.0  ;;  %v19483_v10 = vsub.f32 %v12649_v55, %v16103_v0  ;;  %v12665_v59 = vmax.f32 %v17416_v54, 0.0 }
 0x376   : > { %v15700_v16 = vand.u32 4294901760, %v19475_v53  ;;  %v15618_v30 = vand.u32 4294901760, %v12662_v17  ;;  %v16191_v61 = vand.u32 4294901760, %v19478_v13  ;;  %v16109_v39 = vand.u32 4294901760, %v12664_v62 }
 0x377   : > { %v15694_v42 = vand.u32 4294901760, %v19480_v29  ;;  %v15616_v45 = vand.u32 4294901760, %v12663_v5  ;;  %v16185_v43 = vand.u32 4294901760, %v19483_v10  ;;  %15115 = vmatmul.mubr.f32.vlgmr.msra.gmra.mrb[44].mxu0 %v18503_v20  ;;  %v16107_v44 = vand.u32 4294901760, %v12665_v59 }
 0x378   : > { %v15701_v34 = vsub.f32 %v19475_v53, %v15700_v16  ;;  %v19489_v28 = vpack.c.bf16 %v15618_v30, %v15614_v52  ;;  %v15711_v38 = vsub.f32 %v12662_v17, %v15618_v30  ;;  %v16192_v32 = vsub.f32 %v19478_v13, %v16191_v61  ;;  %15680 = vmatprep.mubr.f32.mxu0 %v17966_v3 }
 0x379   : > { %v19493_v19 = vpack.c.bf16 %v16109_v39, %v16105_v57  ;;  %v16202_v23 = vsub.f32 %v12664_v62, %v16109_v39  ;;  %v15705_v41 = vsub.f32 %v12663_v5, %v15616_v45  ;;  %15606 = vmatmul.mubr.f32.vlgmr.msra.gmra.mrb[44].mxu1 %v18503_v20  ;;  %v19497_v15 = vpack.c.bf16 %v15616_v45, %v15612_v50 }
 0x37a   : > { %v15712_v24 = vand.u32 4294901760, %v15711_v38  ;;  %v15702_v35 = vand.u32 4294901760, %v15701_v34  ;;  %16171 = vmatprep.mubr.f32.mxu1 %v17966_v3  ;;  %v15695_v6 = vsub.f32 %v19480_v29, %v15694_v42  ;;  %v16193_v7 = vand.u32 4294901760, %v16192_v32 }
 0x37b   : > { %v16203_v11 = vand.u32 4294901760, %v16202_v23  ;;  %v15706_v37 = vand.u32 4294901760, %v15705_v41  ;;  %v16196_v52 = vsub.f32 %v12665_v59, %v16107_v44  ;;  %17290 = vmatprep.subr.bf16.mxu0 %v19497_v15  ;;  %v17313_v55 = vpack.c.bf16 %v16107_v44, %v16103_v0 }
 0x37c   : > { %v15713_v46 = vsub.f32 %v15711_v38, %v15712_v24  ;;  %17292 = vmatpush1.bf16.msra.mxu0 %v19489_v28  ;;  %v16186_v63 = vsub.f32 %v19483_v10, %v16185_v43  ;;  %v17297_v57 = vpack.c.bf16 %v15705_v41, %v19480_v29  ;;  %v15696_v51 = vand.u32 4294901760, %v15695_v6 }
 0x37d   : > { %v16204_v47 = vsub.f32 %v16202_v23, %v16203_v11  ;;  %v15707_v60 = vsub.f32 %v15705_v41, %v15706_v37  ;;  %v16197_v21 = vand.u32 4294901760, %v16196_v52  ;;  %17314 = vmatprep.subr.bf16.mxu1 %v17313_v55  ;;  %v17321_v58 = vpack.c.bf16 %v16196_v52, %v19483_v10 }
 0x37e   : > { %v15714_v50 = vand.u32 4294901760, %v15713_v46  ;;  %17316 = vmatpush1.bf16.msra.mxu1 %v19493_v19  ;;  %v17299_v0 = vpack.c.bf16 %v15711_v38, %v19475_v53  ;;  %v17323_v62 = vpack.c.bf16 %v16202_v23, %v19478_v13  ;;  %v17305_v59 = vpack.c.bf16 %v15706_v37, %v15694_v42  ;;  %v4503_v13 = vpop.permute.xlu1 %4502 }
 0x37f   : > { %v16205_v17 = vand.u32 4294901760, %v16204_v47  ;;  %v15708_v54 = vand.u32 4294901760, %v15707_v60  ;;  %15686 = vmatmul.mubr.f32.vlgmr.msra.gmra.mrb[46].mxu0 %v18545_v27  ;;  %v16198_v5 = vsub.f32 %v16196_v52, %v16197_v21  ;;  %v17329_v29 = vpack.c.bf16 %v16197_v21, %v16185_v43 }
 0x380   : > { %v17295_v30 = vpack.c.bf16 %v15714_v50, %v15702_v35  ;;  %15776 = vmatprep.mubr.f32.mxu0 %v17966_v3  ;;  %v17307_v34 = vpack.c.bf16 %v15712_v24, %v15700_v16  ;;  %v17331_v10 = vpack.c.bf16 %v16203_v11, %v16191_v61  ;;  %v16187_v32 = vand.u32 4294901760, %v16186_v63 }
 0x381   : > { %v17293_v39 = vpack.c.bf16 %v15708_v54, %v15696_v51  ;;  %v17319_v45 = vpack.c.bf16 %v16205_v17, %v16193_v7  ;;  %16177 = vmatmul.mubr.f32.vlgmr.msra.gmra.mrb[46].mxu1 %v18545_v27  ;;  %v16199_v41 = vand.u32 4294901760, %v16198_v5 }
 0x382   : > { %16267 = vmatprep.mubr.f32.mxu1 %v17966_v3 }
 0x383   : > { %17294 = vmatprep.subr.bf16.mxu0 %v17293_v39  ;;  %v17317_v53 = vpack.c.bf16 %v16199_v41, %v16187_v32 }
 0x384   : > { %17296 = vmatpush1.bf16.msra.mxu0 %v17295_v30 }
 0x385   : > { %17298 = vmatprep.subr.bf16.mxu0 %v17297_v57  ;;  %17318 = vmatprep.subr.bf16.mxu1 %v17317_v53 }
 0x386   : > { %17320 = vmatpush1.bf16.msra.mxu1 %v17319_v45 }
 0x387   : > { %17322 = vmatprep.subr.bf16.mxu1 %v17321_v58  ;;  %15778 = vmatmul.mubr.f32.vlgmr.msra.gmra.mrb[46].mxu0 %v18503_v20 }
 0x388   : > { %17300 = vmatpush1.bf16.msra.mxu0 %v17299_v0  ;;  %15856 = vmatprep.mubr.f32.mxu0 %v17966_v3 }
 0x389   : > { %16269 = vmatmul.mubr.f32.vlgmr.msra.gmra.mrb[46].mxu1 %v18503_v20  ;;  %17302 = vmatprep.subr.bf16.mxu0 %v19497_v15 }
 0x38a   : > { %17324 = vmatpush1.bf16.msra.mxu1 %v17323_v62  ;;  %16347 = vmatprep.mubr.f32.mxu1 %v17966_v3 }
 0x38b   : > { %17326 = vmatprep.subr.bf16.mxu1 %v17313_v55 }
 0x38f   : > { %15859 = vmatmul.mubr.f32.vlgmr.msra.gmra.mrb[46].mxu0 %v18508_v22 }
 0x390   : > { %17304 = vmatpush1.bf16.msra.mxu0 %v19489_v28  ;;  %15933 = vmatprep.mubr.f32.mxu0 %v17966_v3 }
 0x391   : > { %16350 = vmatmul.mubr.f32.vlgmr.msra.gmra.mrb[46].mxu1 %v18508_v22  ;;  %17306 = vmatprep.subr.bf16.mxu0 %v17305_v59  ;;  %v4505_v22 = vlaneseq }
 0x392   : > { %17328 = vmatpush1.bf16.msra.mxu1 %v19493_v19  ;;  %16424 = vmatprep.mubr.f32.mxu1 %v17966_v3 }
 0x393   : > { %17330 = vmatprep.subr.bf16.mxu1 %v17329_v29 }
 0x397   : > { %15937 = vmatmul.mubr.f32.vlgmr.msra.gmra.mrb[46].mxu0 %v18511_v26 }
 0x398   : > { %17308 = vmatpush1.bf16.msra.mxu0 %v17307_v34  ;;  %16019 = vmatprep.mubr.f32.mxu0 %v17966_v3 }
 0x399   : > { %16428 = vmatmul.mubr.f32.vlgmr.msra.gmra.mrb[46].mxu1 %v18511_v26  ;;  %17310 = vmatprep.subr.bf16.mxu0 %v19497_v15  ;;  %v4506_v26 = vshrl.u32 %v4505_v22, 7 }
 0x39a   : > { %17332 = vmatpush1.bf16.msra.mxu1 %v17331_v10  ;;  %16510 = vmatprep.mubr.f32.mxu1 %v17966_v3 }
 0x39b   : > { %17334 = vmatprep.subr.bf16.mxu1 %v17313_v55  ;;  %v4507_v27 = vsub.s32 0, %v4506_v26 }
 0x39d   : > { %v19537_v16 = vrot.slane %v4503_v13, %v4507_v27 }
 0x39f   : > { %16021 = vmatmul.mubr.f32.vlgmr.msra.gmra.mrb[46].mxu0 %v18503_v20  ;;  %v17369_v61 = vadd.f32 %v18970_v1, %v19537_v16  ;;  %v17370_v42 = vadd.f32 %v18974_v56, %v19537_v16  ;;  %v17372_v23 = vadd.f32 %v18977_v4, %v19537_v16  ;;  %v17373_v41 = vadd.f32 %v19094_v48, %v19537_v16 }
 0x3a0   : > { %17312 = vmatpush1.bf16.msra.mxu0 %v19489_v28  ;;  %16095 = vmatprep.mubr.f32.mxu0 %v17966_v3  ;;  %v17968_v28 = vmov 1983009808   ;;  %v17374_v53 = vadd.f32 %v19098_v49, %v19537_v16 }
 0x3a1   : > { %16512 = vmatmul.mubr.f32.vlgmr.msra.gmra.mrb[46].mxu1 %v18503_v20  ;;  %v16725_v38 = vunpack.c.l.s4 %v17968_v28  ;;  %v8441_v15 = vmax.f32 %v17369_v61, 0.0  ;;  %v8442_v1 = vmax.f32 %v17370_v42, 0.0  ;;  %v8444_v55 = vmax.f32 %v17372_v23, 0.0 }
 0x3a2   : > { %17336 = vmatpush1.bf16.msra.mxu1 %v19493_v19  ;;  %16586 = vmatprep.mubr.f32.mxu1 %v17966_v3  ;;  %v17371_v3 = vadd.f32 %v18972_v2, %v19537_v16  ;;  %v17376_v61 = vadd.f32 %v19101_v40, %v19537_v16  ;;  %v8445_v28 = vmax.f32 %v17373_v41, 0.0 }
 0x3a3   : > { %v16726_v6 = vunpack.c.0.s8 %v16725_v38  ;;  %v16611_v63 = vsel %vm16610_vm3, %v8441_v15, 0.0  ;;  %v16612_v57 = vsel %vm16610_vm3, %v8442_v1, 0.0  ;;  %v16614_v30 = vsel %vm16610_vm3, %v8444_v55, 0.0 }
 0x3a4   : > { %v8443_v7 = vmax.f32 %v17371_v3, 0.0 }
 0x3a5   : > { %v19557_v17 = vsub.s32 %v16726_v6, %v4506_v26  ;;  %v17375_v26 = vadd.f32 %v19096_v14, %v19537_v16 }
 0x3a6   : > { %v16613_v0 = vsel %vm16610_vm3, %v8443_v7, 0.0 }
 0x3a7   : > { %16097 = vmatmul.mubr.f32.vlgmr.msra.gmra.mrb[46].mxu0 %v18503_v20  ;;  %v8447_v23 = vmax.f32 %v17375_v26, 0.0 }
 0x3a9   : > { %16588 = vmatmul.mubr.f32.vlgmr.msra.gmra.mrb[46].mxu1 %v18503_v20 }
 0x3ea   : > { %v13152_v43 = vpop.f32.mrb[40].mxu0 }
 0x3eb   : > { %v17417_v20 = vadd.f32 %v13152_v43, %v19537_v16  ;;  %v13154_v19 = vpop.f32.mrb[41].mxu0 }
 0x3ec   : > { %v13643_v24 = vpop.f32.mrb[40].mxu1  ;;  %v17418_v44 = vadd.f32 %v13154_v19, %v19537_v16 }
 0x3ed   : > { %v16594_v35 = vmax.f32 %v17417_v20, 0.0  ;;  %v17419_v56 = vadd.f32 %v13643_v24, %v19537_v16  ;;  %v13645_v11 = vpop.f32.mrb[41].mxu1  ;;  %v8446_v20 = vmax.f32 %v17374_v53, 0.0 }
 0x3ee   : > { %v16595_v37 = vmax.f32 %v17418_v44, 0.0  ;;  %v17420_v2 = vadd.f32 %v13645_v11, %v19537_v16  ;;  %v8448_v44 = vmax.f32 %v17376_v61, 0.0 }
 0x3ef   : > { %v16627_v46 = vsel %vm16610_vm3, %v16594_v35, 0.0  ;;  %v16596_v52 = vmax.f32 %v17419_v56, 0.0  ;;  %v16615_v35 = vsel %vm16610_vm3, %v8445_v28, 0.0 }
 0x3f0   : > { %v16659_v4 = vrot.slane %v16627_v46, 7  ;;  %v16628_v47 = vsel %vm16610_vm3, %v16595_v37, 0.0  ;;  %v16597_v60 = vmax.f32 %v17420_v2, 0.0  ;;  %v16616_v37 = vsel %vm16610_vm3, %v8446_v20, 0.0 }
 0x3f1   : > { %v16629_v50 = vsel %vm16610_vm3, %v16596_v52, 0.0  ;;  %v16660_v21 = vrot.slane %v16628_v47, 7  ;;  %v16617_v46 = vsel %vm16610_vm3, %v8447_v23, 0.0 }
 0x3f2   : > { %v16691_v51 = vsel %vm16610_vm3, %v16611_v63, %v16659_v4  ;;  %v16661_v58 = vrot.slane %v16629_v50, 7  ;;  %v16630_v54 = vsel %vm16610_vm3, %v16597_v60, 0.0  ;;  %v16618_v4 = vsel %vm16610_vm3, %v8448_v44, 0.0 }
 0x3f3   : > { %v16692_v62 = vsel %vm16610_vm3, %v16612_v57, %v16660_v21  ;;  %v16662_v5 = vrot.slane %v16630_v54, 7 }
 0x3f4   : > { %v16693_v59 = vsel %vm16610_vm3, %v16613_v0, %v16661_v58  ;;  %v16723_v29 = vcombine.low %v16691_v51, %v16692_v62 }
 0x3f5   : > { %v16694_v39 = vsel %vm16610_vm3, %v16614_v30, %v16662_v5  ;;  %v17377_v5 = vadd.f32 %v19216_v31, %v19537_v16  ;;  %v17378_v30 = vadd.f32 %v19220_v33, %v19537_v16 }
 0x3f6   : > { %v16730_v45 = vrot.slane %v16723_v29, %v19557_v17  ;;  %v16731_v34 = vcombine.low %v16693_v59, %v16694_v39  ;;  %v17379_v29 = vadd.f32 %v19218_v36, %v19537_v16 }
 0x3f7   : > { %v8449_v41 = vmax.f32 %v17377_v5, 0.0  ;;  %v8450_v26 = vmax.f32 %v17378_v30, 0.0 }
 0x3f8   : > { %v16738_v10 = vrot.slane %v16731_v34, %v19557_v17  ;;  %v17380_v34 = vadd.f32 %v19223_v12, %v19537_v16 }
 0x3f9   : > { %v16620_v20 = vsel %vm16610_vm3, %v8450_v26, 0.0 }
 0x3fa   : > { %v16787_v32 = vcombine.low %v16730_v45, %v16738_v10 }
 0x3fc   : > { %v16795_v58 = vrot.slane %v16787_v32, %v19557_v17 }
 0x41a   : > { %v14134_v22 = vpop.f32.mrb[42].mxu0 }
 0x41b   : > { %v17421_v27 = vadd.f32 %v14134_v22, %v19537_v16  ;;  %v14136_v13 = vpop.f32.mrb[43].mxu0 }
 0x41c   : > { %v14625_v42 = vpop.f32.mrb[42].mxu1  ;;  %v17422_v43 = vadd.f32 %v14136_v13, %v19537_v16  ;;  %v8451_v13 = vmax.f32 %v17379_v29, 0.0 }
 0x41d   : > { %v16598_v38 = vmax.f32 %v17421_v27, 0.0  ;;  %v17423_v48 = vadd.f32 %v14625_v42, %v19537_v16  ;;  %v14627_v3 = vpop.f32.mrb[43].mxu1  ;;  %v8452_v42 = vmax.f32 %v17380_v34, 0.0 }
 0x41e   : > { %v16599_v49 = vmax.f32 %v17422_v43, 0.0  ;;  %v17424_v19 = vadd.f32 %v14627_v3, %v19537_v16 }
 0x41f   : > { %v16631_v14 = vsel %vm16610_vm3, %v16598_v38, 0.0  ;;  %v16600_v24 = vmax.f32 %v17423_v48, 0.0  ;;  %v16619_v38 = vsel %vm16610_vm3, %v8449_v41, 0.0 }
 0x420   : > { %v16663_v15 = vrot.slane %v16631_v14, 7  ;;  %v16632_v40 = vsel %vm16610_vm3, %v16599_v49, 0.0  ;;  %v16601_v1 = vmax.f32 %v17424_v19, 0.0  ;;  %v16621_v14 = vsel %vm16610_vm3, %v8451_v13, 0.0 }
 0x421   : > { %v16633_v56 = vsel %vm16610_vm3, %v16600_v24, 0.0  ;;  %v16664_v11 = vrot.slane %v16632_v40, 7 }
 0x422   : > { %v16695_v6 = vsel %vm16610_vm3, %v16615_v35, %v16663_v15  ;;  %v16665_v2 = vrot.slane %v16633_v56, 7  ;;  %v16634_v7 = vsel %vm16610_vm3, %v16601_v1, 0.0  ;;  %v16622_v15 = vsel %vm16610_vm3, %v8452_v42, 0.0 }
 0x423   : > { %v16696_v52 = vsel %vm16610_vm3, %v16616_v37, %v16664_v11  ;;  %v16666_v55 = vrot.slane %v16634_v7, 7  ;;  %v17382_v7 = vadd.f32 %v19272_v18, %v19537_v16 }
 0x424   : > { %v16697_v47 = vsel %vm16610_vm3, %v16617_v46, %v16665_v2  ;;  %v16739_v60 = vcombine.low %v16695_v6, %v16696_v52  ;;  %v17381_v2 = vadd.f32 %v19268_v8, %v19537_v16  ;;  %v17383_v52 = vadd.f32 %v19270_v9, %v19537_v16 }
 0x425   : > { %v16698_v63 = vsel %vm16610_vm3, %v16618_v4, %v16666_v55 }
 0x426   : > { %v16746_v57 = vrot.slane %v16739_v60, %v19557_v17  ;;  %v16747_v50 = vcombine.low %v16697_v47, %v16698_v63  ;;  %v17384_v47 = vadd.f32 %v19274_v25, %v19537_v16 }
 0x428   : > { %v16754_v21 = vrot.slane %v16747_v50, %v19557_v17 }
 0x42a   : > { %v16788_v51 = vcombine.low %v16746_v57, %v16754_v21  ;;  %v8453_v57 = vmax.f32 %v17381_v2, 0.0 }
 0x42c   : > { %v16802_v54 = vrot.slane %v16788_v51, %v19557_v17  ;;  %v8454_v51 = vmax.f32 %v17382_v7, 0.0 }
 0x42e   : > { %v16803_v0 = vcombine.low %v16795_v58, %v16802_v54  ;;  %v16804_v62 = vcombine.high %v16795_v58, %v16802_v54  ;;  %v8455_v54 = vmax.f32 %v17383_v52, 0.0 }
 0x430   : > { %16827 = vst [vmem:[%s19599_s15] sm:$0xff] %v16803_v0  ;;  %16828 = vst [vmem:[%s19599_s15 + $0x8] sm:$0xff] %v16804_v62  ;;  %v8456_v62 = vmax.f32 %v17384_v47, 0.0 }
 0x44a   : > { %v15116_v59 = vpop.f32.mrb[44].mxu0 }
 0x44b   : > { %v17425_v39 = vadd.f32 %v15116_v59, %v19537_v16  ;;  %v15118_v45 = vpop.f32.mrb[45].mxu0  ;;  %v16623_v59 = vsel %vm16610_vm3, %v8453_v57, 0.0 }
 0x44c   : > { %v15607_v10 = vpop.f32.mrb[44].mxu1  ;;  %v17426_v32 = vadd.f32 %v15118_v45, %v19537_v16  ;;  %v16624_v45 = vsel %vm16610_vm3, %v8454_v51, 0.0 }
 0x44d   : > { %v16602_v53 = vmax.f32 %v17425_v39, 0.0  ;;  %v17427_v31 = vadd.f32 %v15607_v10, %v19537_v16  ;;  %v15609_v22 = vpop.f32.mrb[45].mxu1 }
 0x44e   : > { %v16603_v33 = vmax.f32 %v17426_v32, 0.0  ;;  %v17428_v27 = vadd.f32 %v15609_v22, %v19537_v16  ;;  %v16625_v32 = vsel %vm16610_vm3, %v8455_v54, 0.0 }
 0x44f   : > { %v16635_v36 = vsel %vm16610_vm3, %v16602_v53, 0.0  ;;  %v16604_v61 = vmax.f32 %v17427_v31, 0.0  ;;  %v16626_v31 = vsel %vm16610_vm3, %v8456_v62, 0.0 }
 0x450   : > { %v16667_v43 = vrot.slane %v16635_v36, 7  ;;  %v16636_v12 = vsel %vm16610_vm3, %v16603_v33, 0.0  ;;  %v16605_v28 = vmax.f32 %v17428_v27, 0.0 }
 0x451   : > { %v16637_v48 = vsel %vm16610_vm3, %v16604_v61, 0.0  ;;  %v16668_v3 = vrot.slane %v16636_v12, 7 }
 0x452   : > { %v16699_v49 = vsel %vm16610_vm3, %v16619_v38, %v16667_v43  ;;  %v16669_v19 = vrot.slane %v16637_v48, 7  ;;  %v16638_v23 = vsel %vm16610_vm3, %v16605_v28, 0.0 }
 0x453   : > { %v16700_v24 = vsel %vm16610_vm3, %v16620_v20, %v16668_v3  ;;  %v16670_v44 = vrot.slane %v16638_v23, 7 }
 0x454   : > { %v16701_v40 = vsel %vm16610_vm3, %v16621_v14, %v16669_v19  ;;  %v16755_v1 = vcombine.low %v16699_v49, %v16700_v24 }
 0x455   : > { %v16702_v35 = vsel %vm16610_vm3, %v16622_v15, %v16670_v44 }
 0x456   : > { %v16762_v56 = vrot.slane %v16755_v1, %v19557_v17  ;;  %v16763_v11 = vcombine.low %v16701_v40, %v16702_v35 }
 0x458   : > { %v16770_v37 = vrot.slane %v16763_v11, %v19557_v17 }
 0x45a   : > { %v16805_v6 = vcombine.low %v16762_v56, %v16770_v37 }
 0x45c   : > { %v16813_v42 = vrot.slane %v16805_v6, %v19557_v17 }
 0x47a   : > { %v16098_v46 = vpop.f32.mrb[46].mxu0 }
 0x47b   : > { %v17429_v55 = vadd.f32 %v16098_v46, %v19537_v16  ;;  %v16100_v4 = vpop.f32.mrb[47].mxu0 }
 0x47c   : > { %v16589_v60 = vpop.f32.mrb[46].mxu1  ;;  %v17430_v63 = vadd.f32 %v16100_v4, %v19537_v16 }
 0x47d   : > { %v16606_v50 = vmax.f32 %v17429_v55, 0.0  ;;  %v17431_v8 = vadd.f32 %v16589_v60, %v19537_v16  ;;  %v16591_v21 = vpop.f32.mrb[47].mxu1 }
 0x47e   : > { %v16607_v18 = vmax.f32 %v17430_v63, 0.0  ;;  %v17432_v58 = vadd.f32 %v16591_v21, %v19537_v16 }
 0x47f   : > { %v16639_v9 = vsel %vm16610_vm3, %v16606_v50, 0.0  ;;  %v16608_v0 = vmax.f32 %v17431_v8, 0.0 }
 0x480   : > { %v16671_v5 = vrot.slane %v16639_v9, 7  ;;  %v16640_v25 = vsel %vm16610_vm3, %v16607_v18, 0.0  ;;  %v16609_v30 = vmax.f32 %v17432_v58, 0.0 }
 0x481   : > { %v16641_v29 = vsel %vm16610_vm3, %v16608_v0, 0.0  ;;  %v16672_v39 = vrot.slane %v16640_v25, 7 }
 0x482   : > { %v16703_v34 = vsel %vm16610_vm3, %v16623_v59, %v16671_v5  ;;  %v16673_v10 = vrot.slane %v16641_v29, 7  ;;  %v16642_v16 = vsel %vm16610_vm3, %v16609_v30, 0.0 }
 0x483   : > { %v16704_v41 = vsel %vm16610_vm3, %v16624_v45, %v16672_v39  ;;  %v16674_v53 = vrot.slane %v16642_v16, 7 }
 0x484   : > { %v16705_v22 = vsel %vm16610_vm3, %v16625_v32, %v16673_v10  ;;  %v16771_v26 = vcombine.low %v16703_v34, %v16704_v41 }
 0x485   : > { %v16706_v33 = vsel %vm16610_vm3, %v16626_v31, %v16674_v53 }
 0x486   : > { %v16778_v27 = vrot.slane %v16771_v26, %v19557_v17  ;;  %v16779_v13 = vcombine.low %v16705_v22, %v16706_v33 }
 0x488   : > { %v16786_v36 = vrot.slane %v16779_v13, %v19557_v17 }
 0x48a   : > { %v16806_v61 = vcombine.low %v16778_v27, %v16786_v36 }
 0x48c   : > { %v16820_v43 = vrot.slane %v16806_v61, %v19557_v17 }
 0x48e   : > { %v16821_v12 = vcombine.low %v16813_v42, %v16820_v43  ;;  %v16822_v28 = vcombine.high %v16813_v42, %v16820_v43 }
 0x490   : > { %16829 = vst [vmem:[%s19599_s15 + $0x10] sm:$0xff] %v16821_v12  ;;  %16830 = vst [vmem:[%s19599_s15 + $0x18] sm:$0xff] %v16822_v28 }
 0x491 PF: > { %s17_s22 = sadd.s32 1, %s17964_s22   ;;  %s19674_s20 = smov %s17960_s21 }
 0x492   : > { %p14_p5 = scmp.ge.s32.totalorder %s17_s22, 4   ;;  %s19675_s21 = smov %s19677_s4 }
 0x494   :  { %16 = sbr.rel (!%p14_p5) target bundleno = 3 (0x3), region = 71 }

</bundles_post_ra>
